<compile_context>
chip_gen: v7x
topology: tpu7x:2x2x1
jax: 0.10.0
libtpu: 0.0.40
codegen_flags: <defaults>
</compile_context>

<pallas_src>
import math

import jax
import jax.numpy as jnp
from jax import lax
from jax.experimental import pallas as pl
from jax.experimental.pallas import tpu as pltpu


_FULL_UNROLL_MAX_T = 32     # fully unroll the wavefront loop for small T
_STEADY_UNROLL = 8          # partial unroll of the steady-state fori_loop


# ---------------------------------------------------------------------------
# Fused kernel: wavefront-pipelined stacked LSTMs + heads + domain classifier.
# ---------------------------------------------------------------------------
def _build_fused_kernel(T, B, Dp, H, n_layers, T_out, d_output, d_dim,
                        full_unroll):
    H4 = 4 * H
    n_fore = n_layers - 1
    n_in = 1 + 3 * n_layers + 2 + 6
    n_steps = T + n_layers - 1

    def kernel(*refs):
        x_ref = refs[0]
        lstm_refs = refs[1:1 + 3 * n_layers]
        head_w_ref, head_b_ref = refs[1 + 3 * n_layers:3 + 3 * n_layers]
        (dc_w1_ref, dc_b1_ref, dc_g_ref, dc_be_ref,
         dc_w2_ref, dc_b2_ref) = refs[3 + 3 * n_layers:n_in]
        loc_scale_ref, dhat_ref = refs[n_in:n_in + 2]
        xp_scr, feat_scr, fore_scr = refs[n_in + 2:]

        # ------ hoisted non-recurrent projection of the feature LSTM ------
        # One fat (T*B, Dp) x (Dp, 4H) matmul off the serial critical path,
        # bias folded in.  xp_scr is lane-dense (4H = 128 lanes for H = 32).
        xp_scr[...] = (
            jnp.dot(x_ref[...].reshape(T * B, Dp), lstm_refs[0][...],
                    preferred_element_type=jnp.float32) + lstm_refs[2][...]
        ).reshape(T, B, H4)

        # Recurrent weights hoisted into vregs (small H; for H >= 128 move
        # these loads into the step loop to bound vreg live ranges).
        w_hh0 = lstm_refs[1][...]
        fore_w = [(lstm_refs[3 * l][...], lstm_refs[3 * l + 1][...],
                   lstm_refs[3 * l + 2][...]) for l in range(1, n_layers)]

        def lstm_gates(gates, c_prev):
            # Gate columns were permuted wrapper-side to [i | f | o | g]:
            # ONE sigmoid over 3H contiguous lanes + ONE tanh over H lanes
            # (3 EUP dispatches per step incl. tanh(c_new) instead of 5).
            sig = jax.nn.sigmoid(gates[:, :3 * H])
            g_g = jnp.tanh(gates[:, 3 * H:])
            i_g = sig[:, :H]
            f_g = sig[:, H:2 * H]
            o_g = sig[:, 2 * H:3 * H]
            c_new = f_g * c_prev + i_g * g_g
            h_new = o_g * jnp.tanh(c_new)
            return h_new, c_new

        def wave_step(s, hs, cs, concrete):
            """One wavefront step: layer l advances to timestep t = s - l.

            Every layer reads only the PREVIOUS step's hidden states (hs),
            so the n_layers updates within a step are mutually independent
            and the MXU/EUP pipelines see n_layers concurrent chains instead
            of one serial chain."""
            new_hs = list(hs)
            new_cs = list(cs)

            # ---- feature LSTM (layer 0), t = s ---------------------------
            if (not concrete) or (0 <= s < T):
                gates0 = xp_scr[s] + jnp.dot(
                    hs[0], w_hh0, preferred_element_type=jnp.float32)
                h0, c0 = lstm_gates(gates0, cs[0])
                feat_scr[s] = h0        # full-T history for the domain head
                new_hs[0], new_cs[0] = h0, c0

            # ---- forecast LSTMs: layer l consumes h_{l-1, t} from hs -----
            for l in range(1, n_layers):
                t_l = s - l
                if concrete and not (0 <= t_l < T):
                    continue
                wih_l, whh_l, b_l = fore_w[l - 1]
                # Per-step input projection (wavefront schedule: no hoisted
                # full-T projection and no full-T history for layers > 0).
                # TODO(synk): on v7x keep whh_l resident in MXU staging
                # (pltpu.matmul_push_rhs) and fold the adds into the MRB
                # accumulate.
                gates = (jnp.dot(hs[l - 1], wih_l,
                                 preferred_element_type=jnp.float32)
                         + jnp.dot(hs[l], whh_l,
                                   preferred_element_type=jnp.float32)
                         + b_l)
                h_l, c_l = lstm_gates(gates, cs[l])
                new_hs[l], new_cs[l] = h_l, c_l

                # Only the last T_out timesteps of each forecast layer are
                # ever read again (loc/scale heads) -> store only those.
                dst = (l - 1) * T_out + (t_l - (T - T_out))
                if concrete:
                    if t_l >= T - T_out:
                        fore_scr[dst] = h_l
                else:
                    @pl.when(t_l >= T - T_out)
                    def _(dst=dst, h_l=h_l):
                        fore_scr[dst] = h_l
            return new_hs, new_cs

        hs = [jnp.zeros((B, H), jnp.float32) for _ in range(n_layers)]
        cs = [jnp.zeros((B, H), jnp.float32) for _ in range(n_layers)]

        if full_unroll:
            # Small T: fully unrolled wavefront (static indices, lets the
            # scheduler interleave all layers' matmul/EUP chains).
            for s in range(n_steps):
                hs, cs = wave_step(s, hs, cs, concrete=True)
        else:
            # Large T: unrolled prologue / epilogue + partially unrolled
            # steady-state loop (all layers active, no layer conditionals).
            for s in range(n_layers - 1):
                hs, cs = wave_step(s, hs, cs, concrete=True)

            def body(s, carry):
                bhs, bcs = carry
                nhs, ncs = wave_step(s, list(bhs), list(bcs), concrete=False)
                return (tuple(nhs), tuple(ncs))

            hs, cs = lax.fori_loop(n_layers - 1, T, body,
                                   (tuple(hs), tuple(cs)),
                                   unroll=_STEADY_UNROLL)
            hs, cs = list(hs), list(cs)
            for s in range(T, n_steps):
                hs, cs = wave_step(s, hs, cs, concrete=True)

        # ------ loc & scale heads: one fused, lane-dense output -----------
        head = (jnp.zeros((T_out * B, 2 * d_output), jnp.float32)
                + head_b_ref[...])
        for l in range(n_fore):
            out_l = fore_scr[pl.ds(l * T_out, T_out)].reshape(T_out * B, H)
            w_l = head_w_ref[pl.ds(l * H, H), :]
            head = head + jnp.dot(out_l, w_l,
                                  preferred_element_type=jnp.float32)
        cols = lax.broadcasted_iota(jnp.int32, (T_out * B, 2 * d_output), 1)
        # columns [0, d_output) hold loc; [d_output, 2*d_output) hold scale.
        loc_scale = jnp.where(cols < d_output, head,
                              jax.nn.softplus(head) + 1e-6)
        loc_scale_ref[...] = loc_scale.reshape(T_out, B, 2 * d_output)

        # ------ domain classifier: Linear -> BN(train) -> ReLU -> Linear --
        feat2d = feat_scr[...].reshape(T * B, H)
        z = jnp.dot(feat2d, dc_w1_ref[...],
                    preferred_element_type=jnp.float32) + dc_b1_ref[...]
        # Single-pass batch statistics (biased variance, matching BN train).
        inv_n = 1.0 / float(T * B)
        mean = jnp.sum(z, axis=0, keepdims=True) * inv_n
        ex2 = jnp.sum(z * z, axis=0, keepdims=True) * inv_n
        var = ex2 - mean * mean
        zn = (z - mean) * lax.rsqrt(var + 1e-5)
        zn = zn * dc_g_ref[...] + dc_be_ref[...]
        a = jnp.maximum(zn, 0.0)
        dhat = jnp.dot(a, dc_w2_ref[...],
                       preferred_element_type=jnp.float32) + dc_b2_ref[...]
        # time-mean of logits (matches d_hat.view(T,B,-1).mean(0) in PyTorch)
        dhat_ref[...] = jnp.mean(dhat.reshape(T, B, d_dim), axis=0)

    return kernel


def fused_deepar_kernel(inputs, lstm_weights, head_w, head_b, dc_params,
                        d_outputseqlen):
    T, B, Dp = inputs.shape
    H = lstm_weights[0][1].shape[0]
    n_layers = len(lstm_weights)
    d_output = head_w.shape[1] // 2
    d_dim = dc_params[4].shape[1]
    T_out = int(d_outputseqlen)

    full_unroll = (T <= _FULL_UNROLL_MAX_T) or (T < n_layers)
    kernel = _build_fused_kernel(T, B, Dp, H, n_layers, T_out, d_output,
                                 d_dim, full_unroll)

    args = [inputs]
    for (wih, whh, b) in lstm_weights:
        args += [wih, whh, b]
    args += [head_w, head_b]
    args += list(dc_params)

    out_shape = (
        jax.ShapeDtypeStruct((T_out, B, 2 * d_output), jnp.float32),  # [loc|scale]
        jax.ShapeDtypeStruct((B, d_dim), jnp.float32),                # d_hat mean
    )
    scratch_shapes = [
        pltpu.VMEM((T, B, 4 * H), jnp.float32),                   # hoisted x@W_ih0
        pltpu.VMEM((T, B, H), jnp.float32),                       # feature history
        pltpu.VMEM(((n_layers - 1) * T_out, B, H), jnp.float32),  # forecast tails
    ]

    # Explicit VMEM budget: inputs, weights, outputs and scratch are all
    # resident (grid-less call); 2x headroom, clamped below the v7x ceiling.
    f32 = 4
    n_bytes = sum(math.prod(a.shape) * f32 for a in args)
    n_bytes += sum(math.prod(s.shape) * f32 for s in out_shape)
    n_bytes += sum(math.prod(s) * f32
                   for s in ((T, B, 4 * H), (T, B, H),
                             ((n_layers - 1) * T_out, B, H)))
    vmem_limit = int(min(max(2 * n_bytes, 4 << 20), 48 << 20))

    # TODO(synk): on v7x, split the batch over the 2 TensorCores (grid axis
    # with dimension_semantics=("parallel",) or pl.core_map); the BatchNorm
    # statistics in the domain head must then be reduced across cores to
    # keep numerics identical to the PyTorch reference.
    return pl.pallas_call(
        kernel,
        out_shape=out_shape,
        scratch_shapes=scratch_shapes,
        compiler_params=pltpu.CompilerParams(vmem_limit_bytes=vmem_limit),
    )(*args)


# ---------------------------------------------------------------------------
# Parameter construction (deterministic, in-script).  Gate columns are in
# PyTorch order [i, f, g, o]; the wrapper permutes them for the kernel.
# ---------------------------------------------------------------------------
def init_params(key, d_lag, d_cov, d_emb, d_dim, d_output, d_hidden, N):
    keys = iter(jax.random.split(key, 64))

    def rnd(shape, scale=0.1):
        return (scale * jax.random.normal(next(keys), shape)).astype(jnp.float32)

    params = {}
    params["emb"] = [rnd((int(d_emb[i][0]), int(d_emb[i][1])))
                     for i in range(len(d_emb))]
    d_emb_tot = int(sum(e[1] for e in d_emb)) if len(d_emb) else 0
    d_in = d_lag + d_cov + d_emb_tot

    def lstm_params(din, H):
        return (rnd((din, 4 * H)), rnd((H, 4 * H)), rnd((1, 4 * H)))

    params["feature_lstm"] = lstm_params(d_in, d_hidden)
    params["forecast_lstms"] = [lstm_params(d_hidden, d_hidden)
                                for _ in range(N - 1)]

    dh_cat = d_hidden * (N - 1)
    params["loc_w"] = rnd((dh_cat, d_output))
    params["loc_b"] = rnd((1, d_output))
    params["scale_w"] = rnd((dh_cat, d_output))
    params["scale_b"] = rnd((1, d_output))

    params["dc_w1"] = rnd((d_hidden, d_hidden))
    params["dc_b1"] = rnd((1, d_hidden))
    params["dc_gamma"] = jnp.ones((1, d_hidden), jnp.float32)
    params["dc_beta"] = jnp.zeros((1, d_hidden), jnp.float32)
    params["dc_w2"] = rnd((d_hidden, d_dim))
    params["dc_b2"] = rnd((1, d_dim))
    return params


# ---------------------------------------------------------------------------
# Full forward pass (embedding gathers, weight prep and scalar losses are
# tiny JAX glue; everything else runs in the single fused Pallas kernel).
# ---------------------------------------------------------------------------
def _permute_gate_columns(w, H):
    """PyTorch LSTM gate order [i, f, g, o] -> kernel order [i, f, o, g].

    Wrapper-side (free) permutation so the kernel applies one fused sigmoid
    over the first 3H gate columns and one tanh over the last H."""
    return jnp.concatenate(
        [w[..., :2 * H], w[..., 3 * H:], w[..., 2 * H:3 * H]], axis=-1)


def deepar_dann_forward(params, X_emb, X_cov, X_lag, y, d_outputseqlen,
                        domain, alpha=1.0):
    dim_seq = X_lag.shape[0]

    # Embedding lookups (gather) — glue.
    x_emb = [tbl[X_emb[:, :, i]] for i, tbl in enumerate(params["emb"])]
    if x_emb:
        x_emb = jnp.concatenate(x_emb, axis=-1)
        inputs = jnp.concatenate(
            [X_lag, X_cov[:dim_seq], x_emb[:dim_seq]], axis=-1)
    else:
        inputs = jnp.concatenate([X_lag, X_cov[:dim_seq]], axis=-1)

    H = params["feature_lstm"][1].shape[0]

    # --- wrapper-side weight prep (traced once under jit, negligible) -----
    # 1) permute gate columns for the fused-nonlinearity layout.
    lstm_weights = []
    for (wih, whh, b) in [params["feature_lstm"]] + list(params["forecast_lstms"]):
        lstm_weights.append((_permute_gate_columns(wih, H),
                             _permute_gate_columns(whh, H),
                             _permute_gate_columns(b, H)))
    # 2) pad the feature-LSTM input dim to a multiple of 8 (sublane alignment
    #    for the hoisted projection matmul); zero rows contribute nothing.
    d_in = inputs.shape[-1]
    d_pad = ((d_in + 7) // 8) * 8
    if d_pad != d_in:
        inputs = jnp.pad(inputs, ((0, 0), (0, 0), (0, d_pad - d_in)))
        wih0, whh0, b0 = lstm_weights[0]
        lstm_weights[0] = (jnp.pad(wih0, ((0, d_pad - d_in), (0, 0))), whh0, b0)
    # 3) fuse the loc / scale heads into a single lane-dense output head.
    head_w = jnp.concatenate([params["loc_w"], params["scale_w"]], axis=1)
    head_b = jnp.concatenate([params["loc_b"], params["scale_b"]], axis=1)
    dc_params = (params["dc_w1"], params["dc_b1"], params["dc_gamma"],
                 params["dc_beta"], params["dc_w2"], params["dc_b2"])
    # TODO(synk): on v6e/v7x cast matmul operands to bfloat16 (f32 accumulate);
    # kept f32 here to stay numerically comparable to the PyTorch reference.

    loc_scale, d_hat = fused_deepar_kernel(
        inputs, lstm_weights, head_w, head_b, dc_params, d_outputseqlen)
    d_output = params["loc_w"].shape[1]
    y_hat_loc = loc_scale[..., :d_output]
    y_hat_scale = loc_scale[..., d_output:]

    # Domain cross-entropy (training branch); ReverseLayerF is identity fwd.
    d_target = jnp.argmax(domain, axis=1)                     # (B,)
    logz = jax.scipy.special.logsumexp(d_hat, axis=1)
    picked = jnp.take_along_axis(d_hat, d_target[:, None], axis=1)[:, 0]
    loss_d = jnp.mean(logz - picked)                          # F.cross_entropy

    # Gaussian NLL on the forecast window.
    y_out = y[-d_outputseqlen:]
    log_prob = (-0.5 * ((y_out - y_hat_loc) / y_hat_scale) ** 2
                - jnp.log(y_hat_scale) - 0.5 * math.log(2.0 * math.pi))
    loss_y = -jnp.mean(log_prob)

    total_loss = loss_d + loss_y
    y_hat_distr = (y_hat_loc, y_hat_scale)   # Normal(loc, scale) parameters
    return total_loss, loss_y, y_hat_distr, y_hat_loc, y_hat_scale


_forward_jit = jax.jit(deepar_dann_forward, static_argnums=(5,))


# ---------------------------------------------------------------------------
if __name__ == "__main__":
    # Module hyper-parameters (small, consistent with the forward pass).
    d_lag, d_cov = 3, 2
    d_emb = [[5, 3], [7, 2]]          # (num_embeddings, embedding_dim) rows
    d_dim = 3                          # number of domains
    d_output = 2
    d_hidden = 32
    dropout = 0.0                      # deterministic forward
    N = 3                              # 1 feature LSTM + (N-1) forecast LSTMs

    seq, batch = 8, 8
    d_outputseqlen = 4

    key = jax.random.PRNGKey(0)
    k_par, k_emb, k_cov, k_lag, k_y, k_dom = jax.random.split(key, 6)

    params = init_params(k_par, d_lag, d_cov, d_emb, d_dim, d_output,
                         d_hidden, N)

    X_emb = jax.random.randint(
        k_emb, (seq, batch, len(d_emb)), 0, 5).astype(jnp.int32)
    X_cov = jax.random.normal(k_cov, (seq, batch, d_cov), jnp.float32)
    X_lag = jax.random.normal(k_lag, (seq, batch, d_lag), jnp.float32)
    y = jax.random.normal(k_y, (seq, batch, d_output), jnp.float32)
    domain = jax.nn.one_hot(
        jax.random.randint(k_dom, (batch,), 0, d_dim), d_dim,
        dtype=jnp.float32)

    out = _forward_jit(params, X_emb, X_cov, X_lag, y,
                       d_outputseqlen, domain, 1.0)
    total_loss, loss_y, _, y_hat_loc, y_hat_scale = out
    jax.block_until_ready(total_loss)
    jax.block_until_ready(y_hat_loc)
    jax.block_until_ready(y_hat_scale)
    print("KERNEL_OK")
</pallas_src>

<mosaic_0001>
module attributes {stable_mosaic.version = 11 : i64} {
  func.func @kernel(%arg0: memref<8x8x16xf32, #tpu.memory_space<vmem>>, %arg1: memref<16x128xf32, #tpu.memory_space<vmem>>, %arg2: memref<32x128xf32, #tpu.memory_space<vmem>>, %arg3: memref<1x128xf32, #tpu.memory_space<vmem>>, %arg4: memref<32x128xf32, #tpu.memory_space<vmem>>, %arg5: memref<32x128xf32, #tpu.memory_space<vmem>>, %arg6: memref<1x128xf32, #tpu.memory_space<vmem>>, %arg7: memref<32x128xf32, #tpu.memory_space<vmem>>, %arg8: memref<32x128xf32, #tpu.memory_space<vmem>>, %arg9: memref<1x128xf32, #tpu.memory_space<vmem>>, %arg10: memref<64x4xf32, #tpu.memory_space<vmem>>, %arg11: memref<1x4xf32, #tpu.memory_space<vmem>>, %arg12: memref<32x32xf32, #tpu.memory_space<vmem>>, %arg13: memref<1x32xf32, #tpu.memory_space<vmem>>, %arg14: memref<1x32xf32, #tpu.memory_space<vmem>>, %arg15: memref<1x32xf32, #tpu.memory_space<vmem>>, %arg16: memref<32x3xf32, #tpu.memory_space<vmem>>, %arg17: memref<1x3xf32, #tpu.memory_space<vmem>>, %arg18: memref<4x8x4xf32, #tpu.memory_space<vmem>>, %arg19: memref<8x3xf32, #tpu.memory_space<vmem>>, %arg20: memref<8x8x128xf32, #tpu.memory_space<vmem>>, %arg21: memref<8x8x32xf32, #tpu.memory_space<vmem>>, %arg22: memref<8x8x32xf32, #tpu.memory_space<vmem>>) attributes {dimension_semantics = [], scalar_prefetch = 0 : i64, scratch_operands = 3 : i64, tpu.core_type = #tpu.core_type<tc>} {
    %c0 = arith.constant 0 : index
    %c0_0 = arith.constant 0 : index
    %c0_1 = arith.constant 0 : index
    %0 = vector.load %arg0[%c0, %c0_0, %c0_1] : memref<8x8x16xf32, #tpu.memory_space<vmem>>, vector<8x8x16xf32>
    %1 = vector.shape_cast %0 : vector<8x8x16xf32> to vector<64x16xf32>
    %c0_2 = arith.constant 0 : index
    %c0_3 = arith.constant 0 : index
    %2 = vector.load %arg1[%c0_2, %c0_3] : memref<16x128xf32, #tpu.memory_space<vmem>>, vector<16x128xf32>
    %cst = arith.constant dense<0.000000e+00> : vector<64x128xf32>
    %3 = tpu.matmul %1, %2, %cst {dimension_numbers = #tpu.dot_dimension_numbers<[1], [0], [0], [1], [0, 0, 1, 1], [], []>} : vector<64x16xf32>, vector<16x128xf32>, vector<64x128xf32> -> vector<64x128xf32>
    %c0_4 = arith.constant 0 : index
    %c0_5 = arith.constant 0 : index
    %4 = vector.load %arg3[%c0_4, %c0_5] : memref<1x128xf32, #tpu.memory_space<vmem>>, vector<1x128xf32>
    %5 = vector.broadcast %4 : vector<1x128xf32> to vector<64x128xf32>
    %6 = arith.addf %3, %5 : vector<64x128xf32>
    %7 = vector.shape_cast %6 : vector<64x128xf32> to vector<8x8x128xf32>
    %c0_6 = arith.constant 0 : index
    %c0_7 = arith.constant 0 : index
    %c0_8 = arith.constant 0 : index
    %8 = vector.load %arg20[%c0_6, %c0_7, %c0_8] : memref<8x8x128xf32, #tpu.memory_space<vmem>>, vector<8x8x128xf32>
    tpu.vector_store %arg20[%c0_6, %c0_7, %c0_8], %7 {strides = array<i32>} : memref<8x8x128xf32, #tpu.memory_space<vmem>>, vector<8x8x128xf32>,
    %c0_9 = arith.constant 0 : index
    %c0_10 = arith.constant 0 : index
    %9 = vector.load %arg2[%c0_9, %c0_10] : memref<32x128xf32, #tpu.memory_space<vmem>>, vector<32x128xf32>
    %c0_11 = arith.constant 0 : index
    %c0_12 = arith.constant 0 : index
    %10 = vector.load %arg4[%c0_11, %c0_12] : memref<32x128xf32, #tpu.memory_space<vmem>>, vector<32x128xf32>
    %c0_13 = arith.constant 0 : index
    %c0_14 = arith.constant 0 : index
    %11 = vector.load %arg5[%c0_13, %c0_14] : memref<32x128xf32, #tpu.memory_space<vmem>>, vector<32x128xf32>
    %c0_15 = arith.constant 0 : index
    %c0_16 = arith.constant 0 : index
    %12 = vector.load %arg6[%c0_15, %c0_16] : memref<1x128xf32, #tpu.memory_space<vmem>>, vector<1x128xf32>
    %c0_17 = arith.constant 0 : index
    %c0_18 = arith.constant 0 : index
    %13 = vector.load %arg7[%c0_17, %c0_18] : memref<32x128xf32, #tpu.memory_space<vmem>>, vector<32x128xf32>
    %c0_19 = arith.constant 0 : index
    %c0_20 = arith.constant 0 : index
    %14 = vector.load %arg8[%c0_19, %c0_20] : memref<32x128xf32, #tpu.memory_space<vmem>>, vector<32x128xf32>
    %c0_21 = arith.constant 0 : index
    %c0_22 = arith.constant 0 : index
    %15 = vector.load %arg9[%c0_21, %c0_22] : memref<1x128xf32, #tpu.memory_space<vmem>>, vector<1x128xf32>
    %cst_23 = arith.constant 0.000000e+00 : f32
    %16 = vector.broadcast %cst_23 : f32 to vector<8x32xf32>
    %cst_24 = arith.constant 0.000000e+00 : f32
    %17 = vector.broadcast %cst_24 : f32 to vector<8x32xf32>
    %cst_25 = arith.constant 0.000000e+00 : f32
    %18 = vector.broadcast %cst_25 : f32 to vector<8x32xf32>
    %cst_26 = arith.constant 0.000000e+00 : f32
    %19 = vector.broadcast %cst_26 : f32 to vector<8x32xf32>
    %cst_27 = arith.constant 0.000000e+00 : f32
    %20 = vector.broadcast %cst_27 : f32 to vector<8x32xf32>
    %cst_28 = arith.constant 0.000000e+00 : f32
    %21 = vector.broadcast %cst_28 : f32 to vector<8x32xf32>
    %c0_29 = arith.constant 0 : index
    %c0_30 = arith.constant 0 : index
    %c0_31 = arith.constant 0 : index
    %22 = vector.load %arg20[%c0_29, %c0_30, %c0_31] : memref<8x8x128xf32, #tpu.memory_space<vmem>>, vector<1x8x128xf32>
    %23 = vector.shape_cast %22 : vector<1x8x128xf32> to vector<8x128xf32>
    %cst_32 = arith.constant dense<0.000000e+00> : vector<8x128xf32>
    %24 = tpu.matmul %16, %9, %cst_32 {dimension_numbers = #tpu.dot_dimension_numbers<[1], [0], [0], [1], [0, 0, 1, 1], [], []>} : vector<8x32xf32>, vector<32x128xf32>, vector<8x128xf32> -> vector<8x128xf32>
    %25 = arith.addf %23, %24 : vector<8x128xf32>
    %26 = vector.extract_strided_slice %25 {offsets = [0, 0], sizes = [8, 96], strides = [1, 1]} : vector<8x128xf32> to vector<8x96xf32>
    %27 = arith.negf %26 : vector<8x96xf32>
    %28 = math.exp %27 : vector<8x96xf32>
    %cst_33 = arith.constant 1.000000e+00 : f32
    %29 = vector.broadcast %cst_33 : f32 to vector<8x96xf32>
    %30 = arith.addf %29, %28 : vector<8x96xf32>
    %31 = arith.divf %29, %30 : vector<8x96xf32>
    %32 = vector.extract_strided_slice %25 {offsets = [0, 96], sizes = [8, 32], strides = [1, 1]} : vector<8x128xf32> to vector<8x32xf32>
    %33 = math.tanh %32 : vector<8x32xf32>
    %34 = vector.extract_strided_slice %31 {offsets = [0, 0], sizes = [8, 32], strides = [1, 1]} : vector<8x96xf32> to vector<8x32xf32>
    %35 = vector.extract_strided_slice %31 {offsets = [0, 32], sizes = [8, 32], strides = [1, 1]} : vector<8x96xf32> to vector<8x32xf32>
    %36 = vector.extract_strided_slice %31 {offsets = [0, 64], sizes = [8, 32], strides = [1, 1]} : vector<8x96xf32> to vector<8x32xf32>
    %37 = arith.mulf %35, %19 : vector<8x32xf32>
    %38 = arith.mulf %34, %33 : vector<8x32xf32>
    %39 = arith.addf %37, %38 : vector<8x32xf32>
    %40 = math.tanh %39 : vector<8x32xf32>
    %41 = arith.mulf %36, %40 : vector<8x32xf32>
    %c0_34 = arith.constant 0 : index
    %c0_35 = arith.constant 0 : index
    %c0_36 = arith.constant 0 : index
    %42 = vector.load %arg21[%c0_34, %c0_35, %c0_36] : memref<8x8x32xf32, #tpu.memory_space<vmem>>, vector<1x8x32xf32>
    %43 = vector.shape_cast %42 : vector<1x8x32xf32> to vector<8x32xf32>
    %44 = vector.shape_cast %41 : vector<8x32xf32> to vector<1x8x32xf32>
    tpu.vector_store %arg21[%c0_34, %c0_35, %c0_36], %44 {strides = array<i32>} : memref<8x8x32xf32, #tpu.memory_space<vmem>>, vector<1x8x32xf32>,
    %c1 = arith.constant 1 : index
    %c0_37 = arith.constant 0 : index
    %c0_38 = arith.constant 0 : index
    %45 = vector.load %arg20[%c1, %c0_37, %c0_38] : memref<8x8x128xf32, #tpu.memory_space<vmem>>, vector<1x8x128xf32>
    %46 = vector.shape_cast %45 : vector<1x8x128xf32> to vector<8x128xf32>
    %cst_39 = arith.constant dense<0.000000e+00> : vector<8x128xf32>
    %47 = tpu.matmul %41, %9, %cst_39 {dimension_numbers = #tpu.dot_dimension_numbers<[1], [0], [0], [1], [0, 0, 1, 1], [], []>} : vector<8x32xf32>, vector<32x128xf32>, vector<8x128xf32> -> vector<8x128xf32>
    %48 = arith.addf %46, %47 : vector<8x128xf32>
    %49 = vector.extract_strided_slice %48 {offsets = [0, 0], sizes = [8, 96], strides = [1, 1]} : vector<8x128xf32> to vector<8x96xf32>
    %50 = arith.negf %49 : vector<8x96xf32>
    %51 = math.exp %50 : vector<8x96xf32>
    %cst_40 = arith.constant 1.000000e+00 : f32
    %52 = vector.broadcast %cst_40 : f32 to vector<8x96xf32>
    %53 = arith.addf %52, %51 : vector<8x96xf32>
    %54 = arith.divf %52, %53 : vector<8x96xf32>
    %55 = vector.extract_strided_slice %48 {offsets = [0, 96], sizes = [8, 32], strides = [1, 1]} : vector<8x128xf32> to vector<8x32xf32>
    %56 = math.tanh %55 : vector<8x32xf32>
    %57 = vector.extract_strided_slice %54 {offsets = [0, 0], sizes = [8, 32], strides = [1, 1]} : vector<8x96xf32> to vector<8x32xf32>
    %58 = vector.extract_strided_slice %54 {offsets = [0, 32], sizes = [8, 32], strides = [1, 1]} : vector<8x96xf32> to vector<8x32xf32>
    %59 = vector.extract_strided_slice %54 {offsets = [0, 64], sizes = [8, 32], strides = [1, 1]} : vector<8x96xf32> to vector<8x32xf32>
    %60 = arith.mulf %58, %39 : vector<8x32xf32>
    %61 = arith.mulf %57, %56 : vector<8x32xf32>
    %62 = arith.addf %60, %61 : vector<8x32xf32>
    %63 = math.tanh %62 : vector<8x32xf32>
    %64 = arith.mulf %59, %63 : vector<8x32xf32>
    %c1_41 = arith.constant 1 : index
    %c0_42 = arith.constant 0 : index
    %c0_43 = arith.constant 0 : index
    %65 = vector.load %arg21[%c1_41, %c0_42, %c0_43] : memref<8x8x32xf32, #tpu.memory_space<vmem>>, vector<1x8x32xf32>
    %66 = vector.shape_cast %65 : vector<1x8x32xf32> to vector<8x32xf32>
    %67 = vector.shape_cast %64 : vector<8x32xf32> to vector<1x8x32xf32>
    tpu.vector_store %arg21[%c1_41, %c0_42, %c0_43], %67 {strides = array<i32>} : memref<8x8x32xf32, #tpu.memory_space<vmem>>, vector<1x8x32xf32>,
    %cst_44 = arith.constant dense<0.000000e+00> : vector<8x128xf32>
    %68 = tpu.matmul %41, %10, %cst_44 {dimension_numbers = #tpu.dot_dimension_numbers<[1], [0], [0], [1], [0, 0, 1, 1], [], []>} : vector<8x32xf32>, vector<32x128xf32>, vector<8x128xf32> -> vector<8x128xf32>
    %cst_45 = arith.constant dense<0.000000e+00> : vector<8x128xf32>
    %69 = tpu.matmul %17, %11, %cst_45 {dimension_numbers = #tpu.dot_dimension_numbers<[1], [0], [0], [1], [0, 0, 1, 1], [], []>} : vector<8x32xf32>, vector<32x128xf32>, vector<8x128xf32> -> vector<8x128xf32>
    %70 = arith.addf %68, %69 : vector<8x128xf32>
    %71 = vector.broadcast %12 : vector<1x128xf32> to vector<8x128xf32>
    %72 = arith.addf %70, %71 : vector<8x128xf32>
    %73 = vector.extract_strided_slice %72 {offsets = [0, 0], sizes = [8, 96], strides = [1, 1]} : vector<8x128xf32> to vector<8x96xf32>
    %74 = arith.negf %73 : vector<8x96xf32>
    %75 = math.exp %74 : vector<8x96xf32>
    %cst_46 = arith.constant 1.000000e+00 : f32
    %76 = vector.broadcast %cst_46 : f32 to vector<8x96xf32>
    %77 = arith.addf %76, %75 : vector<8x96xf32>
    %78 = arith.divf %76, %77 : vector<8x96xf32>
    %79 = vector.extract_strided_slice %72 {offsets = [0, 96], sizes = [8, 32], strides = [1, 1]} : vector<8x128xf32> to vector<8x32xf32>
    %80 = math.tanh %79 : vector<8x32xf32>
    %81 = vector.extract_strided_slice %78 {offsets = [0, 0], sizes = [8, 32], strides = [1, 1]} : vector<8x96xf32> to vector<8x32xf32>
    %82 = vector.extract_strided_slice %78 {offsets = [0, 32], sizes = [8, 32], strides = [1, 1]} : vector<8x96xf32> to vector<8x32xf32>
    %83 = vector.extract_strided_slice %78 {offsets = [0, 64], sizes = [8, 32], strides = [1, 1]} : vector<8x96xf32> to vector<8x32xf32>
    %84 = arith.mulf %82, %20 : vector<8x32xf32>
    %85 = arith.mulf %81, %80 : vector<8x32xf32>
    %86 = arith.addf %84, %85 : vector<8x32xf32>
    %87 = math.tanh %86 : vector<8x32xf32>
    %88 = arith.mulf %83, %87 : vector<8x32xf32>
    %c2 = arith.constant 2 : index
    %c0_47 = arith.constant 0 : index
    %c0_48 = arith.constant 0 : index
    %89 = vector.load %arg20[%c2, %c0_47, %c0_48] : memref<8x8x128xf32, #tpu.memory_space<vmem>>, vector<1x8x128xf32>
    %90 = vector.shape_cast %89 : vector<1x8x128xf32> to vector<8x128xf32>
    %cst_49 = arith.constant dense<0.000000e+00> : vector<8x128xf32>
    %91 = tpu.matmul %64, %9, %cst_49 {dimension_numbers = #tpu.dot_dimension_numbers<[1], [0], [0], [1], [0, 0, 1, 1], [], []>} : vector<8x32xf32>, vector<32x128xf32>, vector<8x128xf32> -> vector<8x128xf32>
    %92 = arith.addf %90, %91 : vector<8x128xf32>
    %93 = vector.extract_strided_slice %92 {offsets = [0, 0], sizes = [8, 96], strides = [1, 1]} : vector<8x128xf32> to vector<8x96xf32>
    %94 = arith.negf %93 : vector<8x96xf32>
    %95 = math.exp %94 : vector<8x96xf32>
    %cst_50 = arith.constant 1.000000e+00 : f32
    %96 = vector.broadcast %cst_50 : f32 to vector<8x96xf32>
    %97 = arith.addf %96, %95 : vector<8x96xf32>
    %98 = arith.divf %96, %97 : vector<8x96xf32>
    %99 = vector.extract_strided_slice %92 {offsets = [0, 96], sizes = [8, 32], strides = [1, 1]} : vector<8x128xf32> to vector<8x32xf32>
    %100 = math.tanh %99 : vector<8x32xf32>
    %101 = vector.extract_strided_slice %98 {offsets = [0, 0], sizes = [8, 32], strides = [1, 1]} : vector<8x96xf32> to vector<8x32xf32>
    %102 = vector.extract_strided_slice %98 {offsets = [0, 32], sizes = [8, 32], strides = [1, 1]} : vector<8x96xf32> to vector<8x32xf32>
    %103 = vector.extract_strided_slice %98 {offsets = [0, 64], sizes = [8, 32], strides = [1, 1]} : vector<8x96xf32> to vector<8x32xf32>
    %104 = arith.mulf %102, %62 : vector<8x32xf32>
    %105 = arith.mulf %101, %100 : vector<8x32xf32>
    %106 = arith.addf %104, %105 : vector<8x32xf32>
    %107 = math.tanh %106 : vector<8x32xf32>
    %108 = arith.mulf %103, %107 : vector<8x32xf32>
    %c2_51 = arith.constant 2 : index
    %c0_52 = arith.constant 0 : index
    %c0_53 = arith.constant 0 : index
    %109 = vector.load %arg21[%c2_51, %c0_52, %c0_53] : memref<8x8x32xf32, #tpu.memory_space<vmem>>, vector<1x8x32xf32>
    %110 = vector.shape_cast %109 : vector<1x8x32xf32> to vector<8x32xf32>
    %111 = vector.shape_cast %108 : vector<8x32xf32> to vector<1x8x32xf32>
    tpu.vector_store %arg21[%c2_51, %c0_52, %c0_53], %111 {strides = array<i32>} : memref<8x8x32xf32, #tpu.memory_space<vmem>>, vector<1x8x32xf32>,
    %cst_54 = arith.constant dense<0.000000e+00> : vector<8x128xf32>
    %112 = tpu.matmul %64, %10, %cst_54 {dimension_numbers = #tpu.dot_dimension_numbers<[1], [0], [0], [1], [0, 0, 1, 1], [], []>} : vector<8x32xf32>, vector<32x128xf32>, vector<8x128xf32> -> vector<8x128xf32>
    %cst_55 = arith.constant dense<0.000000e+00> : vector<8x128xf32>
    %113 = tpu.matmul %88, %11, %cst_55 {dimension_numbers = #tpu.dot_dimension_numbers<[1], [0], [0], [1], [0, 0, 1, 1], [], []>} : vector<8x32xf32>, vector<32x128xf32>, vector<8x128xf32> -> vector<8x128xf32>
    %114 = arith.addf %112, %113 : vector<8x128xf32>
    %115 = vector.broadcast %12 : vector<1x128xf32> to vector<8x128xf32>
    %116 = arith.addf %114, %115 : vector<8x128xf32>
    %117 = vector.extract_strided_slice %116 {offsets = [0, 0], sizes = [8, 96], strides = [1, 1]} : vector<8x128xf32> to vector<8x96xf32>
    %118 = arith.negf %117 : vector<8x96xf32>
    %119 = math.exp %118 : vector<8x96xf32>
    %cst_56 = arith.constant 1.000000e+00 : f32
    %120 = vector.broadcast %cst_56 : f32 to vector<8x96xf32>
    %121 = arith.addf %120, %119 : vector<8x96xf32>
    %122 = arith.divf %120, %121 : vector<8x96xf32>
    %123 = vector.extract_strided_slice %116 {offsets = [0, 96], sizes = [8, 32], strides = [1, 1]} : vector<8x128xf32> to vector<8x32xf32>
    %124 = math.tanh %123 : vector<8x32xf32>
    %125 = vector.extract_strided_slice %122 {offsets = [0, 0], sizes = [8, 32], strides = [1, 1]} : vector<8x96xf32> to vector<8x32xf32>
    %126 = vector.extract_strided_slice %122 {offsets = [0, 32], sizes = [8, 32], strides = [1, 1]} : vector<8x96xf32> to vector<8x32xf32>
    %127 = vector.extract_strided_slice %122 {offsets = [0, 64], sizes = [8, 32], strides = [1, 1]} : vector<8x96xf32> to vector<8x32xf32>
    %128 = arith.mulf %126, %86 : vector<8x32xf32>
    %129 = arith.mulf %125, %124 : vector<8x32xf32>
    %130 = arith.addf %128, %129 : vector<8x32xf32>
    %131 = math.tanh %130 : vector<8x32xf32>
    %132 = arith.mulf %127, %131 : vector<8x32xf32>
    %cst_57 = arith.constant dense<0.000000e+00> : vector<8x128xf32>
    %133 = tpu.matmul %88, %13, %cst_57 {dimension_numbers = #tpu.dot_dimension_numbers<[1], [0], [0], [1], [0, 0, 1, 1], [], []>} : vector<8x32xf32>, vector<32x128xf32>, vector<8x128xf32> -> vector<8x128xf32>
    %cst_58 = arith.constant dense<0.000000e+00> : vector<8x128xf32>
    %134 = tpu.matmul %18, %14, %cst_58 {dimension_numbers = #tpu.dot_dimension_numbers<[1], [0], [0], [1], [0, 0, 1, 1], [], []>} : vector<8x32xf32>, vector<32x128xf32>, vector<8x128xf32> -> vector<8x128xf32>
    %135 = arith.addf %133, %134 : vector<8x128xf32>
    %136 = vector.broadcast %15 : vector<1x128xf32> to vector<8x128xf32>
    %137 = arith.addf %135, %136 : vector<8x128xf32>
    %138 = vector.extract_strided_slice %137 {offsets = [0, 0], sizes = [8, 96], strides = [1, 1]} : vector<8x128xf32> to vector<8x96xf32>
    %139 = arith.negf %138 : vector<8x96xf32>
    %140 = math.exp %139 : vector<8x96xf32>
    %cst_59 = arith.constant 1.000000e+00 : f32
    %141 = vector.broadcast %cst_59 : f32 to vector<8x96xf32>
    %142 = arith.addf %141, %140 : vector<8x96xf32>
    %143 = arith.divf %141, %142 : vector<8x96xf32>
    %144 = vector.extract_strided_slice %137 {offsets = [0, 96], sizes = [8, 32], strides = [1, 1]} : vector<8x128xf32> to vector<8x32xf32>
    %145 = math.tanh %144 : vector<8x32xf32>
    %146 = vector.extract_strided_slice %143 {offsets = [0, 0], sizes = [8, 32], strides = [1, 1]} : vector<8x96xf32> to vector<8x32xf32>
    %147 = vector.extract_strided_slice %143 {offsets = [0, 32], sizes = [8, 32], strides = [1, 1]} : vector<8x96xf32> to vector<8x32xf32>
    %148 = vector.extract_strided_slice %143 {offsets = [0, 64], sizes = [8, 32], strides = [1, 1]} : vector<8x96xf32> to vector<8x32xf32>
    %149 = arith.mulf %147, %21 : vector<8x32xf32>
    %150 = arith.mulf %146, %145 : vector<8x32xf32>
    %151 = arith.addf %149, %150 : vector<8x32xf32>
    %152 = math.tanh %151 : vector<8x32xf32>
    %153 = arith.mulf %148, %152 : vector<8x32xf32>
    %c3 = arith.constant 3 : index
    %c0_60 = arith.constant 0 : index
    %c0_61 = arith.constant 0 : index
    %154 = vector.load %arg20[%c3, %c0_60, %c0_61] : memref<8x8x128xf32, #tpu.memory_space<vmem>>, vector<1x8x128xf32>
    %155 = vector.shape_cast %154 : vector<1x8x128xf32> to vector<8x128xf32>
    %cst_62 = arith.constant dense<0.000000e+00> : vector<8x128xf32>
    %156 = tpu.matmul %108, %9, %cst_62 {dimension_numbers = #tpu.dot_dimension_numbers<[1], [0], [0], [1], [0, 0, 1, 1], [], []>} : vector<8x32xf32>, vector<32x128xf32>, vector<8x128xf32> -> vector<8x128xf32>
    %157 = arith.addf %155, %156 : vector<8x128xf32>
    %158 = vector.extract_strided_slice %157 {offsets = [0, 0], sizes = [8, 96], strides = [1, 1]} : vector<8x128xf32> to vector<8x96xf32>
    %159 = arith.negf %158 : vector<8x96xf32>
    %160 = math.exp %159 : vector<8x96xf32>
    %cst_63 = arith.constant 1.000000e+00 : f32
    %161 = vector.broadcast %cst_63 : f32 to vector<8x96xf32>
    %162 = arith.addf %161, %160 : vector<8x96xf32>
    %163 = arith.divf %161, %162 : vector<8x96xf32>
    %164 = vector.extract_strided_slice %157 {offsets = [0, 96], sizes = [8, 32], strides = [1, 1]} : vector<8x128xf32> to vector<8x32xf32>
    %165 = math.tanh %164 : vector<8x32xf32>
    %166 = vector.extract_strided_slice %163 {offsets = [0, 0], sizes = [8, 32], strides = [1, 1]} : vector<8x96xf32> to vector<8x32xf32>
    %167 = vector.extract_strided_slice %163 {offsets = [0, 32], sizes = [8, 32], strides = [1, 1]} : vector<8x96xf32> to vector<8x32xf32>
    %168 = vector.extract_strided_slice %163 {offsets = [0, 64], sizes = [8, 32], strides = [1, 1]} : vector<8x96xf32> to vector<8x32xf32>
    %169 = arith.mulf %167, %106 : vector<8x32xf32>
    %170 = arith.mulf %166, %165 : vector<8x32xf32>
    %171 = arith.addf %169, %170 : vector<8x32xf32>
    %172 = math.tanh %171 : vector<8x32xf32>
    %173 = arith.mulf %168, %172 : vector<8x32xf32>
    %c3_64 = arith.constant 3 : index
    %c0_65 = arith.constant 0 : index
    %c0_66 = arith.constant 0 : index
    %174 = vector.load %arg21[%c3_64, %c0_65, %c0_66] : memref<8x8x32xf32, #tpu.memory_space<vmem>>, vector<1x8x32xf32>
    %175 = vector.shape_cast %174 : vector<1x8x32xf32> to vector<8x32xf32>
    %176 = vector.shape_cast %173 : vector<8x32xf32> to vector<1x8x32xf32>
    tpu.vector_store %arg21[%c3_64, %c0_65, %c0_66], %176 {strides = array<i32>} : memref<8x8x32xf32, #tpu.memory_space<vmem>>, vector<1x8x32xf32>,
    %cst_67 = arith.constant dense<0.000000e+00> : vector<8x128xf32>
    %177 = tpu.matmul %108, %10, %cst_67 {dimension_numbers = #tpu.dot_dimension_numbers<[1], [0], [0], [1], [0, 0, 1, 1], [], []>} : vector<8x32xf32>, vector<32x128xf32>, vector<8x128xf32> -> vector<8x128xf32>
    %cst_68 = arith.constant dense<0.000000e+00> : vector<8x128xf32>
    %178 = tpu.matmul %132, %11, %cst_68 {dimension_numbers = #tpu.dot_dimension_numbers<[1], [0], [0], [1], [0, 0, 1, 1], [], []>} : vector<8x32xf32>, vector<32x128xf32>, vector<8x128xf32> -> vector<8x128xf32>
    %179 = arith.addf %177, %178 : vector<8x128xf32>
    %180 = vector.broadcast %12 : vector<1x128xf32> to vector<8x128xf32>
    %181 = arith.addf %179, %180 : vector<8x128xf32>
    %182 = vector.extract_strided_slice %181 {offsets = [0, 0], sizes = [8, 96], strides = [1, 1]} : vector<8x128xf32> to vector<8x96xf32>
    %183 = arith.negf %182 : vector<8x96xf32>
    %184 = math.exp %183 : vector<8x96xf32>
    %cst_69 = arith.constant 1.000000e+00 : f32
    %185 = vector.broadcast %cst_69 : f32 to vector<8x96xf32>
    %186 = arith.addf %185, %184 : vector<8x96xf32>
    %187 = arith.divf %185, %186 : vector<8x96xf32>
    %188 = vector.extract_strided_slice %181 {offsets = [0, 96], sizes = [8, 32], strides = [1, 1]} : vector<8x128xf32> to vector<8x32xf32>
    %189 = math.tanh %188 : vector<8x32xf32>
    %190 = vector.extract_strided_slice %187 {offsets = [0, 0], sizes = [8, 32], strides = [1, 1]} : vector<8x96xf32> to vector<8x32xf32>
    %191 = vector.extract_strided_slice %187 {offsets = [0, 32], sizes = [8, 32], strides = [1, 1]} : vector<8x96xf32> to vector<8x32xf32>
    %192 = vector.extract_strided_slice %187 {offsets = [0, 64], sizes = [8, 32], strides = [1, 1]} : vector<8x96xf32> to vector<8x32xf32>
    %193 = arith.mulf %191, %130 : vector<8x32xf32>
    %194 = arith.mulf %190, %189 : vector<8x32xf32>
    %195 = arith.addf %193, %194 : vector<8x32xf32>
    %196 = math.tanh %195 : vector<8x32xf32>
    %197 = arith.mulf %192, %196 : vector<8x32xf32>
    %cst_70 = arith.constant dense<0.000000e+00> : vector<8x128xf32>
    %198 = tpu.matmul %132, %13, %cst_70 {dimension_numbers = #tpu.dot_dimension_numbers<[1], [0], [0], [1], [0, 0, 1, 1], [], []>} : vector<8x32xf32>, vector<32x128xf32>, vector<8x128xf32> -> vector<8x128xf32>
    %cst_71 = arith.constant dense<0.000000e+00> : vector<8x128xf32>
    %199 = tpu.matmul %153, %14, %cst_71 {dimension_numbers = #tpu.dot_dimension_numbers<[1], [0], [0], [1], [0, 0, 1, 1], [], []>} : vector<8x32xf32>, vector<32x128xf32>, vector<8x128xf32> -> vector<8x128xf32>
    %200 = arith.addf %198, %199 : vector<8x128xf32>
    %201 = vector.broadcast %15 : vector<1x128xf32> to vector<8x128xf32>
    %202 = arith.addf %200, %201 : vector<8x128xf32>
    %203 = vector.extract_strided_slice %202 {offsets = [0, 0], sizes = [8, 96], strides = [1, 1]} : vector<8x128xf32> to vector<8x96xf32>
    %204 = arith.negf %203 : vector<8x96xf32>
    %205 = math.exp %204 : vector<8x96xf32>
    %cst_72 = arith.constant 1.000000e+00 : f32
    %206 = vector.broadcast %cst_72 : f32 to vector<8x96xf32>
    %207 = arith.addf %206, %205 : vector<8x96xf32>
    %208 = arith.divf %206, %207 : vector<8x96xf32>
    %209 = vector.extract_strided_slice %202 {offsets = [0, 96], sizes = [8, 32], strides = [1, 1]} : vector<8x128xf32> to vector<8x32xf32>
    %210 = math.tanh %209 : vector<8x32xf32>
    %211 = vector.extract_strided_slice %208 {offsets = [0, 0], sizes = [8, 32], strides = [1, 1]} : vector<8x96xf32> to vector<8x32xf32>
    %212 = vector.extract_strided_slice %208 {offsets = [0, 32], sizes = [8, 32], strides = [1, 1]} : vector<8x96xf32> to vector<8x32xf32>
    %213 = vector.extract_strided_slice %208 {offsets = [0, 64], sizes = [8, 32], strides = [1, 1]} : vector<8x96xf32> to vector<8x32xf32>
    %214 = arith.mulf %212, %151 : vector<8x32xf32>
    %215 = arith.mulf %211, %210 : vector<8x32xf32>
    %216 = arith.addf %214, %215 : vector<8x32xf32>
    %217 = math.tanh %216 : vector<8x32xf32>
    %218 = arith.mulf %213, %217 : vector<8x32xf32>
    %c4 = arith.constant 4 : index
    %c0_73 = arith.constant 0 : index
    %c0_74 = arith.constant 0 : index
    %219 = vector.load %arg20[%c4, %c0_73, %c0_74] : memref<8x8x128xf32, #tpu.memory_space<vmem>>, vector<1x8x128xf32>
    %220 = vector.shape_cast %219 : vector<1x8x128xf32> to vector<8x128xf32>
    %cst_75 = arith.constant dense<0.000000e+00> : vector<8x128xf32>
    %221 = tpu.matmul %173, %9, %cst_75 {dimension_numbers = #tpu.dot_dimension_numbers<[1], [0], [0], [1], [0, 0, 1, 1], [], []>} : vector<8x32xf32>, vector<32x128xf32>, vector<8x128xf32> -> vector<8x128xf32>
    %222 = arith.addf %220, %221 : vector<8x128xf32>
    %223 = vector.extract_strided_slice %222 {offsets = [0, 0], sizes = [8, 96], strides = [1, 1]} : vector<8x128xf32> to vector<8x96xf32>
    %224 = arith.negf %223 : vector<8x96xf32>
    %225 = math.exp %224 : vector<8x96xf32>
    %cst_76 = arith.constant 1.000000e+00 : f32
    %226 = vector.broadcast %cst_76 : f32 to vector<8x96xf32>
    %227 = arith.addf %226, %225 : vector<8x96xf32>
    %228 = arith.divf %226, %227 : vector<8x96xf32>
    %229 = vector.extract_strided_slice %222 {offsets = [0, 96], sizes = [8, 32], strides = [1, 1]} : vector<8x128xf32> to vector<8x32xf32>
    %230 = math.tanh %229 : vector<8x32xf32>
    %231 = vector.extract_strided_slice %228 {offsets = [0, 0], sizes = [8, 32], strides = [1, 1]} : vector<8x96xf32> to vector<8x32xf32>
    %232 = vector.extract_strided_slice %228 {offsets = [0, 32], sizes = [8, 32], strides = [1, 1]} : vector<8x96xf32> to vector<8x32xf32>
    %233 = vector.extract_strided_slice %228 {offsets = [0, 64], sizes = [8, 32], strides = [1, 1]} : vector<8x96xf32> to vector<8x32xf32>
    %234 = arith.mulf %232, %171 : vector<8x32xf32>
    %235 = arith.mulf %231, %230 : vector<8x32xf32>
    %236 = arith.addf %234, %235 : vector<8x32xf32>
    %237 = math.tanh %236 : vector<8x32xf32>
    %238 = arith.mulf %233, %237 : vector<8x32xf32>
    %c4_77 = arith.constant 4 : index
    %c0_78 = arith.constant 0 : index
    %c0_79 = arith.constant 0 : index
    %239 = vector.load %arg21[%c4_77, %c0_78, %c0_79] : memref<8x8x32xf32, #tpu.memory_space<vmem>>, vector<1x8x32xf32>
    %240 = vector.shape_cast %239 : vector<1x8x32xf32> to vector<8x32xf32>
    %241 = vector.shape_cast %238 : vector<8x32xf32> to vector<1x8x32xf32>
    tpu.vector_store %arg21[%c4_77, %c0_78, %c0_79], %241 {strides = array<i32>} : memref<8x8x32xf32, #tpu.memory_space<vmem>>, vector<1x8x32xf32>,
    %cst_80 = arith.constant dense<0.000000e+00> : vector<8x128xf32>
    %242 = tpu.matmul %173, %10, %cst_80 {dimension_numbers = #tpu.dot_dimension_numbers<[1], [0], [0], [1], [0, 0, 1, 1], [], []>} : vector<8x32xf32>, vector<32x128xf32>, vector<8x128xf32> -> vector<8x128xf32>
    %cst_81 = arith.constant dense<0.000000e+00> : vector<8x128xf32>
    %243 = tpu.matmul %197, %11, %cst_81 {dimension_numbers = #tpu.dot_dimension_numbers<[1], [0], [0], [1], [0, 0, 1, 1], [], []>} : vector<8x32xf32>, vector<32x128xf32>, vector<8x128xf32> -> vector<8x128xf32>
    %244 = arith.addf %242, %243 : vector<8x128xf32>
    %245 = vector.broadcast %12 : vector<1x128xf32> to vector<8x128xf32>
    %246 = arith.addf %244, %245 : vector<8x128xf32>
    %247 = vector.extract_strided_slice %246 {offsets = [0, 0], sizes = [8, 96], strides = [1, 1]} : vector<8x128xf32> to vector<8x96xf32>
    %248 = arith.negf %247 : vector<8x96xf32>
    %249 = math.exp %248 : vector<8x96xf32>
    %cst_82 = arith.constant 1.000000e+00 : f32
    %250 = vector.broadcast %cst_82 : f32 to vector<8x96xf32>
    %251 = arith.addf %250, %249 : vector<8x96xf32>
    %252 = arith.divf %250, %251 : vector<8x96xf32>
    %253 = vector.extract_strided_slice %246 {offsets = [0, 96], sizes = [8, 32], strides = [1, 1]} : vector<8x128xf32> to vector<8x32xf32>
    %254 = math.tanh %253 : vector<8x32xf32>
    %255 = vector.extract_strided_slice %252 {offsets = [0, 0], sizes = [8, 32], strides = [1, 1]} : vector<8x96xf32> to vector<8x32xf32>
    %256 = vector.extract_strided_slice %252 {offsets = [0, 32], sizes = [8, 32], strides = [1, 1]} : vector<8x96xf32> to vector<8x32xf32>
    %257 = vector.extract_strided_slice %252 {offsets = [0, 64], sizes = [8, 32], strides = [1, 1]} : vector<8x96xf32> to vector<8x32xf32>
    %258 = arith.mulf %256, %195 : vector<8x32xf32>
    %259 = arith.mulf %255, %254 : vector<8x32xf32>
    %260 = arith.addf %258, %259 : vector<8x32xf32>
    %261 = math.tanh %260 : vector<8x32xf32>
    %262 = arith.mulf %257, %261 : vector<8x32xf32>
    %cst_83 = arith.constant dense<0.000000e+00> : vector<8x128xf32>
    %263 = tpu.matmul %197, %13, %cst_83 {dimension_numbers = #tpu.dot_dimension_numbers<[1], [0], [0], [1], [0, 0, 1, 1], [], []>} : vector<8x32xf32>, vector<32x128xf32>, vector<8x128xf32> -> vector<8x128xf32>
    %cst_84 = arith.constant dense<0.000000e+00> : vector<8x128xf32>
    %264 = tpu.matmul %218, %14, %cst_84 {dimension_numbers = #tpu.dot_dimension_numbers<[1], [0], [0], [1], [0, 0, 1, 1], [], []>} : vector<8x32xf32>, vector<32x128xf32>, vector<8x128xf32> -> vector<8x128xf32>
    %265 = arith.addf %263, %264 : vector<8x128xf32>
    %266 = vector.broadcast %15 : vector<1x128xf32> to vector<8x128xf32>
    %267 = arith.addf %265, %266 : vector<8x128xf32>
    %268 = vector.extract_strided_slice %267 {offsets = [0, 0], sizes = [8, 96], strides = [1, 1]} : vector<8x128xf32> to vector<8x96xf32>
    %269 = arith.negf %268 : vector<8x96xf32>
    %270 = math.exp %269 : vector<8x96xf32>
    %cst_85 = arith.constant 1.000000e+00 : f32
    %271 = vector.broadcast %cst_85 : f32 to vector<8x96xf32>
    %272 = arith.addf %271, %270 : vector<8x96xf32>
    %273 = arith.divf %271, %272 : vector<8x96xf32>
    %274 = vector.extract_strided_slice %267 {offsets = [0, 96], sizes = [8, 32], strides = [1, 1]} : vector<8x128xf32> to vector<8x32xf32>
    %275 = math.tanh %274 : vector<8x32xf32>
    %276 = vector.extract_strided_slice %273 {offsets = [0, 0], sizes = [8, 32], strides = [1, 1]} : vector<8x96xf32> to vector<8x32xf32>
    %277 = vector.extract_strided_slice %273 {offsets = [0, 32], sizes = [8, 32], strides = [1, 1]} : vector<8x96xf32> to vector<8x32xf32>
    %278 = vector.extract_strided_slice %273 {offsets = [0, 64], sizes = [8, 32], strides = [1, 1]} : vector<8x96xf32> to vector<8x32xf32>
    %279 = arith.mulf %277, %216 : vector<8x32xf32>
    %280 = arith.mulf %276, %275 : vector<8x32xf32>
    %281 = arith.addf %279, %280 : vector<8x32xf32>
    %282 = math.tanh %281 : vector<8x32xf32>
    %283 = arith.mulf %278, %282 : vector<8x32xf32>
    %c5 = arith.constant 5 : index
    %c0_86 = arith.constant 0 : index
    %c0_87 = arith.constant 0 : index
    %284 = vector.load %arg20[%c5, %c0_86, %c0_87] : memref<8x8x128xf32, #tpu.memory_space<vmem>>, vector<1x8x128xf32>
    %285 = vector.shape_cast %284 : vector<1x8x128xf32> to vector<8x128xf32>
    %cst_88 = arith.constant dense<0.000000e+00> : vector<8x128xf32>
    %286 = tpu.matmul %238, %9, %cst_88 {dimension_numbers = #tpu.dot_dimension_numbers<[1], [0], [0], [1], [0, 0, 1, 1], [], []>} : vector<8x32xf32>, vector<32x128xf32>, vector<8x128xf32> -> vector<8x128xf32>
    %287 = arith.addf %285, %286 : vector<8x128xf32>
    %288 = vector.extract_strided_slice %287 {offsets = [0, 0], sizes = [8, 96], strides = [1, 1]} : vector<8x128xf32> to vector<8x96xf32>
    %289 = arith.negf %288 : vector<8x96xf32>
    %290 = math.exp %289 : vector<8x96xf32>
    %cst_89 = arith.constant 1.000000e+00 : f32
    %291 = vector.broadcast %cst_89 : f32 to vector<8x96xf32>
    %292 = arith.addf %291, %290 : vector<8x96xf32>
    %293 = arith.divf %291, %292 : vector<8x96xf32>
    %294 = vector.extract_strided_slice %287 {offsets = [0, 96], sizes = [8, 32], strides = [1, 1]} : vector<8x128xf32> to vector<8x32xf32>
    %295 = math.tanh %294 : vector<8x32xf32>
    %296 = vector.extract_strided_slice %293 {offsets = [0, 0], sizes = [8, 32], strides = [1, 1]} : vector<8x96xf32> to vector<8x32xf32>
    %297 = vector.extract_strided_slice %293 {offsets = [0, 32], sizes = [8, 32], strides = [1, 1]} : vector<8x96xf32> to vector<8x32xf32>
    %298 = vector.extract_strided_slice %293 {offsets = [0, 64], sizes = [8, 32], strides = [1, 1]} : vector<8x96xf32> to vector<8x32xf32>
    %299 = arith.mulf %297, %236 : vector<8x32xf32>
    %300 = arith.mulf %296, %295 : vector<8x32xf32>
    %301 = arith.addf %299, %300 : vector<8x32xf32>
    %302 = math.tanh %301 : vector<8x32xf32>
    %303 = arith.mulf %298, %302 : vector<8x32xf32>
    %c5_90 = arith.constant 5 : index
    %c0_91 = arith.constant 0 : index
    %c0_92 = arith.constant 0 : index
    %304 = vector.load %arg21[%c5_90, %c0_91, %c0_92] : memref<8x8x32xf32, #tpu.memory_space<vmem>>, vector<1x8x32xf32>
    %305 = vector.shape_cast %304 : vector<1x8x32xf32> to vector<8x32xf32>
    %306 = vector.shape_cast %303 : vector<8x32xf32> to vector<1x8x32xf32>
    tpu.vector_store %arg21[%c5_90, %c0_91, %c0_92], %306 {strides = array<i32>} : memref<8x8x32xf32, #tpu.memory_space<vmem>>, vector<1x8x32xf32>,
    %cst_93 = arith.constant dense<0.000000e+00> : vector<8x128xf32>
    %307 = tpu.matmul %238, %10, %cst_93 {dimension_numbers = #tpu.dot_dimension_numbers<[1], [0], [0], [1], [0, 0, 1, 1], [], []>} : vector<8x32xf32>, vector<32x128xf32>, vector<8x128xf32> -> vector<8x128xf32>
    %cst_94 = arith.constant dense<0.000000e+00> : vector<8x128xf32>
    %308 = tpu.matmul %262, %11, %cst_94 {dimension_numbers = #tpu.dot_dimension_numbers<[1], [0], [0], [1], [0, 0, 1, 1], [], []>} : vector<8x32xf32>, vector<32x128xf32>, vector<8x128xf32> -> vector<8x128xf32>
    %309 = arith.addf %307, %308 : vector<8x128xf32>
    %310 = vector.broadcast %12 : vector<1x128xf32> to vector<8x128xf32>
    %311 = arith.addf %309, %310 : vector<8x128xf32>
    %312 = vector.extract_strided_slice %311 {offsets = [0, 0], sizes = [8, 96], strides = [1, 1]} : vector<8x128xf32> to vector<8x96xf32>
    %313 = arith.negf %312 : vector<8x96xf32>
    %314 = math.exp %313 : vector<8x96xf32>
    %cst_95 = arith.constant 1.000000e+00 : f32
    %315 = vector.broadcast %cst_95 : f32 to vector<8x96xf32>
    %316 = arith.addf %315, %314 : vector<8x96xf32>
    %317 = arith.divf %315, %316 : vector<8x96xf32>
    %318 = vector.extract_strided_slice %311 {offsets = [0, 96], sizes = [8, 32], strides = [1, 1]} : vector<8x128xf32> to vector<8x32xf32>
    %319 = math.tanh %318 : vector<8x32xf32>
    %320 = vector.extract_strided_slice %317 {offsets = [0, 0], sizes = [8, 32], strides = [1, 1]} : vector<8x96xf32> to vector<8x32xf32>
    %321 = vector.extract_strided_slice %317 {offsets = [0, 32], sizes = [8, 32], strides = [1, 1]} : vector<8x96xf32> to vector<8x32xf32>
    %322 = vector.extract_strided_slice %317 {offsets = [0, 64], sizes = [8, 32], strides = [1, 1]} : vector<8x96xf32> to vector<8x32xf32>
    %323 = arith.mulf %321, %260 : vector<8x32xf32>
    %324 = arith.mulf %320, %319 : vector<8x32xf32>
    %325 = arith.addf %323, %324 : vector<8x32xf32>
    %326 = math.tanh %325 : vector<8x32xf32>
    %327 = arith.mulf %322, %326 : vector<8x32xf32>
    %c0_96 = arith.constant 0 : index
    %c0_97 = arith.constant 0 : index
    %c0_98 = arith.constant 0 : index
    %328 = vector.load %arg22[%c0_96, %c0_97, %c0_98] : memref<8x8x32xf32, #tpu.memory_space<vmem>>, vector<1x8x32xf32>
    %329 = vector.shape_cast %328 : vector<1x8x32xf32> to vector<8x32xf32>
    %330 = vector.shape_cast %327 : vector<8x32xf32> to vector<1x8x32xf32>
    tpu.vector_store %arg22[%c0_96, %c0_97, %c0_98], %330 {strides = array<i32>} : memref<8x8x32xf32, #tpu.memory_space<vmem>>, vector<1x8x32xf32>,
    %cst_99 = arith.constant dense<0.000000e+00> : vector<8x128xf32>
    %331 = tpu.matmul %262, %13, %cst_99 {dimension_numbers = #tpu.dot_dimension_numbers<[1], [0], [0], [1], [0, 0, 1, 1], [], []>} : vector<8x32xf32>, vector<32x128xf32>, vector<8x128xf32> -> vector<8x128xf32>
    %cst_100 = arith.constant dense<0.000000e+00> : vector<8x128xf32>
    %332 = tpu.matmul %283, %14, %cst_100 {dimension_numbers = #tpu.dot_dimension_numbers<[1], [0], [0], [1], [0, 0, 1, 1], [], []>} : vector<8x32xf32>, vector<32x128xf32>, vector<8x128xf32> -> vector<8x128xf32>
    %333 = arith.addf %331, %332 : vector<8x128xf32>
    %334 = vector.broadcast %15 : vector<1x128xf32> to vector<8x128xf32>
    %335 = arith.addf %333, %334 : vector<8x128xf32>
    %336 = vector.extract_strided_slice %335 {offsets = [0, 0], sizes = [8, 96], strides = [1, 1]} : vector<8x128xf32> to vector<8x96xf32>
    %337 = arith.negf %336 : vector<8x96xf32>
    %338 = math.exp %337 : vector<8x96xf32>
    %cst_101 = arith.constant 1.000000e+00 : f32
    %339 = vector.broadcast %cst_101 : f32 to vector<8x96xf32>
    %340 = arith.addf %339, %338 : vector<8x96xf32>
    %341 = arith.divf %339, %340 : vector<8x96xf32>
    %342 = vector.extract_strided_slice %335 {offsets = [0, 96], sizes = [8, 32], strides = [1, 1]} : vector<8x128xf32> to vector<8x32xf32>
    %343 = math.tanh %342 : vector<8x32xf32>
    %344 = vector.extract_strided_slice %341 {offsets = [0, 0], sizes = [8, 32], strides = [1, 1]} : vector<8x96xf32> to vector<8x32xf32>
    %345 = vector.extract_strided_slice %341 {offsets = [0, 32], sizes = [8, 32], strides = [1, 1]} : vector<8x96xf32> to vector<8x32xf32>
    %346 = vector.extract_strided_slice %341 {offsets = [0, 64], sizes = [8, 32], strides = [1, 1]} : vector<8x96xf32> to vector<8x32xf32>
    %347 = arith.mulf %345, %281 : vector<8x32xf32>
    %348 = arith.mulf %344, %343 : vector<8x32xf32>
    %349 = arith.addf %347, %348 : vector<8x32xf32>
    %350 = math.tanh %349 : vector<8x32xf32>
    %351 = arith.mulf %346, %350 : vector<8x32xf32>
    %c6 = arith.constant 6 : index
    %c0_102 = arith.constant 0 : index
    %c0_103 = arith.constant 0 : index
    %352 = vector.load %arg20[%c6, %c0_102, %c0_103] : memref<8x8x128xf32, #tpu.memory_space<vmem>>, vector<1x8x128xf32>
    %353 = vector.shape_cast %352 : vector<1x8x128xf32> to vector<8x128xf32>
    %cst_104 = arith.constant dense<0.000000e+00> : vector<8x128xf32>
    %354 = tpu.matmul %303, %9, %cst_104 {dimension_numbers = #tpu.dot_dimension_numbers<[1], [0], [0], [1], [0, 0, 1, 1], [], []>} : vector<8x32xf32>, vector<32x128xf32>, vector<8x128xf32> -> vector<8x128xf32>
    %355 = arith.addf %353, %354 : vector<8x128xf32>
    %356 = vector.extract_strided_slice %355 {offsets = [0, 0], sizes = [8, 96], strides = [1, 1]} : vector<8x128xf32> to vector<8x96xf32>
    %357 = arith.negf %356 : vector<8x96xf32>
    %358 = math.exp %357 : vector<8x96xf32>
    %cst_105 = arith.constant 1.000000e+00 : f32
    %359 = vector.broadcast %cst_105 : f32 to vector<8x96xf32>
    %360 = arith.addf %359, %358 : vector<8x96xf32>
    %361 = arith.divf %359, %360 : vector<8x96xf32>
    %362 = vector.extract_strided_slice %355 {offsets = [0, 96], sizes = [8, 32], strides = [1, 1]} : vector<8x128xf32> to vector<8x32xf32>
    %363 = math.tanh %362 : vector<8x32xf32>
    %364 = vector.extract_strided_slice %361 {offsets = [0, 0], sizes = [8, 32], strides = [1, 1]} : vector<8x96xf32> to vector<8x32xf32>
    %365 = vector.extract_strided_slice %361 {offsets = [0, 32], sizes = [8, 32], strides = [1, 1]} : vector<8x96xf32> to vector<8x32xf32>
    %366 = vector.extract_strided_slice %361 {offsets = [0, 64], sizes = [8, 32], strides = [1, 1]} : vector<8x96xf32> to vector<8x32xf32>
    %367 = arith.mulf %365, %301 : vector<8x32xf32>
    %368 = arith.mulf %364, %363 : vector<8x32xf32>
    %369 = arith.addf %367, %368 : vector<8x32xf32>
    %370 = math.tanh %369 : vector<8x32xf32>
    %371 = arith.mulf %366, %370 : vector<8x32xf32>
    %c6_106 = arith.constant 6 : index
    %c0_107 = arith.constant 0 : index
    %c0_108 = arith.constant 0 : index
    %372 = vector.load %arg21[%c6_106, %c0_107, %c0_108] : memref<8x8x32xf32, #tpu.memory_space<vmem>>, vector<1x8x32xf32>
    %373 = vector.shape_cast %372 : vector<1x8x32xf32> to vector<8x32xf32>
    %374 = vector.shape_cast %371 : vector<8x32xf32> to vector<1x8x32xf32>
    tpu.vector_store %arg21[%c6_106, %c0_107, %c0_108], %374 {strides = array<i32>} : memref<8x8x32xf32, #tpu.memory_space<vmem>>, vector<1x8x32xf32>,
    %cst_109 = arith.constant dense<0.000000e+00> : vector<8x128xf32>
    %375 = tpu.matmul %303, %10, %cst_109 {dimension_numbers = #tpu.dot_dimension_numbers<[1], [0], [0], [1], [0, 0, 1, 1], [], []>} : vector<8x32xf32>, vector<32x128xf32>, vector<8x128xf32> -> vector<8x128xf32>
    %cst_110 = arith.constant dense<0.000000e+00> : vector<8x128xf32>
    %376 = tpu.matmul %327, %11, %cst_110 {dimension_numbers = #tpu.dot_dimension_numbers<[1], [0], [0], [1], [0, 0, 1, 1], [], []>} : vector<8x32xf32>, vector<32x128xf32>, vector<8x128xf32> -> vector<8x128xf32>
    %377 = arith.addf %375, %376 : vector<8x128xf32>
    %378 = vector.broadcast %12 : vector<1x128xf32> to vector<8x128xf32>
    %379 = arith.addf %377, %378 : vector<8x128xf32>
    %380 = vector.extract_strided_slice %379 {offsets = [0, 0], sizes = [8, 96], strides = [1, 1]} : vector<8x128xf32> to vector<8x96xf32>
    %381 = arith.negf %380 : vector<8x96xf32>
    %382 = math.exp %381 : vector<8x96xf32>
    %cst_111 = arith.constant 1.000000e+00 : f32
    %383 = vector.broadcast %cst_111 : f32 to vector<8x96xf32>
    %384 = arith.addf %383, %382 : vector<8x96xf32>
    %385 = arith.divf %383, %384 : vector<8x96xf32>
    %386 = vector.extract_strided_slice %379 {offsets = [0, 96], sizes = [8, 32], strides = [1, 1]} : vector<8x128xf32> to vector<8x32xf32>
    %387 = math.tanh %386 : vector<8x32xf32>
    %388 = vector.extract_strided_slice %385 {offsets = [0, 0], sizes = [8, 32], strides = [1, 1]} : vector<8x96xf32> to vector<8x32xf32>
    %389 = vector.extract_strided_slice %385 {offsets = [0, 32], sizes = [8, 32], strides = [1, 1]} : vector<8x96xf32> to vector<8x32xf32>
    %390 = vector.extract_strided_slice %385 {offsets = [0, 64], sizes = [8, 32], strides = [1, 1]} : vector<8x96xf32> to vector<8x32xf32>
    %391 = arith.mulf %389, %325 : vector<8x32xf32>
    %392 = arith.mulf %388, %387 : vector<8x32xf32>
    %393 = arith.addf %391, %392 : vector<8x32xf32>
    %394 = math.tanh %393 : vector<8x32xf32>
    %395 = arith.mulf %390, %394 : vector<8x32xf32>
    %c1_112 = arith.constant 1 : index
    %c0_113 = arith.constant 0 : index
    %c0_114 = arith.constant 0 : index
    %396 = vector.load %arg22[%c1_112, %c0_113, %c0_114] : memref<8x8x32xf32, #tpu.memory_space<vmem>>, vector<1x8x32xf32>
    %397 = vector.shape_cast %396 : vector<1x8x32xf32> to vector<8x32xf32>
    %398 = vector.shape_cast %395 : vector<8x32xf32> to vector<1x8x32xf32>
    tpu.vector_store %arg22[%c1_112, %c0_113, %c0_114], %398 {strides = array<i32>} : memref<8x8x32xf32, #tpu.memory_space<vmem>>, vector<1x8x32xf32>,
    %cst_115 = arith.constant dense<0.000000e+00> : vector<8x128xf32>
    %399 = tpu.matmul %327, %13, %cst_115 {dimension_numbers = #tpu.dot_dimension_numbers<[1], [0], [0], [1], [0, 0, 1, 1], [], []>} : vector<8x32xf32>, vector<32x128xf32>, vector<8x128xf32> -> vector<8x128xf32>
    %cst_116 = arith.constant dense<0.000000e+00> : vector<8x128xf32>
    %400 = tpu.matmul %351, %14, %cst_116 {dimension_numbers = #tpu.dot_dimension_numbers<[1], [0], [0], [1], [0, 0, 1, 1], [], []>} : vector<8x32xf32>, vector<32x128xf32>, vector<8x128xf32> -> vector<8x128xf32>
    %401 = arith.addf %399, %400 : vector<8x128xf32>
    %402 = vector.broadcast %15 : vector<1x128xf32> to vector<8x128xf32>
    %403 = arith.addf %401, %402 : vector<8x128xf32>
    %404 = vector.extract_strided_slice %403 {offsets = [0, 0], sizes = [8, 96], strides = [1, 1]} : vector<8x128xf32> to vector<8x96xf32>
    %405 = arith.negf %404 : vector<8x96xf32>
    %406 = math.exp %405 : vector<8x96xf32>
    %cst_117 = arith.constant 1.000000e+00 : f32
    %407 = vector.broadcast %cst_117 : f32 to vector<8x96xf32>
    %408 = arith.addf %407, %406 : vector<8x96xf32>
    %409 = arith.divf %407, %408 : vector<8x96xf32>
    %410 = vector.extract_strided_slice %403 {offsets = [0, 96], sizes = [8, 32], strides = [1, 1]} : vector<8x128xf32> to vector<8x32xf32>
    %411 = math.tanh %410 : vector<8x32xf32>
    %412 = vector.extract_strided_slice %409 {offsets = [0, 0], sizes = [8, 32], strides = [1, 1]} : vector<8x96xf32> to vector<8x32xf32>
    %413 = vector.extract_strided_slice %409 {offsets = [0, 32], sizes = [8, 32], strides = [1, 1]} : vector<8x96xf32> to vector<8x32xf32>
    %414 = vector.extract_strided_slice %409 {offsets = [0, 64], sizes = [8, 32], strides = [1, 1]} : vector<8x96xf32> to vector<8x32xf32>
    %415 = arith.mulf %413, %349 : vector<8x32xf32>
    %416 = arith.mulf %412, %411 : vector<8x32xf32>
    %417 = arith.addf %415, %416 : vector<8x32xf32>
    %418 = math.tanh %417 : vector<8x32xf32>
    %419 = arith.mulf %414, %418 : vector<8x32xf32>
    %c4_118 = arith.constant 4 : index
    %c0_119 = arith.constant 0 : index
    %c0_120 = arith.constant 0 : index
    %420 = vector.load %arg22[%c4_118, %c0_119, %c0_120] : memref<8x8x32xf32, #tpu.memory_space<vmem>>, vector<1x8x32xf32>
    %421 = vector.shape_cast %420 : vector<1x8x32xf32> to vector<8x32xf32>
    %422 = vector.shape_cast %419 : vector<8x32xf32> to vector<1x8x32xf32>
    tpu.vector_store %arg22[%c4_118, %c0_119, %c0_120], %422 {strides = array<i32>} : memref<8x8x32xf32, #tpu.memory_space<vmem>>, vector<1x8x32xf32>,
    %c7 = arith.constant 7 : index
    %c0_121 = arith.constant 0 : index
    %c0_122 = arith.constant 0 : index
    %423 = vector.load %arg20[%c7, %c0_121, %c0_122] : memref<8x8x128xf32, #tpu.memory_space<vmem>>, vector<1x8x128xf32>
    %424 = vector.shape_cast %423 : vector<1x8x128xf32> to vector<8x128xf32>
    %cst_123 = arith.constant dense<0.000000e+00> : vector<8x128xf32>
    %425 = tpu.matmul %371, %9, %cst_123 {dimension_numbers = #tpu.dot_dimension_numbers<[1], [0], [0], [1], [0, 0, 1, 1], [], []>} : vector<8x32xf32>, vector<32x128xf32>, vector<8x128xf32> -> vector<8x128xf32>
    %426 = arith.addf %424, %425 : vector<8x128xf32>
    %427 = vector.extract_strided_slice %426 {offsets = [0, 0], sizes = [8, 96], strides = [1, 1]} : vector<8x128xf32> to vector<8x96xf32>
    %428 = arith.negf %427 : vector<8x96xf32>
    %429 = math.exp %428 : vector<8x96xf32>
    %cst_124 = arith.constant 1.000000e+00 : f32
    %430 = vector.broadcast %cst_124 : f32 to vector<8x96xf32>
    %431 = arith.addf %430, %429 : vector<8x96xf32>
    %432 = arith.divf %430, %431 : vector<8x96xf32>
    %433 = vector.extract_strided_slice %426 {offsets = [0, 96], sizes = [8, 32], strides = [1, 1]} : vector<8x128xf32> to vector<8x32xf32>
    %434 = math.tanh %433 : vector<8x32xf32>
    %435 = vector.extract_strided_slice %432 {offsets = [0, 0], sizes = [8, 32], strides = [1, 1]} : vector<8x96xf32> to vector<8x32xf32>
    %436 = vector.extract_strided_slice %432 {offsets = [0, 32], sizes = [8, 32], strides = [1, 1]} : vector<8x96xf32> to vector<8x32xf32>
    %437 = vector.extract_strided_slice %432 {offsets = [0, 64], sizes = [8, 32], strides = [1, 1]} : vector<8x96xf32> to vector<8x32xf32>
    %438 = arith.mulf %436, %369 : vector<8x32xf32>
    %439 = arith.mulf %435, %434 : vector<8x32xf32>
    %440 = arith.addf %438, %439 : vector<8x32xf32>
    %441 = math.tanh %440 : vector<8x32xf32>
    %442 = arith.mulf %437, %441 : vector<8x32xf32>
    %c7_125 = arith.constant 7 : index
    %c0_126 = arith.constant 0 : index
    %c0_127 = arith.constant 0 : index
    %443 = vector.load %arg21[%c7_125, %c0_126, %c0_127] : memref<8x8x32xf32, #tpu.memory_space<vmem>>, vector<1x8x32xf32>
    %444 = vector.shape_cast %443 : vector<1x8x32xf32> to vector<8x32xf32>
    %445 = vector.shape_cast %442 : vector<8x32xf32> to vector<1x8x32xf32>
    tpu.vector_store %arg21[%c7_125, %c0_126, %c0_127], %445 {strides = array<i32>} : memref<8x8x32xf32, #tpu.memory_space<vmem>>, vector<1x8x32xf32>,
    %cst_128 = arith.constant dense<0.000000e+00> : vector<8x128xf32>
    %446 = tpu.matmul %371, %10, %cst_128 {dimension_numbers = #tpu.dot_dimension_numbers<[1], [0], [0], [1], [0, 0, 1, 1], [], []>} : vector<8x32xf32>, vector<32x128xf32>, vector<8x128xf32> -> vector<8x128xf32>
    %cst_129 = arith.constant dense<0.000000e+00> : vector<8x128xf32>
    %447 = tpu.matmul %395, %11, %cst_129 {dimension_numbers = #tpu.dot_dimension_numbers<[1], [0], [0], [1], [0, 0, 1, 1], [], []>} : vector<8x32xf32>, vector<32x128xf32>, vector<8x128xf32> -> vector<8x128xf32>
    %448 = arith.addf %446, %447 : vector<8x128xf32>
    %449 = vector.broadcast %12 : vector<1x128xf32> to vector<8x128xf32>
    %450 = arith.addf %448, %449 : vector<8x128xf32>
    %451 = vector.extract_strided_slice %450 {offsets = [0, 0], sizes = [8, 96], strides = [1, 1]} : vector<8x128xf32> to vector<8x96xf32>
    %452 = arith.negf %451 : vector<8x96xf32>
    %453 = math.exp %452 : vector<8x96xf32>
    %cst_130 = arith.constant 1.000000e+00 : f32
    %454 = vector.broadcast %cst_130 : f32 to vector<8x96xf32>
    %455 = arith.addf %454, %453 : vector<8x96xf32>
    %456 = arith.divf %454, %455 : vector<8x96xf32>
    %457 = vector.extract_strided_slice %450 {offsets = [0, 96], sizes = [8, 32], strides = [1, 1]} : vector<8x128xf32> to vector<8x32xf32>
    %458 = math.tanh %457 : vector<8x32xf32>
    %459 = vector.extract_strided_slice %456 {offsets = [0, 0], sizes = [8, 32], strides = [1, 1]} : vector<8x96xf32> to vector<8x32xf32>
    %460 = vector.extract_strided_slice %456 {offsets = [0, 32], sizes = [8, 32], strides = [1, 1]} : vector<8x96xf32> to vector<8x32xf32>
    %461 = vector.extract_strided_slice %456 {offsets = [0, 64], sizes = [8, 32], strides = [1, 1]} : vector<8x96xf32> to vector<8x32xf32>
    %462 = arith.mulf %460, %393 : vector<8x32xf32>
    %463 = arith.mulf %459, %458 : vector<8x32xf32>
    %464 = arith.addf %462, %463 : vector<8x32xf32>
    %465 = math.tanh %464 : vector<8x32xf32>
    %466 = arith.mulf %461, %465 : vector<8x32xf32>
    %c2_131 = arith.constant 2 : index
    %c0_132 = arith.constant 0 : index
    %c0_133 = arith.constant 0 : index
    %467 = vector.load %arg22[%c2_131, %c0_132, %c0_133] : memref<8x8x32xf32, #tpu.memory_space<vmem>>, vector<1x8x32xf32>
    %468 = vector.shape_cast %467 : vector<1x8x32xf32> to vector<8x32xf32>
    %469 = vector.shape_cast %466 : vector<8x32xf32> to vector<1x8x32xf32>
    tpu.vector_store %arg22[%c2_131, %c0_132, %c0_133], %469 {strides = array<i32>} : memref<8x8x32xf32, #tpu.memory_space<vmem>>, vector<1x8x32xf32>,
    %cst_134 = arith.constant dense<0.000000e+00> : vector<8x128xf32>
    %470 = tpu.matmul %395, %13, %cst_134 {dimension_numbers = #tpu.dot_dimension_numbers<[1], [0], [0], [1], [0, 0, 1, 1], [], []>} : vector<8x32xf32>, vector<32x128xf32>, vector<8x128xf32> -> vector<8x128xf32>
    %cst_135 = arith.constant dense<0.000000e+00> : vector<8x128xf32>
    %471 = tpu.matmul %419, %14, %cst_135 {dimension_numbers = #tpu.dot_dimension_numbers<[1], [0], [0], [1], [0, 0, 1, 1], [], []>} : vector<8x32xf32>, vector<32x128xf32>, vector<8x128xf32> -> vector<8x128xf32>
    %472 = arith.addf %470, %471 : vector<8x128xf32>
    %473 = vector.broadcast %15 : vector<1x128xf32> to vector<8x128xf32>
    %474 = arith.addf %472, %473 : vector<8x128xf32>
    %475 = vector.extract_strided_slice %474 {offsets = [0, 0], sizes = [8, 96], strides = [1, 1]} : vector<8x128xf32> to vector<8x96xf32>
    %476 = arith.negf %475 : vector<8x96xf32>
    %477 = math.exp %476 : vector<8x96xf32>
    %cst_136 = arith.constant 1.000000e+00 : f32
    %478 = vector.broadcast %cst_136 : f32 to vector<8x96xf32>
    %479 = arith.addf %478, %477 : vector<8x96xf32>
    %480 = arith.divf %478, %479 : vector<8x96xf32>
    %481 = vector.extract_strided_slice %474 {offsets = [0, 96], sizes = [8, 32], strides = [1, 1]} : vector<8x128xf32> to vector<8x32xf32>
    %482 = math.tanh %481 : vector<8x32xf32>
    %483 = vector.extract_strided_slice %480 {offsets = [0, 0], sizes = [8, 32], strides = [1, 1]} : vector<8x96xf32> to vector<8x32xf32>
    %484 = vector.extract_strided_slice %480 {offsets = [0, 32], sizes = [8, 32], strides = [1, 1]} : vector<8x96xf32> to vector<8x32xf32>
    %485 = vector.extract_strided_slice %480 {offsets = [0, 64], sizes = [8, 32], strides = [1, 1]} : vector<8x96xf32> to vector<8x32xf32>
    %486 = arith.mulf %484, %417 : vector<8x32xf32>
    %487 = arith.mulf %483, %482 : vector<8x32xf32>
    %488 = arith.addf %486, %487 : vector<8x32xf32>
    %489 = math.tanh %488 : vector<8x32xf32>
    %490 = arith.mulf %485, %489 : vector<8x32xf32>
    %c5_137 = arith.constant 5 : index
    %c0_138 = arith.constant 0 : index
    %c0_139 = arith.constant 0 : index
    %491 = vector.load %arg22[%c5_137, %c0_138, %c0_139] : memref<8x8x32xf32, #tpu.memory_space<vmem>>, vector<1x8x32xf32>
    %492 = vector.shape_cast %491 : vector<1x8x32xf32> to vector<8x32xf32>
    %493 = vector.shape_cast %490 : vector<8x32xf32> to vector<1x8x32xf32>
    tpu.vector_store %arg22[%c5_137, %c0_138, %c0_139], %493 {strides = array<i32>} : memref<8x8x32xf32, #tpu.memory_space<vmem>>, vector<1x8x32xf32>,
    %cst_140 = arith.constant dense<0.000000e+00> : vector<8x128xf32>
    %494 = tpu.matmul %442, %10, %cst_140 {dimension_numbers = #tpu.dot_dimension_numbers<[1], [0], [0], [1], [0, 0, 1, 1], [], []>} : vector<8x32xf32>, vector<32x128xf32>, vector<8x128xf32> -> vector<8x128xf32>
    %cst_141 = arith.constant dense<0.000000e+00> : vector<8x128xf32>
    %495 = tpu.matmul %466, %11, %cst_141 {dimension_numbers = #tpu.dot_dimension_numbers<[1], [0], [0], [1], [0, 0, 1, 1], [], []>} : vector<8x32xf32>, vector<32x128xf32>, vector<8x128xf32> -> vector<8x128xf32>
    %496 = arith.addf %494, %495 : vector<8x128xf32>
    %497 = vector.broadcast %12 : vector<1x128xf32> to vector<8x128xf32>
    %498 = arith.addf %496, %497 : vector<8x128xf32>
    %499 = vector.extract_strided_slice %498 {offsets = [0, 0], sizes = [8, 96], strides = [1, 1]} : vector<8x128xf32> to vector<8x96xf32>
    %500 = arith.negf %499 : vector<8x96xf32>
    %501 = math.exp %500 : vector<8x96xf32>
    %cst_142 = arith.constant 1.000000e+00 : f32
    %502 = vector.broadcast %cst_142 : f32 to vector<8x96xf32>
    %503 = arith.addf %502, %501 : vector<8x96xf32>
    %504 = arith.divf %502, %503 : vector<8x96xf32>
    %505 = vector.extract_strided_slice %498 {offsets = [0, 96], sizes = [8, 32], strides = [1, 1]} : vector<8x128xf32> to vector<8x32xf32>
    %506 = math.tanh %505 : vector<8x32xf32>
    %507 = vector.extract_strided_slice %504 {offsets = [0, 0], sizes = [8, 32], strides = [1, 1]} : vector<8x96xf32> to vector<8x32xf32>
    %508 = vector.extract_strided_slice %504 {offsets = [0, 32], sizes = [8, 32], strides = [1, 1]} : vector<8x96xf32> to vector<8x32xf32>
    %509 = vector.extract_strided_slice %504 {offsets = [0, 64], sizes = [8, 32], strides = [1, 1]} : vector<8x96xf32> to vector<8x32xf32>
    %510 = arith.mulf %508, %464 : vector<8x32xf32>
    %511 = arith.mulf %507, %506 : vector<8x32xf32>
    %512 = arith.addf %510, %511 : vector<8x32xf32>
    %513 = math.tanh %512 : vector<8x32xf32>
    %514 = arith.mulf %509, %513 : vector<8x32xf32>
    %c3_143 = arith.constant 3 : index
    %c0_144 = arith.constant 0 : index
    %c0_145 = arith.constant 0 : index
    %515 = vector.load %arg22[%c3_143, %c0_144, %c0_145] : memref<8x8x32xf32, #tpu.memory_space<vmem>>, vector<1x8x32xf32>
    %516 = vector.shape_cast %515 : vector<1x8x32xf32> to vector<8x32xf32>
    %517 = vector.shape_cast %514 : vector<8x32xf32> to vector<1x8x32xf32>
    tpu.vector_store %arg22[%c3_143, %c0_144, %c0_145], %517 {strides = array<i32>} : memref<8x8x32xf32, #tpu.memory_space<vmem>>, vector<1x8x32xf32>,
    %cst_146 = arith.constant dense<0.000000e+00> : vector<8x128xf32>
    %518 = tpu.matmul %466, %13, %cst_146 {dimension_numbers = #tpu.dot_dimension_numbers<[1], [0], [0], [1], [0, 0, 1, 1], [], []>} : vector<8x32xf32>, vector<32x128xf32>, vector<8x128xf32> -> vector<8x128xf32>
    %cst_147 = arith.constant dense<0.000000e+00> : vector<8x128xf32>
    %519 = tpu.matmul %490, %14, %cst_147 {dimension_numbers = #tpu.dot_dimension_numbers<[1], [0], [0], [1], [0, 0, 1, 1], [], []>} : vector<8x32xf32>, vector<32x128xf32>, vector<8x128xf32> -> vector<8x128xf32>
    %520 = arith.addf %518, %519 : vector<8x128xf32>
    %521 = vector.broadcast %15 : vector<1x128xf32> to vector<8x128xf32>
    %522 = arith.addf %520, %521 : vector<8x128xf32>
    %523 = vector.extract_strided_slice %522 {offsets = [0, 0], sizes = [8, 96], strides = [1, 1]} : vector<8x128xf32> to vector<8x96xf32>
    %524 = arith.negf %523 : vector<8x96xf32>
    %525 = math.exp %524 : vector<8x96xf32>
    %cst_148 = arith.constant 1.000000e+00 : f32
    %526 = vector.broadcast %cst_148 : f32 to vector<8x96xf32>
    %527 = arith.addf %526, %525 : vector<8x96xf32>
    %528 = arith.divf %526, %527 : vector<8x96xf32>
    %529 = vector.extract_strided_slice %522 {offsets = [0, 96], sizes = [8, 32], strides = [1, 1]} : vector<8x128xf32> to vector<8x32xf32>
    %530 = math.tanh %529 : vector<8x32xf32>
    %531 = vector.extract_strided_slice %528 {offsets = [0, 0], sizes = [8, 32], strides = [1, 1]} : vector<8x96xf32> to vector<8x32xf32>
    %532 = vector.extract_strided_slice %528 {offsets = [0, 32], sizes = [8, 32], strides = [1, 1]} : vector<8x96xf32> to vector<8x32xf32>
    %533 = vector.extract_strided_slice %528 {offsets = [0, 64], sizes = [8, 32], strides = [1, 1]} : vector<8x96xf32> to vector<8x32xf32>
    %534 = arith.mulf %532, %488 : vector<8x32xf32>
    %535 = arith.mulf %531, %530 : vector<8x32xf32>
    %536 = arith.addf %534, %535 : vector<8x32xf32>
    %537 = math.tanh %536 : vector<8x32xf32>
    %538 = arith.mulf %533, %537 : vector<8x32xf32>
    %c6_149 = arith.constant 6 : index
    %c0_150 = arith.constant 0 : index
    %c0_151 = arith.constant 0 : index
    %539 = vector.load %arg22[%c6_149, %c0_150, %c0_151] : memref<8x8x32xf32, #tpu.memory_space<vmem>>, vector<1x8x32xf32>
    %540 = vector.shape_cast %539 : vector<1x8x32xf32> to vector<8x32xf32>
    %541 = vector.shape_cast %538 : vector<8x32xf32> to vector<1x8x32xf32>
    tpu.vector_store %arg22[%c6_149, %c0_150, %c0_151], %541 {strides = array<i32>} : memref<8x8x32xf32, #tpu.memory_space<vmem>>, vector<1x8x32xf32>,
    %cst_152 = arith.constant dense<0.000000e+00> : vector<8x128xf32>
    %542 = tpu.matmul %514, %13, %cst_152 {dimension_numbers = #tpu.dot_dimension_numbers<[1], [0], [0], [1], [0, 0, 1, 1], [], []>} : vector<8x32xf32>, vector<32x128xf32>, vector<8x128xf32> -> vector<8x128xf32>
    %cst_153 = arith.constant dense<0.000000e+00> : vector<8x128xf32>
    %543 = tpu.matmul %538, %14, %cst_153 {dimension_numbers = #tpu.dot_dimension_numbers<[1], [0], [0], [1], [0, 0, 1, 1], [], []>} : vector<8x32xf32>, vector<32x128xf32>, vector<8x128xf32> -> vector<8x128xf32>
    %544 = arith.addf %542, %543 : vector<8x128xf32>
    %545 = vector.broadcast %15 : vector<1x128xf32> to vector<8x128xf32>
    %546 = arith.addf %544, %545 : vector<8x128xf32>
    %547 = vector.extract_strided_slice %546 {offsets = [0, 0], sizes = [8, 96], strides = [1, 1]} : vector<8x128xf32> to vector<8x96xf32>
    %548 = arith.negf %547 : vector<8x96xf32>
    %549 = math.exp %548 : vector<8x96xf32>
    %cst_154 = arith.constant 1.000000e+00 : f32
    %550 = vector.broadcast %cst_154 : f32 to vector<8x96xf32>
    %551 = arith.addf %550, %549 : vector<8x96xf32>
    %552 = arith.divf %550, %551 : vector<8x96xf32>
    %553 = vector.extract_strided_slice %546 {offsets = [0, 96], sizes = [8, 32], strides = [1, 1]} : vector<8x128xf32> to vector<8x32xf32>
    %554 = math.tanh %553 : vector<8x32xf32>
    %555 = vector.extract_strided_slice %552 {offsets = [0, 0], sizes = [8, 32], strides = [1, 1]} : vector<8x96xf32> to vector<8x32xf32>
    %556 = vector.extract_strided_slice %552 {offsets = [0, 32], sizes = [8, 32], strides = [1, 1]} : vector<8x96xf32> to vector<8x32xf32>
    %557 = vector.extract_strided_slice %552 {offsets = [0, 64], sizes = [8, 32], strides = [1, 1]} : vector<8x96xf32> to vector<8x32xf32>
    %558 = arith.mulf %556, %536 : vector<8x32xf32>
    %559 = arith.mulf %555, %554 : vector<8x32xf32>
    %560 = arith.addf %558, %559 : vector<8x32xf32>
    %561 = math.tanh %560 : vector<8x32xf32>
    %562 = arith.mulf %557, %561 : vector<8x32xf32>
    %c7_155 = arith.constant 7 : index
    %c0_156 = arith.constant 0 : index
    %c0_157 = arith.constant 0 : index
    %563 = vector.load %arg22[%c7_155, %c0_156, %c0_157] : memref<8x8x32xf32, #tpu.memory_space<vmem>>, vector<1x8x32xf32>
    %564 = vector.shape_cast %563 : vector<1x8x32xf32> to vector<8x32xf32>
    %565 = vector.shape_cast %562 : vector<8x32xf32> to vector<1x8x32xf32>
    tpu.vector_store %arg22[%c7_155, %c0_156, %c0_157], %565 {strides = array<i32>} : memref<8x8x32xf32, #tpu.memory_space<vmem>>, vector<1x8x32xf32>,
    %cst_158 = arith.constant 0.000000e+00 : f32
    %566 = vector.broadcast %cst_158 : f32 to vector<32x4xf32>
    %c0_159 = arith.constant 0 : index
    %c0_160 = arith.constant 0 : index
    %567 = vector.load %arg11[%c0_159, %c0_160] : memref<1x4xf32, #tpu.memory_space<vmem>>, vector<1x4xf32>
    %568 = vector.broadcast %567 : vector<1x4xf32> to vector<32x4xf32>
    %569 = arith.addf %566, %568 : vector<32x4xf32>
    %c0_161 = arith.constant 0 : index
    %c0_162 = arith.constant 0 : index
    %c0_163 = arith.constant 0 : index
    %570 = vector.load %arg22[%c0_161, %c0_162, %c0_163] : memref<8x8x32xf32, #tpu.memory_space<vmem>>, vector<4x8x32xf32>
    %571 = vector.shape_cast %570 : vector<4x8x32xf32> to vector<32x32xf32>
    %c0_164 = arith.constant 0 : index
    %c0_165 = arith.constant 0 : index
    %572 = vector.load %arg10[%c0_164, %c0_165] : memref<64x4xf32, #tpu.memory_space<vmem>>, vector<32x4xf32>
    %cst_166 = arith.constant dense<0.000000e+00> : vector<32x4xf32>
    %573 = tpu.matmul %571, %572, %cst_166 {dimension_numbers = #tpu.dot_dimension_numbers<[1], [0], [0], [1], [0, 0, 1, 1], [], []>} : vector<32x32xf32>, vector<32x4xf32>, vector<32x4xf32> -> vector<32x4xf32>
    %574 = arith.addf %569, %573 : vector<32x4xf32>
    %c4_167 = arith.constant 4 : index
    %c0_168 = arith.constant 0 : index
    %c0_169 = arith.constant 0 : index
    %575 = vector.load %arg22[%c4_167, %c0_168, %c0_169] : memref<8x8x32xf32, #tpu.memory_space<vmem>>, vector<4x8x32xf32>
    %576 = vector.shape_cast %575 : vector<4x8x32xf32> to vector<32x32xf32>
    %c32 = arith.constant 32 : index
    %c0_170 = arith.constant 0 : index
    %577 = vector.load %arg10[%c32, %c0_170] : memref<64x4xf32, #tpu.memory_space<vmem>>, vector<32x4xf32>
    %cst_171 = arith.constant dense<0.000000e+00> : vector<32x4xf32>
    %578 = tpu.matmul %576, %577, %cst_171 {dimension_numbers = #tpu.dot_dimension_numbers<[1], [0], [0], [1], [0, 0, 1, 1], [], []>} : vector<32x32xf32>, vector<32x4xf32>, vector<32x4xf32> -> vector<32x4xf32>
    %579 = arith.addf %574, %578 : vector<32x4xf32>
    %580 = tpu.iota {dimensions = array<i32: 1>} : vector<32x4xi32>
    %c2_i32 = arith.constant 2 : i32
    %581 = vector.broadcast %c2_i32 : i32 to vector<32x4xi32>
    %582 = arith.cmpi slt, %580, %581 : vector<32x4xi32>
    %cst_172 = arith.constant 0.000000e+00 : f32
    %583 = vector.broadcast %cst_172 : f32 to vector<32x4xf32>
    %584 = arith.maximumf %579, %583 : vector<32x4xf32>
    %585 = vector.broadcast %cst_172 : f32 to vector<32x4xf32>
    %586 = arith.subf %579, %585 : vector<32x4xf32>
    %587 = arith.cmpf one, %586, %586 : vector<32x4xf32>
    %588 = vector.broadcast %cst_172 : f32 to vector<32x4xf32>
    %589 = arith.addf %579, %588 : vector<32x4xf32>
    %590 = math.absf %586 : vector<32x4xf32>
    %cst_173 = arith.constant 0.000000e+00 : f32
    %591 = vector.broadcast %cst_173 : f32 to vector<32x4xf32>
    %592 = arith.subf %591, %590 : vector<32x4xf32>
    %593 = math.exp %592 : vector<32x4xf32>
    %594 = math.log1p %593 : vector<32x4xf32>
    %595 = arith.addf %584, %594 : vector<32x4xf32>
    %596 = arith.select %587, %589, %595 : vector<32x4xi1>, vector<32x4xf32>
    %cst_174 = arith.constant 9.99999997E-7 : f32
    %597 = vector.broadcast %cst_174 : f32 to vector<32x4xf32>
    %598 = arith.addf %596, %597 : vector<32x4xf32>
    %599 = arith.select %582, %579, %598 : vector<32x4xi1>, vector<32x4xf32>
    %600 = vector.shape_cast %599 : vector<32x4xf32> to vector<4x8x4xf32>
    %c0_175 = arith.constant 0 : index
    %c0_176 = arith.constant 0 : index
    %c0_177 = arith.constant 0 : index
    %601 = vector.load %arg18[%c0_175, %c0_176, %c0_177] : memref<4x8x4xf32, #tpu.memory_space<vmem>>, vector<4x8x4xf32>
    tpu.vector_store %arg18[%c0_175, %c0_176, %c0_177], %600 {strides = array<i32>} : memref<4x8x4xf32, #tpu.memory_space<vmem>>, vector<4x8x4xf32>,
    %c0_178 = arith.constant 0 : index
    %c0_179 = arith.constant 0 : index
    %c0_180 = arith.constant 0 : index
    %602 = vector.load %arg21[%c0_178, %c0_179, %c0_180] : memref<8x8x32xf32, #tpu.memory_space<vmem>>, vector<8x8x32xf32>
    %603 = vector.shape_cast %602 : vector<8x8x32xf32> to vector<64x32xf32>
    %c0_181 = arith.constant 0 : index
    %c0_182 = arith.constant 0 : index
    %604 = vector.load %arg12[%c0_181, %c0_182] : memref<32x32xf32, #tpu.memory_space<vmem>>, vector<32x32xf32>
    %cst_183 = arith.constant dense<0.000000e+00> : vector<64x32xf32>
    %605 = tpu.matmul %603, %604, %cst_183 {dimension_numbers = #tpu.dot_dimension_numbers<[1], [0], [0], [1], [0, 0, 1, 1], [], []>} : vector<64x32xf32>, vector<32x32xf32>, vector<64x32xf32> -> vector<64x32xf32>
    %c0_184 = arith.constant 0 : index
    %c0_185 = arith.constant 0 : index
    %606 = vector.load %arg13[%c0_184, %c0_185] : memref<1x32xf32, #tpu.memory_space<vmem>>, vector<1x32xf32>
    %607 = vector.broadcast %606 : vector<1x32xf32> to vector<64x32xf32>
    %608 = arith.addf %605, %607 : vector<64x32xf32>
    %cst_186 = arith.constant dense<0.000000e+00> : vector<32xf32>
    %609 = vector.multi_reduction <add>, %608, %cst_186 [0] : vector<64x32xf32> to vector<32xf32>
    %610 = vector.shape_cast %609 : vector<32xf32> to vector<1x32xf32>
    %cst_187 = arith.constant 1.562500e-02 : f32
    %611 = vector.broadcast %cst_187 : f32 to vector<1x32xf32>
    %612 = arith.mulf %610, %611 : vector<1x32xf32>
    %613 = arith.mulf %608, %608 : vector<64x32xf32>
    %cst_188 = arith.constant dense<0.000000e+00> : vector<32xf32>
    %614 = vector.multi_reduction <add>, %613, %cst_188 [0] : vector<64x32xf32> to vector<32xf32>
    %615 = vector.shape_cast %614 : vector<32xf32> to vector<1x32xf32>
    %cst_189 = arith.constant 1.562500e-02 : f32
    %616 = vector.broadcast %cst_189 : f32 to vector<1x32xf32>
    %617 = arith.mulf %615, %616 : vector<1x32xf32>
    %618 = arith.mulf %612, %612 : vector<1x32xf32>
    %619 = arith.subf %617, %618 : vector<1x32xf32>
    %620 = vector.broadcast %612 : vector<1x32xf32> to vector<64x32xf32>
    %621 = arith.subf %608, %620 : vector<64x32xf32>
    %cst_190 = arith.constant 9.99999974E-6 : f32
    %622 = vector.broadcast %cst_190 : f32 to vector<1x32xf32>
    %623 = arith.addf %619, %622 : vector<1x32xf32>
    %624 = math.rsqrt %623 : vector<1x32xf32>
    %625 = vector.broadcast %624 : vector<1x32xf32> to vector<64x32xf32>
    %626 = arith.mulf %621, %625 : vector<64x32xf32>
    %c0_191 = arith.constant 0 : index
    %c0_192 = arith.constant 0 : index
    %627 = vector.load %arg14[%c0_191, %c0_192] : memref<1x32xf32, #tpu.memory_space<vmem>>, vector<1x32xf32>
    %628 = vector.broadcast %627 : vector<1x32xf32> to vector<64x32xf32>
    %629 = arith.mulf %626, %628 : vector<64x32xf32>
    %c0_193 = arith.constant 0 : index
    %c0_194 = arith.constant 0 : index
    %630 = vector.load %arg15[%c0_193, %c0_194] : memref<1x32xf32, #tpu.memory_space<vmem>>, vector<1x32xf32>
    %631 = vector.broadcast %630 : vector<1x32xf32> to vector<64x32xf32>
    %632 = arith.addf %629, %631 : vector<64x32xf32>
    %cst_195 = arith.constant 0.000000e+00 : f32
    %633 = vector.broadcast %cst_195 : f32 to vector<64x32xf32>
    %634 = arith.maximumf %632, %633 : vector<64x32xf32>
    %c0_196 = arith.constant 0 : index
    %c0_197 = arith.constant 0 : index
    %635 = vector.load %arg16[%c0_196, %c0_197] : memref<32x3xf32, #tpu.memory_space<vmem>>, vector<32x3xf32>
    %cst_198 = arith.constant dense<0.000000e+00> : vector<64x3xf32>
    %636 = tpu.matmul %634, %635, %cst_198 {dimension_numbers = #tpu.dot_dimension_numbers<[1], [0], [0], [1], [0, 0, 1, 1], [], []>} : vector<64x32xf32>, vector<32x3xf32>, vector<64x3xf32> -> vector<64x3xf32>
    %c0_199 = arith.constant 0 : index
    %c0_200 = arith.constant 0 : index
    %637 = vector.load %arg17[%c0_199, %c0_200] : memref<1x3xf32, #tpu.memory_space<vmem>>, vector<1x3xf32>
    %638 = vector.broadcast %637 : vector<1x3xf32> to vector<64x3xf32>
    %639 = arith.addf %636, %638 : vector<64x3xf32>
    %640 = vector.shape_cast %639 : vector<64x3xf32> to vector<8x8x3xf32>
    %cst_201 = arith.constant dense<0.000000e+00> : vector<8x3xf32>
    %641 = vector.multi_reduction <add>, %640, %cst_201 [0] : vector<8x8x3xf32> to vector<8x3xf32>
    %cst_202 = arith.constant 8.000000e+00 : f32
    %642 = vector.broadcast %cst_202 : f32 to vector<8x3xf32>
    %643 = arith.divf %641, %642 : vector<8x3xf32>
    %c0_203 = arith.constant 0 : index
    %c0_204 = arith.constant 0 : index
    %644 = vector.load %arg19[%c0_203, %c0_204] : memref<8x3xf32, #tpu.memory_space<vmem>>, vector<8x3xf32>
    tpu.vector_store %arg19[%c0_203, %c0_204], %643 {strides = array<i32>} : memref<8x3xf32, #tpu.memory_space<vmem>>, vector<8x3xf32>,
    return
  }
}

</mosaic_0001>

<bundles_post_ra>
// kernel: deepar_dann_forward.1
= control target key start
LH: loop header
LB: loop body
LE: loop exit
PB: predicated region body
PF: predicated region fallthrough
CT: control target
= control target key end

     0   :  { %vm78_vm0 = vcmask 130048   ;;  %v5951_v10 = vmov 0.0|0.0   ;;  %vm5952_vm1 = vmmov 0   ;;  %v5953_v16 = vmov 0.0   ;;  %s5954_s30 = smov 32   ;;  %s6972_s1 = inlined_call_operand.vmem [shape: f32[16,128], index: 1, kind: input, shape index: {}]   ;;  %s6973_s0 = inlined_call_operand.vmem [shape: f32[8,8,16], index: 0, kind: input, shape index: {}]   ;;  %s6974_s2 = inlined_call_operand.vmem [shape: f32[32,128], index: 2, kind: input, shape index: {}]   ;;  %s6975_s3 = inlined_call_operand.vmem [shape: f32[1,128], index: 3, kind: input, shape index: {}]   ;;  %s6976_s5 = inlined_call_operand.vmem [shape: f32[32,128], index: 5, kind: input, shape index: {}]   ;;  %s6977_s4 = inlined_call_operand.vmem [shape: f32[32,128], index: 4, kind: input, shape index: {}]   ;;  %s6978_s6 = inlined_call_operand.vmem [shape: f32[1,128], index: 6, kind: input, shape index: {}]   ;;  %s6979_s7 = inlined_call_operand.vmem [shape: f32[32,128], index: 7, kind: input, shape index: {}]   ;;  %s6980_s8 = inlined_call_operand.vmem [shape: f32[32,128], index: 8, kind: input, shape index: {}]   ;;  %s6981_s9 = inlined_call_operand.vmem [shape: f32[1,128], index: 9, kind: input, shape index: {}]   ;;  %s6982_s12 = inlined_call_operand.vmem [shape: f32[32,32], index: 12, kind: input, shape index: {}]   ;;  %s6983_s10 = inlined_call_operand.vmem [shape: f32[64,4], index: 10, kind: input, shape index: {}]   ;;  %s6984_s13 = inlined_call_operand.vmem [shape: f32[1,32], index: 13, kind: input, shape index: {}]   ;;  %s6985_s11 = inlined_call_operand.vmem [shape: f32[1,4], index: 11, kind: input, shape index: {}]   ;;  %s6986_s18 = inlined_call_operand.vmem [shape: f32[4,8,4], index: 18, kind: output, shape index: {0}]   ;;  %s6987_s16 = inlined_call_operand.vmem [shape: f32[32,3], index: 16, kind: input, shape index: {}]   ;;  %s6988_s14 = inlined_call_operand.vmem [shape: f32[1,32], index: 14, kind: input, shape index: {}]   ;;  %s6989_s15 = inlined_call_operand.vmem [shape: f32[1,32], index: 15, kind: input, shape index: {}]   ;;  %s6990_s17 = inlined_call_operand.vmem [shape: f32[1,3], index: 17, kind: input, shape index: {}]   ;;  %s6991_s19 = inlined_call_operand.vmem [shape: f32[8,3], index: 19, kind: output, shape index: {1}]  }
   0x1   :  { %6996 = sst [smem:[#allocation5_spill]] %s6972_s1  ;;  %v224_v39 = vld [vmem:[%s6976_s5] sm:$0xff]  ;;  %v225_v40 = vld [vmem:[%s6976_s5 + $0x8] sm:$0xff]  ;;  %v226_v44 = vld [vmem:[%s6976_s5 + $0x10] sm:$0xff]  ;;  %vm239_vm2 = vcmask 261120   ;;  %vm4142_vm8 = vcmask 31744  }
   0x2   :  { %6997 = sst [smem:[#allocation6_spill]] %s6973_s0  ;;  %s7000_s20 = sld [smem:[#allocation5_spill]]  ;;  %v6145_v41 = vpack.c.bf16 %v225_v40, %v224_v39  ;;  %v227_v45 = vld [vmem:[%s6976_s5 + $0x18] sm:$0xff]  ;;  %v220_v49 = vld [vmem:[%s6977_s4] sm:$0xff]  ;;  %v221_v50 = vld [vmem:[%s6977_s4 + $0x8] sm:$0xff]  ;;  %vm4545_vm9 = vcmask 23552  }
   0x3   :  { %6998 = sst [smem:[#allocation7_spill]] %s6974_s2  ;;  %s7001_s23 = sld [smem:[#allocation6_spill]]  ;;  %v6163_v46 = vpack.c.bf16 %v227_v45, %v226_v44  ;;  %v6183_v51 = vpack.c.bf16 %v221_v50, %v220_v49  ;;  %v222_v52 = vld [vmem:[%s6977_s4 + $0x10] sm:$0xff]  ;;  %v223_v53 = vld [vmem:[%s6977_s4 + $0x18] sm:$0xff]  ;;  %v233_v44 = vld [vmem:[%s6980_s8] sm:$0xff] }
   0x4   :  { %6999 = sst [smem:[#allocation8_spill]] %s6975_s3  ;;  %s7002_s3 = sld [smem:[#allocation7_spill]]  ;;  %v6194_v55 = vpack.c.bf16 %v223_v53, %v222_v52  ;;  %v234_v45 = vld [vmem:[%s6980_s8 + $0x8] sm:$0xff]  ;;  %v232_v49 = vld [vmem:[%s6979_s7 + $0x18] sm:$0xff]  ;;  %v235_v52 = vld [vmem:[%s6980_s8 + $0x10] sm:$0xff] }
   0x5   :  { %s7003_s1 = sld [smem:[#allocation8_spill]]  ;;  %s5955_s5 = smov 64   ;;  %v6263_v50 = vpack.c.bf16 %v234_v45, %v233_v44  ;;  %v236_v53 = vld [vmem:[%s6980_s8 + $0x18] sm:$0xff] }
   0x8   :  { %v69_v0 = vld [vmem:[%s7000_s20] sm:$0xff]  ;;  %v70_v1 = vld [vmem:[%s7000_s20 + $0x8] sm:$0xff] }
   0x9   :  { %v65_v2 = vld [vmem:[%s7001_s23 + $0x20] sm:$0xff]  ;;  %v5447_v3 = vpack.c.bf16 %v70_v1, %v69_v0  ;;  %v66_v7 = vld [vmem:[%s7001_s23 + $0x28] sm:$0xff]  ;;  %v67_v11 = vld [vmem:[%s7001_s23 + $0x30] sm:$0xff] }
   0xa   :  { %4933 = vmatprep.mubr.msk.f32.mxu1 %vm78_vm0, %v65_v2  ;;  %v216_v4 = vld [vmem:[%s7002_s3] sm:$0xff]  ;;  %v217_v5 = vld [vmem:[%s7002_s3 + $0x8] sm:$0xff]  ;;  %v218_v12 = vld [vmem:[%s7002_s3 + $0x10] sm:$0xff] }
   0xb   :  { %v61_v6 = vld [vmem:[%s7001_s23] sm:$0xff]  ;;  %5723 = vmatprep.subr.bf16.mxu1 %v5447_v3  ;;  %5448 = vmatprep.subr.bf16.mxu0 %v5447_v3  ;;  %v6078_v8 = vpack.c.bf16 %v217_v5, %v216_v4  ;;  %v62_v9 = vld [vmem:[%s7001_s23 + $0x8] sm:$0xff]  ;;  %v219_v13 = vld [vmem:[%s7002_s3 + $0x18] sm:$0xff] }
   0xc   :  { %5724 = vmatpush3.bf16.msra.mxu1 %v5447_v3  ;;  %5450 = vmatpush3.bf16.msra.mxu0 %v5447_v3  ;;  %v68_v14 = vld [vmem:[%s7001_s23 + $0x38] sm:$0xff]  ;;  %v6102_v15 = vpack.c.bf16 %v219_v13, %v218_v12  ;;  %v6126_v21 = vld [vmem:[%s7003_s1] ss:$0 sm:$0xff]  ;;  %v63_v42 = vld [vmem:[%s7001_s23 + $0x10] sm:$0xff] }
   0xd   :  { %5451 = vmatprep.subr.bf16.mxu1 %v5951_v10  ;;  %4927 = vmatprep.mubr.msk.f32.mxu0 %vm78_vm0, %v61_v6  ;;  %v64_v43 = vld [vmem:[%s7001_s23 + $0x18] sm:$0xff]  ;;  %v6217_v0 = vld [vmem:[%s6978_s6] ss:$0 sm:$0xff] }
   0xe   :  { %5463 = vmatprep.subr.bf16.mxu0 %v5951_v10 }
   0xf   :  { %4934 = vmatmul.mubr.msk.f32.vlgmr.msra.gmra.mrb[0].mxu1 %vm78_vm0, %v66_v7  ;;  %4928 = vmatmul.mubr.msk.f32.vlgmr.msra.gmra.mrb[0].mxu0 %vm78_vm0, %v62_v9 }
  0x10   :  { %5453 = vmatpush3.bf16.msra.mxu1 %v6078_v8  ;;  %4936 = vmatprep.mubr.msk.f32.mxu1 %vm78_vm0, %v67_v11 }
  0x11   :  { %5454 = vmatprep.subr.bf16.mxu1 %v5951_v10  ;;  %5465 = vmatpush3.bf16.msra.mxu0 %v6145_v41 }
  0x12   :  { %5466 = vmatprep.subr.bf16.mxu0 %v5951_v10  ;;  %4930 = vmatprep.mubr.msk.f32.mxu0 %vm78_vm0, %v63_v42  ;;  %v229_v42 = vld [vmem:[%s6979_s7] sm:$0xff] }
  0x13   :  { %4937 = vmatmul.mubr.msk.f32.gmra.mrb[2].mxu1 %vm78_vm0, %v68_v14  ;;  %4931 = vmatmul.mubr.msk.f32.gmra.mrb[2].mxu0 %vm78_vm0, %v64_v43  ;;  %v230_v43 = vld [vmem:[%s6979_s7 + $0x8] sm:$0xff] }
  0x14   :  { %5456 = vmatpush3.bf16.msra.mxu1 %v6102_v15  ;;  %4947 = vmatprep.mubr.msk.f32.mxu1 %vm5952_vm1, %v5953_v16 }
  0x15   :  { %5457 = vmatprep.subr.bf16.mxu1 %v5951_v10  ;;  %4969 = vmatprep.mubr.msk.f32.mxu0 %vm5952_vm1, %v5953_v16 }
  0x16   :  { %5468 = vmatpush3.bf16.msra.mxu0 %v6163_v46 }
  0x17   :  { %4948 = vmatmul.mubr.f32.vlgmr.msra.gmra.mrb[4].mxu1 %v5953_v16  ;;  %5475 = vmatprep.subr.bf16.mxu0 %v5951_v10 }
  0x18   :  { %5459 = vmatpush3.bf16.msra.mxu1 %v6078_v8  ;;  %4958 = vmatprep.mubr.msk.f32.mxu1 %vm5952_vm1, %v5953_v16 }
  0x19   :  { %5460 = vmatprep.subr.bf16.mxu1 %v5951_v10  ;;  %4970 = vmatmul.mubr.f32.vlgmr.msra.gmra.mrb[4].mxu0 %v5953_v16 }
  0x1a   :  { %5477 = vmatpush3.bf16.msra.mxu0 %v6078_v8  ;;  %4991 = vmatprep.mubr.msk.f32.mxu0 %vm5952_vm1, %v5953_v16 }
  0x1b   :  { %5478 = vmatprep.subr.bf16.mxu0 %v5951_v10 }
  0x1c   :  { %5462 = vmatpush3.bf16.msra.mxu1 %v6102_v15 }
  0x1d   :  { %5469 = vmatprep.subr.bf16.mxu1 %v5951_v10 }
  0x1e   :  { %5480 = vmatpush3.bf16.msra.mxu0 %v6102_v15 }
  0x1f   :  { %5487 = vmatprep.subr.bf16.mxu0 %v5951_v10 }
  0xe2   :  { %v6117_v17 = vpop.f32.mrb[0].mxu1  ;;  %v6119_v18 = vpop.f32.mrb[0].mxu0 }
  0xe3   :  { %v6121_v19 = vpop.f32.mrb[1].mxu1  ;;  %v169_v20 = vpop.f32.mrb[1].mxu0  ;;  %v175_v60 = vadd.f32 %v6119_v18, %v6126_v21 }
  0xe4   :  { %v170_v24 = vadd.f32 %v6126_v21, %v169_v20 }
  0xe6   :  { %v6128_v22 = vpop.f32.mrb[2].mxu1  ;;  %v6208_v56 = vpop.f32.mrb[2].mxu0 }
  0xe7   :  { %v6130_v23 = vpop.f32.mrb[3].mxu1  ;;  %v6210_v57 = vpop.f32.mrb[3].mxu0 }
  0xea   :  { %v309_v25 = vpop.f32.mrb[4].mxu1 }
  0xeb   :  { %v313_v26 = vadd.f32 %v309_v25, %v170_v24  ;;  %v4949_v27 = vpop.f32.mrb[5].mxu1 }
  0xec   :  { %v514_v58 = vpop.f32.mrb[4].mxu0 }
  0xed   :  { %5738 = vtanh.f32 %v313_v26  ;;  %v4581_v29 = vmul.f32 -1.442695, %v313_v26  ;;  %v4971_v59 = vpop.f32.mrb[5].mxu0 }
  0xee   :  { %v6280_v59 = vpack.c.bf16 %v236_v53, %v235_v52 }
  0xef   :  { %5740 = vpow2.f32 %v4581_v29 }
  0xf7   :  { %v5739_v28 = vpop.eup %5738 }
  0xf8   :  { %323 = vrot.lane.b32.xlu0 %v5739_v28, %s5954_s30 }
  0xf9   :  { %v5741_v30 = vpop.eup %5740 }
  0xfa   :  { %v317_v31 = vadd.f32 1.0, %v5741_v30 }
  0xfc   :  { %5742 = vrcp.f32 %v317_v31 }
 0x106   :  { %v5743_v32 = vpop.eup %5742 }
 0x107   :  { %v321_v35 = vmul.f32 0.0, %v5743_v32 }
 0x16a   :  { %v324_v33 = vpop.permute.xlu0 %323 }
 0x16b   :  { %v326_v34 = vmul.f32 %v5743_v32, %v324_v33 }
 0x16d   :  { %328 = vrot.lane.b32.xlu0 %v326_v34, %s5954_s30 }
 0x1df   :  { %v329_v36 = vpop.permute.xlu0 %328 }
 0x1e0   :  { %v6135_v37 = vadd.f32 %v329_v36, %v321_v35 }
 0x1e2   :  { %5744 = vtanh.f32 %v6135_v37 }
 0x1ec   :  { %v5745_v38 = vpop.eup %5744 }
 0x1ed   :  { %334 = vrot.lane.b32.xlu1 %v5745_v38, %s5954_s30 }
 0x25f   :  { %v335_v47 = vpop.permute.xlu1 %334 }
 0x260   :  { %v337_v48 = vmul.f32 %v5743_v32, %v335_v47  ;;  %v6254_v47 = vpack.c.bf16 %v230_v43, %v229_v42 }
 0x262   :  { %339 = vrot.lane.b32.xlu1 %v337_v48, %s5955_s5  ;;  %v231_v48 = vld [vmem:[%s6979_s7 + $0x10] sm:$0xff] }
 0x2d4   :  { %v340_v54 = vpop.permute.xlu1 %339 }
 0x2d5   :  { %342 = vst.msk [vmem:[#allocation3] sm:$0xff] %vm239_vm2, %v340_v54  ;;  %4959 = vmatmul.mubr.msk.f32.vlgmr.msra.gmra.mrb[6].mxu1 %vm239_vm2, %v340_v54 }
 0x2d6   :  { %5471 = vmatpush3.bf16.msra.mxu1 %v6183_v51  ;;  %4980 = vmatprep.mubr.msk.f32.mxu1 %vm5952_vm1, %v5953_v16 }
 0x2d7   :  { %5472 = vmatprep.subr.bf16.mxu1 %v5951_v10 }
 0x2da   :  { %5474 = vmatpush3.bf16.msra.mxu1 %v6194_v55 }
 0x2db   :  { %5481 = vmatprep.subr.bf16.mxu1 %v5951_v10 }
 0x2dd   :  { %4981 = vmatmul.mubr.msk.f32.vlgmr.msra.gmra.mrb[8].mxu1 %vm239_vm2, %v340_v54 }
 0x2de   :  { %5483 = vmatpush3.bf16.msra.mxu1 %v6145_v41  ;;  %5002 = vmatprep.mubr.msk.f32.mxu1 %vm5952_vm1, %v5953_v16 }
 0x2df   :  { %5484 = vmatprep.subr.bf16.mxu1 %v5951_v10 }
 0x2e2   :  { %5486 = vmatpush3.bf16.msra.mxu1 %v6163_v46 }
 0x2e3   :  { %5493 = vmatprep.subr.bf16.mxu1 %v5951_v10 }
 0x3a8   :  { %v413_v61 = vpop.f32.mrb[6].mxu1 }
 0x3a9   :  { %v417_v62 = vadd.f32 %v413_v61, %v175_v60  ;;  %v4960_v63 = vpop.f32.mrb[7].mxu1  ;;  %v180_v60 = vadd.f32 %v6126_v21, %v6210_v57  ;;  %v6310_v57 = vld [vmem:[%s6981_s9] ss:$0 sm:$0xff] }
 0x3ab   :  { %5746 = vtanh.f32 %v417_v62  ;;  %v4583_v7 = vmul.f32 -1.442695, %v417_v62 }
 0x3b0   :  { %v584_v1 = vpop.f32.mrb[8].mxu1 }
 0x3b1   :  { %v585_v2 = vadd.f32 %v584_v1, %v514_v58  ;;  %v4982_v3 = vpop.f32.mrb[9].mxu1  ;;  %v6273_v58 = vpack.c.bf16 %v232_v49, %v231_v48 }
 0x3b3   :  { %v594_v4 = vadd.f32 %v6217_v0, %v585_v2 }
 0x3b5   :  { %v5747_v5 = vpop.eup %5746  ;;  %5748 = vtanh.f32 %v594_v4  ;;  %v4586_v9 = vmul.f32 -1.442695, %v594_v4 }
 0x3b6   :  { %427 = vrot.lane.b32.xlu0 %v5747_v5, %s5954_s30  ;;  %5750 = vpow2.f32 %v4583_v7 }
 0x3b7   :  { %5752 = vpow2.f32 %v4586_v9 }
 0x3bf   :  { %v5749_v6 = vpop.eup %5748 }
 0x3c0   :  { %604 = vrot.lane.b32.xlu1 %v5749_v6, %s5954_s30  ;;  %v5751_v11 = vpop.eup %5750 }
 0x3c1   :  { %v421_v12 = vadd.f32 1.0, %v5751_v11  ;;  %v5753_v13 = vpop.eup %5752 }
 0x3c2   :  { %v598_v14 = vadd.f32 1.0, %v5753_v13 }
 0x3c3   :  { %5754 = vrcp.f32 %v421_v12 }
 0x3c4   :  { %5756 = vrcp.f32 %v598_v14 }
 0x3cd   :  { %v5755_v18 = vpop.eup %5754 }
 0x3ce   :  { %v5757_v25 = vpop.eup %5756  ;;  %v425_v28 = vmul.f32 %v5755_v18, %v6135_v37 }
 0x3cf   :  { %v602_v31 = vmul.f32 0.0, %v5757_v25 }
 0x428   :  { %v428_v20 = vpop.permute.xlu0 %427 }
 0x429   :  { %v430_v24 = vmul.f32 %v5755_v18, %v428_v20 }
 0x42b   :  { %432 = vrot.lane.b32.xlu0 %v430_v24, %s5954_s30 }
 0x432   :  { %v605_v26 = vpop.permute.xlu1 %604 }
 0x433   :  { %v607_v27 = vmul.f32 %v5757_v25, %v605_v26 }
 0x435   :  { %609 = vrot.lane.b32.xlu1 %v607_v27, %s5954_s30 }
 0x49d   :  { %v433_v29 = vpop.permute.xlu0 %432 }
 0x49e   :  { %v6225_v30 = vadd.f32 %v433_v29, %v425_v28 }
 0x4a0   :  { %5758 = vtanh.f32 %v6225_v30 }
 0x4a7   :  { %v610_v32 = vpop.permute.xlu1 %609 }
 0x4a8   :  { %v6228_v33 = vadd.f32 %v610_v32, %v602_v31 }
 0x4aa   :  { %v5759_v34 = vpop.eup %5758  ;;  %5760 = vtanh.f32 %v6228_v33 }
 0x4ab   :  { %438 = vrot.lane.b32.xlu0 %v5759_v34, %s5954_s30 }
 0x4b4   :  { %v5761_v35 = vpop.eup %5760 }
 0x4b5   :  { %615 = vrot.lane.b32.xlu1 %v5761_v35, %s5954_s30 }
 0x51d   :  { %v439_v36 = vpop.permute.xlu0 %438 }
 0x51e   :  { %v441_v38 = vmul.f32 %v5755_v18, %v439_v36 }
 0x520   :  { %443 = vrot.lane.b32.xlu0 %v441_v38, %s5955_s5 }
 0x527   :  { %v616_v37 = vpop.permute.xlu1 %615 }
 0x528   :  { %v618_v39 = vmul.f32 %v5757_v25, %v616_v37 }
 0x52a   :  { %725 = vrot.lane.b32.xlu1 %v618_v39, %s5955_s5 }
 0x592   :  { %v444_v40 = vpop.permute.xlu0 %443 }
 0x593   :  { %447 = vst.msk [vmem:[#allocation3 + $0x8] sm:$0xff] %vm239_vm2, %v444_v40  ;;  %4992 = vmatmul.mubr.msk.f32.vlgmr.msra.gmra.mrb[6].mxu0 %vm239_vm2, %v444_v40 }
 0x594   :  { %5489 = vmatpush3.bf16.msra.mxu0 %v6183_v51  ;;  %5013 = vmatprep.mubr.msk.f32.mxu0 %vm5952_vm1, %v5953_v16 }
 0x595   :  { %5490 = vmatprep.subr.bf16.mxu0 %v5951_v10 }
 0x598   :  { %5492 = vmatpush3.bf16.msra.mxu0 %v6194_v55 }
 0x599   :  { %5499 = vmatprep.subr.bf16.mxu0 %v5951_v10 }
 0x59b   :  { %5014 = vmatmul.mubr.msk.f32.vlgmr.msra.gmra.mrb[8].mxu0 %vm239_vm2, %v444_v40 }
 0x59c   :  { %5501 = vmatpush3.bf16.msra.mxu0 %v6254_v47  ;;  %v726_v54 = vpop.permute.xlu1 %725  ;;  %5035 = vmatprep.mubr.msk.f32.mxu0 %vm5952_vm1, %v5953_v16 }
 0x59d   :  { %5003 = vmatmul.mubr.msk.f32.vlgmr.msra.gmra.mrb[10].mxu1 %vm239_vm2, %v726_v54  ;;  %5502 = vmatprep.subr.bf16.mxu0 %v5951_v10 }
 0x59e   :  { %5495 = vmatpush3.bf16.msra.mxu1 %v6263_v50  ;;  %5024 = vmatprep.mubr.msk.f32.mxu1 %vm5952_vm1, %v5953_v16 }
 0x59f   :  { %5496 = vmatprep.subr.bf16.mxu1 %v5951_v10 }
 0x5a0   :  { %5504 = vmatpush3.bf16.msra.mxu0 %v6273_v58 }
 0x5a1   :  { %5511 = vmatprep.subr.bf16.mxu0 %v5951_v10 }
 0x5a2   :  { %5498 = vmatpush3.bf16.msra.mxu1 %v6280_v59 }
 0x5a3   :  { %5036 = vmatmul.mubr.msk.f32.vlgmr.msra.gmra.mrb[10].mxu0 %vm239_vm2, %v726_v54  ;;  %5505 = vmatprep.subr.bf16.mxu1 %v5951_v10 }
 0x5a4   :  { %5513 = vmatpush3.bf16.msra.mxu0 %v6145_v41  ;;  %5057 = vmatprep.mubr.msk.f32.mxu0 %vm5952_vm1, %v5953_v16 }
 0x5a5   :  { %5025 = vmatmul.mubr.f32.vlgmr.msra.gmra.mrb[12].mxu1 %v5953_v16  ;;  %5514 = vmatprep.subr.bf16.mxu0 %v5951_v10 }
 0x5a6   :  { %5507 = vmatpush3.bf16.msra.mxu1 %v6078_v8  ;;  %5046 = vmatprep.mubr.msk.f32.mxu1 %vm5952_vm1, %v5953_v16 }
 0x5a7   :  { %5508 = vmatprep.subr.bf16.mxu1 %v5951_v10 }
 0x5a8   :  { %5516 = vmatpush3.bf16.msra.mxu0 %v6163_v46 }
 0x5a9   :  { %5523 = vmatprep.subr.bf16.mxu0 %v5951_v10 }
 0x5aa   :  { %5510 = vmatpush3.bf16.msra.mxu1 %v6102_v15 }
 0x5ab   :  { %5517 = vmatprep.subr.bf16.mxu1 %v5951_v10 }
 0x666   :  { %v689_v61 = vpop.f32.mrb[6].mxu0 }
 0x667   :  { %v693_v62 = vadd.f32 %v689_v61, %v180_v60  ;;  %v4993_v63 = vpop.f32.mrb[7].mxu0 }
 0x669   :  { %5762 = vtanh.f32 %v693_v62  ;;  %v4588_v25 = vmul.f32 -1.442695, %v693_v62 }
 0x66e   :  { %v865_v1 = vpop.f32.mrb[8].mxu0 }
 0x66f   :  { %v5015_v2 = vpop.f32.mrb[9].mxu0 }
 0x670   :  { %v795_v3 = vpop.f32.mrb[10].mxu1 }
 0x671   :  { %v866_v4 = vadd.f32 %v865_v1, %v795_v3  ;;  %v5004_v5 = vpop.f32.mrb[11].mxu1 }
 0x673   :  { %v5763_v6 = vpop.eup %5762  ;;  %v869_v7 = vadd.f32 %v6217_v0, %v866_v4 }
 0x674   :  { %703 = vrot.lane.b32.xlu0 %v5763_v6, %s5954_s30 }
 0x675   :  { %5764 = vtanh.f32 %v869_v7  ;;  %v4591_v26 = vmul.f32 -1.442695, %v869_v7 }
 0x676   :  { %v1030_v9 = vpop.f32.mrb[10].mxu0 }
 0x677   :  { %v5037_v11 = vpop.f32.mrb[11].mxu0 }
 0x678   :  { %v960_v12 = vpop.f32.mrb[12].mxu1 }
 0x679   :  { %v1031_v13 = vadd.f32 %v1030_v9, %v960_v12  ;;  %v5026_v14 = vpop.f32.mrb[13].mxu1 }
 0x67b   :  { %v1040_v18 = vadd.f32 %v6310_v57, %v1031_v13  ;;  %v185_v13 = vadd.f32 %v6208_v56, %v6126_v21 }
 0x67d   :  { %5766 = vtanh.f32 %v1040_v18  ;;  %v4594_v29 = vmul.f32 -1.442695, %v1040_v18 }
 0x67e   :  { %5768 = vpow2.f32 %v4588_v25 }
 0x67f   :  { %v5765_v20 = vpop.eup %5764  ;;  %5770 = vpow2.f32 %v4591_v26 }
 0x680   :  { %879 = vrot.lane.b32.xlu1 %v5765_v20, %s5954_s30 }
 0x687   :  { %v5767_v24 = vpop.eup %5766 }
 0x688   :  { %1050 = vrot.lane.b32.xlu0 %v5767_v24, %s5954_s30  ;;  %v5769_v27 = vpop.eup %5768 }
 0x689   :  { %v697_v28 = vadd.f32 1.0, %v5769_v27  ;;  %v5771_v31 = vpop.eup %5770 }
 0x68a   :  { %v873_v32 = vadd.f32 1.0, %v5771_v31 }
 0x68b   :  { %5772 = vrcp.f32 %v697_v28 }
 0x68c   :  { %5774 = vpow2.f32 %v4594_v29 }
 0x68d   :  { %5776 = vrcp.f32 %v873_v32 }
 0x695   :  { %v5773_v34 = vpop.eup %5772 }
 0x696   :  { %v5775_v38 = vpop.eup %5774  ;;  %v701_v48 = vmul.f32 %v5773_v34, %v6225_v30 }
 0x697   :  { %v1044_v37 = vadd.f32 1.0, %v5775_v38  ;;  %v5777_v39 = vpop.eup %5776 }
 0x698   :  { %v877_v53 = vmul.f32 %v5777_v39, %v6228_v33 }
 0x699   :  { %5778 = vrcp.f32 %v1044_v37 }
 0x6a3   :  { %v5779_v43 = vpop.eup %5778 }
 0x6a4   :  { %v1048_v62 = vmul.f32 0.0, %v5779_v43 }
 0x6e6   :  { %v704_v35 = vpop.permute.xlu0 %703 }
 0x6e7   :  { %v706_v36 = vmul.f32 %v5773_v34, %v704_v35 }
 0x6e9   :  { %708 = vrot.lane.b32.xlu1 %v706_v36, %s5954_s30 }
 0x6f2   :  { %v880_v40 = vpop.permute.xlu1 %879 }
 0x6f3   :  { %v882_v42 = vmul.f32 %v5777_v39, %v880_v40 }
 0x6f5   :  { %884 = vrot.lane.b32.xlu0 %v882_v42, %s5954_s30 }
 0x6fa   :  { %v1051_v44 = vpop.permute.xlu0 %1050 }
 0x6fb   :  { %v1053_v45 = vmul.f32 %v5779_v43, %v1051_v44 }
 0x6fd   :  { %1055 = vrot.lane.b32.xlu1 %v1053_v45, %s5954_s30 }
 0x75b   :  { %v709_v49 = vpop.permute.xlu1 %708 }
 0x75c   :  { %v6319_v52 = vadd.f32 %v709_v49, %v701_v48 }
 0x75e   :  { %5780 = vtanh.f32 %v6319_v52 }
 0x767   :  { %v885_v54 = vpop.permute.xlu0 %884 }
 0x768   :  { %v5781_v60 = vpop.eup %5780  ;;  %v6323_v61 = vadd.f32 %v885_v54, %v877_v53 }
 0x769   :  { %714 = vrot.lane.b32.xlu0 %v5781_v60, %s5954_s30 }
 0x76a   :  { %5782 = vtanh.f32 %v6323_v61 }
 0x76f   :  { %v1056_v63 = vpop.permute.xlu1 %1055 }
 0x770   :  { %v6327_v1 = vadd.f32 %v1056_v63, %v1048_v62 }
 0x772   :  { %5784 = vtanh.f32 %v6327_v1 }
 0x774   :  { %v5783_v30 = vpop.eup %5782 }
 0x775   :  { %890 = vrot.lane.b32.xlu1 %v5783_v30, %s5954_s30 }
 0x77c   :  { %v5785_v2 = vpop.eup %5784 }
 0x77d   :  { %1061 = vrot.lane.b32.xlu0 %v5785_v2, %s5954_s30 }
 0x7db   :  { %v715_v33 = vpop.permute.xlu0 %714 }
 0x7dc   :  { %v717_v3 = vmul.f32 %v5773_v34, %v715_v33 }
 0x7de   :  { %719 = vrot.lane.b32.xlu1 %v717_v3, %s5955_s5 }
 0x7e7   :  { %v891_v4 = vpop.permute.xlu1 %890 }
 0x7e8   :  { %v893_v5 = vmul.f32 %v5777_v39, %v891_v4 }
 0x7ea   :  { %1171 = vrot.lane.b32.xlu0 %v893_v5, %s5955_s5 }
 0x7ef   :  { %v1062_v6 = vpop.permute.xlu0 %1061 }
 0x7f0   :  { %v1064_v7 = vmul.f32 %v5779_v43, %v1062_v6 }
 0x7f2   :  { %1341 = vrot.lane.b32.xlu1 %v1064_v7, %s5955_s5 }
 0x850   :  { %v720_v9 = vpop.permute.xlu1 %719 }
 0x851   :  { %723 = vst.msk [vmem:[#allocation3 + $0x10] sm:$0xff] %vm239_vm2, %v720_v9  ;;  %5047 = vmatmul.mubr.msk.f32.vlgmr.msra.gmra.mrb[14].mxu1 %vm239_vm2, %v720_v9 }
 0x852   :  { %5519 = vmatpush3.bf16.msra.mxu1 %v6183_v51  ;;  %5068 = vmatprep.mubr.msk.f32.mxu1 %vm5952_vm1, %v5953_v16 }
 0x853   :  { %5520 = vmatprep.subr.bf16.mxu1 %v5951_v10 }
 0x856   :  { %5522 = vmatpush3.bf16.msra.mxu1 %v6194_v55 }
 0x857   :  { %5529 = vmatprep.subr.bf16.mxu1 %v5951_v10 }
 0x859   :  { %5069 = vmatmul.mubr.msk.f32.vlgmr.msra.gmra.mrb[16].mxu1 %vm239_vm2, %v720_v9 }
 0x85a   :  { %5531 = vmatpush3.bf16.msra.mxu1 %v6254_v47  ;;  %5090 = vmatprep.mubr.msk.f32.mxu1 %vm5952_vm1, %v5953_v16 }
 0x85b   :  { %5532 = vmatprep.subr.bf16.mxu1 %v5951_v10 }
 0x85c   :  { %v1172_v11 = vpop.permute.xlu0 %1171 }
 0x85d   :  { %5058 = vmatmul.mubr.msk.f32.vlgmr.msra.gmra.mrb[12].mxu0 %vm239_vm2, %v1172_v11 }
 0x85e   :  { %5525 = vmatpush3.bf16.msra.mxu0 %v6263_v50  ;;  %5534 = vmatpush3.bf16.msra.mxu1 %v6273_v58 }
 0x85f   :  { %5526 = vmatprep.subr.bf16.mxu0 %v5951_v10  ;;  %5079 = vmatprep.mubr.msk.f32.mxu0 %vm5952_vm1, %v5953_v16 }
 0x860   :  { %5541 = vmatprep.subr.bf16.mxu1 %v5951_v10 }
 0x861   :  { %5091 = vmatmul.mubr.msk.f32.vlgmr.msra.gmra.mrb[18].mxu1 %vm239_vm2, %v1172_v11 }
 0x862   :  { %5528 = vmatpush3.bf16.msra.mxu0 %v6280_v59  ;;  %5543 = vmatpush3.bf16.msra.mxu1 %v6145_v41 }
 0x863   :  { %5535 = vmatprep.subr.bf16.mxu0 %v5951_v10  ;;  %5544 = vmatprep.subr.bf16.mxu1 %v5951_v10 }
 0x864   :  { %v1342_v12 = vpop.permute.xlu1 %1341  ;;  %5112 = vmatprep.mubr.msk.f32.mxu1 %vm5952_vm1, %v5953_v16 }
 0x865   :  { %5080 = vmatmul.mubr.msk.f32.vlgmr.msra.gmra.mrb[14].mxu0 %vm239_vm2, %v1342_v12 }
 0x866   :  { %5537 = vmatpush3.bf16.msra.mxu0 %v6078_v8  ;;  %5101 = vmatprep.mubr.msk.f32.mxu0 %vm5952_vm1, %v5953_v16 }
 0x867   :  { %5538 = vmatprep.subr.bf16.mxu0 %v5951_v10  ;;  %5546 = vmatpush3.bf16.msra.mxu1 %v6163_v46 }
 0x868   :  { %5553 = vmatprep.subr.bf16.mxu1 %v5951_v10 }
 0x86a   :  { %5540 = vmatpush3.bf16.msra.mxu0 %v6102_v15 }
 0x86b   :  { %5547 = vmatprep.subr.bf16.mxu0 %v5951_v10 }
 0x924   :  { %v1135_v14 = vpop.f32.mrb[14].mxu1 }
 0x925   :  { %v1139_v18 = vadd.f32 %v1135_v14, %v185_v13  ;;  %v5048_v20 = vpop.f32.mrb[15].mxu1 }
 0x927   :  { %5786 = vtanh.f32 %v1139_v18  ;;  %v4596_v40 = vmul.f32 -1.442695, %v1139_v18 }
 0x92c   :  { %v1311_v24 = vpop.f32.mrb[16].mxu1 }
 0x92d   :  { %v5070_v25 = vpop.f32.mrb[17].mxu1 }
 0x930   :  { %v1241_v26 = vpop.f32.mrb[12].mxu0 }
 0x931   :  { %v5787_v27 = vpop.eup %5786  ;;  %v1312_v28 = vadd.f32 %v1311_v24, %v1241_v26  ;;  %v5059_v29 = vpop.f32.mrb[13].mxu0 }
 0x932   :  { %1149 = vrot.lane.b32.xlu0 %v5787_v27, %s5954_s30 }
 0x933   :  { %v1315_v31 = vadd.f32 %v6217_v0, %v1312_v28 }
 0x934   :  { %v1481_v32 = vpop.f32.mrb[18].mxu1 }
 0x935   :  { %5788 = vtanh.f32 %v1315_v31  ;;  %v5092_v34 = vpop.f32.mrb[19].mxu1  ;;  %v4599_v43 = vmul.f32 -1.442695, %v1315_v31 }
 0x938   :  { %v1411_v35 = vpop.f32.mrb[14].mxu0 }
 0x939   :  { %v1482_v36 = vadd.f32 %v1481_v32, %v1411_v35  ;;  %v5081_v56 = vpop.f32.mrb[15].mxu0  ;;  %v190_v35 = vadd.f32 %v6126_v21, %v6121_v19 }
 0x93b   :  { %v1485_v38 = vadd.f32 %v6310_v57, %v1482_v36 }
 0x93d   :  { %5790 = vtanh.f32 %v1485_v38  ;;  %v4602_v45 = vmul.f32 -1.442695, %v1485_v38 }
 0x93e   :  { %5792 = vpow2.f32 %v4596_v40 }
 0x93f   :  { %v5789_v37 = vpop.eup %5788  ;;  %5794 = vpow2.f32 %v4599_v43 }
 0x940   :  { %1325 = vrot.lane.b32.xlu1 %v5789_v37, %s5954_s30 }
 0x947   :  { %v5791_v39 = vpop.eup %5790 }
 0x948   :  { %1495 = vrot.lane.b32.xlu0 %v5791_v39, %s5954_s30  ;;  %v5793_v42 = vpop.eup %5792 }
 0x949   :  { %v1143_v44 = vadd.f32 1.0, %v5793_v42  ;;  %v5795_v48 = vpop.eup %5794 }
 0x94a   :  { %v1319_v53 = vadd.f32 1.0, %v5795_v48 }
 0x94b   :  { %5796 = vrcp.f32 %v1143_v44 }
 0x94c   :  { %5798 = vpow2.f32 %v4602_v45 }
 0x94d   :  { %5800 = vrcp.f32 %v1319_v53 }
 0x955   :  { %v5797_v49 = vpop.eup %5796 }
 0x956   :  { %v5799_v62 = vpop.eup %5798  ;;  %v1147_v6 = vmul.f32 %v5797_v49, %v6319_v52 }
 0x957   :  { %v1489_v63 = vadd.f32 1.0, %v5799_v62  ;;  %v5801_v30 = vpop.eup %5800 }
 0x958   :  { %v1323_v12 = vmul.f32 %v5801_v30, %v6323_v61 }
 0x959   :  { %5802 = vrcp.f32 %v1489_v63 }
 0x963   :  { %v5803_v3 = vpop.eup %5802 }
 0x964   :  { %v1493_v18 = vmul.f32 %v5803_v3, %v6327_v1 }
 0x9a4   :  { %v1150_v54 = vpop.permute.xlu0 %1149 }
 0x9a5   :  { %v1152_v60 = vmul.f32 %v5797_v49, %v1150_v54 }
 0x9a7   :  { %1154 = vrot.lane.b32.xlu1 %v1152_v60, %s5954_s30 }
 0x9b2   :  { %v1326_v2 = vpop.permute.xlu1 %1325 }
 0x9b3   :  { %v1328_v33 = vmul.f32 %v5801_v30, %v1326_v2 }
 0x9b5   :  { %1330 = vrot.lane.b32.xlu0 %v1328_v33, %s5954_s30 }
 0x9ba   :  { %v1496_v4 = vpop.permute.xlu0 %1495 }
 0x9bb   :  { %v1498_v5 = vmul.f32 %v5803_v3, %v1496_v4 }
 0x9bd   :  { %1500 = vrot.lane.b32.xlu1 %v1498_v5, %s5954_s30 }
 0xa19   :  { %v1155_v7 = vpop.permute.xlu1 %1154 }
 0xa1a   :  { %v6382_v9 = vadd.f32 %v1155_v7, %v1147_v6 }
 0xa1c   :  { %5804 = vtanh.f32 %v6382_v9 }
 0xa26   :  { %v5805_v11 = vpop.eup %5804 }
 0xa27   :  { %v1331_v13 = vpop.permute.xlu0 %1330  ;;  %1160 = vrot.lane.b32.xlu0 %v5805_v11, %s5954_s30 }
 0xa28   :  { %v6387_v14 = vadd.f32 %v1331_v13, %v1323_v12 }
 0xa2a   :  { %5806 = vtanh.f32 %v6387_v14 }
 0xa2f   :  { %v1501_v20 = vpop.permute.xlu1 %1500 }
 0xa30   :  { %v6391_v24 = vadd.f32 %v1501_v20, %v1493_v18 }
 0xa32   :  { %5808 = vtanh.f32 %v6391_v24 }
 0xa34   :  { %v5807_v52 = vpop.eup %5806 }
 0xa35   :  { %1336 = vrot.lane.b32.xlu1 %v5807_v52, %s5954_s30 }
 0xa3c   :  { %v5809_v25 = vpop.eup %5808 }
 0xa3d   :  { %1506 = vrot.lane.b32.xlu0 %v5809_v25, %s5954_s30 }
 0xa99   :  { %v1161_v61 = vpop.permute.xlu0 %1160 }
 0xa9a   :  { %v1163_v26 = vmul.f32 %v5797_v49, %v1161_v61 }
 0xa9c   :  { %1165 = vrot.lane.b32.xlu1 %v1163_v26, %s5955_s5 }
 0xaa7   :  { %v1337_v27 = vpop.permute.xlu1 %1336 }
 0xaa8   :  { %v1339_v28 = vmul.f32 %v5801_v30, %v1337_v27 }
 0xaaa   :  { %1616 = vrot.lane.b32.xlu0 %v1339_v28, %s5955_s5 }
 0xaaf   :  { %v1507_v1 = vpop.permute.xlu0 %1506 }
 0xab0   :  { %v1509_v29 = vmul.f32 %v5803_v3, %v1507_v1 }
 0xab2   :  { %1786 = vrot.lane.b32.xlu1 %v1509_v29, %s5955_s5 }
 0xb0e   :  { %v1166_v31 = vpop.permute.xlu1 %1165 }
 0xb0f   :  { %1169 = vst.msk [vmem:[#allocation3 + $0x18] sm:$0xff] %vm239_vm2, %v1166_v31  ;;  %5102 = vmatmul.mubr.msk.f32.vlgmr.msra.gmra.mrb[16].mxu0 %vm239_vm2, %v1166_v31 }
 0xb10   :  { %5549 = vmatpush3.bf16.msra.mxu0 %v6183_v51  ;;  %5123 = vmatprep.mubr.msk.f32.mxu0 %vm5952_vm1, %v5953_v16 }
 0xb11   :  { %5550 = vmatprep.subr.bf16.mxu0 %v5951_v10 }
 0xb14   :  { %5552 = vmatpush3.bf16.msra.mxu0 %v6194_v55 }
 0xb15   :  { %5559 = vmatprep.subr.bf16.mxu0 %v5951_v10 }
 0xb17   :  { %5124 = vmatmul.mubr.msk.f32.vlgmr.msra.gmra.mrb[18].mxu0 %vm239_vm2, %v1166_v31 }
 0xb18   :  { %5561 = vmatpush3.bf16.msra.mxu0 %v6254_v47  ;;  %5145 = vmatprep.mubr.msk.f32.mxu0 %vm5952_vm1, %v5953_v16 }
 0xb19   :  { %5562 = vmatprep.subr.bf16.mxu0 %v5951_v10 }
 0xb1c   :  { %5564 = vmatpush3.bf16.msra.mxu0 %v6273_v58  ;;  %v1617_v32 = vpop.permute.xlu0 %1616 }
 0xb1d   :  { %5113 = vmatmul.mubr.msk.f32.vlgmr.msra.gmra.mrb[20].mxu1 %vm239_vm2, %v1617_v32  ;;  %5571 = vmatprep.subr.bf16.mxu0 %v5951_v10 }
 0xb1e   :  { %5555 = vmatpush3.bf16.msra.mxu1 %v6263_v50  ;;  %5134 = vmatprep.mubr.msk.f32.mxu1 %vm5952_vm1, %v5953_v16 }
 0xb1f   :  { %5146 = vmatmul.mubr.msk.f32.vlgmr.msra.gmra.mrb[20].mxu0 %vm239_vm2, %v1617_v32  ;;  %5556 = vmatprep.subr.bf16.mxu1 %v5951_v10 }
 0xb20   :  { %5573 = vmatpush3.bf16.msra.mxu0 %v6145_v41  ;;  %5167 = vmatprep.mubr.msk.f32.mxu0 %vm5952_vm1, %v5953_v16 }
 0xb21   :  { %5574 = vmatprep.subr.bf16.mxu0 %v5951_v10 }
 0xb22   :  { %5558 = vmatpush3.bf16.msra.mxu1 %v6280_v59 }
 0xb23   :  { %5565 = vmatprep.subr.bf16.mxu1 %v5951_v10 }
 0xb24   :  { %v1787_v34 = vpop.permute.xlu1 %1786  ;;  %5576 = vmatpush3.bf16.msra.mxu0 %v6163_v46 }
 0xb25   :  { %5135 = vmatmul.mubr.msk.f32.vlgmr.msra.gmra.mrb[22].mxu1 %vm239_vm2, %v1787_v34  ;;  %5583 = vmatprep.subr.bf16.mxu0 %v5951_v10 }
 0xb26   :  { %5567 = vmatpush3.bf16.msra.mxu1 %v6078_v8  ;;  %5156 = vmatprep.mubr.msk.f32.mxu1 %vm5952_vm1, %v5953_v16 }
 0xb27   :  { %5568 = vmatprep.subr.bf16.mxu1 %v5951_v10 }
 0xb2a   :  { %5570 = vmatpush3.bf16.msra.mxu1 %v6102_v15 }
 0xb2b   :  { %5577 = vmatprep.subr.bf16.mxu1 %v5951_v10 }
 0xbe2   :  { %v1580_v36 = vpop.f32.mrb[16].mxu0 }
 0xbe3   :  { %v1584_v56 = vadd.f32 %v1580_v36, %v190_v35  ;;  %v5103_v38 = vpop.f32.mrb[17].mxu0 }
 0xbe5   :  { %5810 = vtanh.f32 %v1584_v56  ;;  %v4604_v63 = vmul.f32 -1.442695, %v1584_v56 }
 0xbea   :  { %v1756_v37 = vpop.f32.mrb[18].mxu0 }
 0xbeb   :  { %v5125_v39 = vpop.f32.mrb[19].mxu0 }
 0xbef   :  { %v5811_v40 = vpop.eup %5810 }
 0xbf0   :  { %v1686_v42 = vpop.f32.mrb[20].mxu1  ;;  %1594 = vrot.lane.b32.xlu0 %v5811_v40, %s5954_s30 }
 0xbf1   :  { %v1757_v43 = vadd.f32 %v1756_v37, %v1686_v42  ;;  %v5114_v44 = vpop.f32.mrb[21].mxu1 }
 0xbf2   :  { %v1926_v45 = vpop.f32.mrb[20].mxu0 }
 0xbf3   :  { %v1760_v48 = vadd.f32 %v6217_v0, %v1757_v43  ;;  %v5147_v49 = vpop.f32.mrb[21].mxu0 }
 0xbf5   :  { %5812 = vtanh.f32 %v1760_v48  ;;  %v4607_v2 = vmul.f32 -1.442695, %v1760_v48  ;;  %v6502_v48 = vld [vmem:[%s7003_s1] ss:$0 sm:$0xff] }
 0xbf6   :  { %v195_v49 = vadd.f32 %v6502_v48, %v6117_v17 }
 0xbf8   :  { %v1856_v53 = vpop.f32.mrb[22].mxu1 }
 0xbf9   :  { %v1927_v54 = vadd.f32 %v1926_v45, %v1856_v53  ;;  %v5136_v19 = vpop.f32.mrb[23].mxu1 }
 0xbfb   :  { %v1930_v21 = vadd.f32 %v6310_v57, %v1927_v54 }
 0xbfd   :  { %5814 = vtanh.f32 %v1930_v21  ;;  %v4610_v3 = vmul.f32 -1.442695, %v1930_v21 }
 0xbfe   :  { %5816 = vpow2.f32 %v4604_v63 }
 0xbff   :  { %v5813_v60 = vpop.eup %5812  ;;  %5818 = vpow2.f32 %v4607_v2 }
 0xc00   :  { %1770 = vrot.lane.b32.xlu1 %v5813_v60, %s5954_s30 }
 0xc07   :  { %v5815_v62 = vpop.eup %5814 }
 0xc08   :  { %1940 = vrot.lane.b32.xlu0 %v5815_v62, %s5954_s30  ;;  %v5817_v30 = vpop.eup %5816 }
 0xc09   :  { %v1588_v33 = vadd.f32 1.0, %v5817_v30  ;;  %v5819_v4 = vpop.eup %5818 }
 0xc0a   :  { %v1764_v11 = vadd.f32 1.0, %v5819_v4 }
 0xc0b   :  { %5820 = vrcp.f32 %v1588_v33 }
 0xc0c   :  { %5822 = vpow2.f32 %v4610_v3 }
 0xc0d   :  { %5824 = vrcp.f32 %v1764_v11 }
 0xc15   :  { %v5821_v5 = vpop.eup %5820 }
 0xc16   :  { %v5823_v12 = vpop.eup %5822  ;;  %v1592_v27 = vmul.f32 %v5821_v5, %v6382_v9 }
 0xc17   :  { %v1934_v13 = vadd.f32 1.0, %v5823_v12  ;;  %v5825_v18 = vpop.eup %5824 }
 0xc18   :  { %v1768_v31 = vmul.f32 %v5825_v18, %v6387_v14 }
 0xc19   :  { %5826 = vrcp.f32 %v1934_v13 }
 0xc23   :  { %v5827_v25 = vpop.eup %5826 }
 0xc24   :  { %v1938_v35 = vmul.f32 %v5827_v25, %v6391_v24 }
 0xc62   :  { %v1595_v6 = vpop.permute.xlu0 %1594 }
 0xc63   :  { %v1597_v7 = vmul.f32 %v5821_v5, %v1595_v6 }
 0xc65   :  { %1599 = vrot.lane.b32.xlu1 %v1597_v7, %s5954_s30 }
 0xc72   :  { %v1771_v20 = vpop.permute.xlu1 %1770 }
 0xc73   :  { %v1773_v52 = vmul.f32 %v5825_v18, %v1771_v20 }
 0xc75   :  { %1775 = vrot.lane.b32.xlu0 %v1773_v52, %s5954_s30 }
 0xc7a   :  { %v1941_v61 = vpop.permute.xlu0 %1940 }
 0xc7b   :  { %v1943_v26 = vmul.f32 %v5827_v25, %v1941_v61 }
 0xc7d   :  { %1945 = vrot.lane.b32.xlu1 %v1943_v26, %s5954_s30 }
 0xcd7   :  { %v1600_v28 = vpop.permute.xlu1 %1599 }
 0xcd8   :  { %v6446_v1 = vadd.f32 %v1600_v28, %v1592_v27 }
 0xcda   :  { %5828 = vtanh.f32 %v6446_v1 }
 0xce4   :  { %v5829_v29 = vpop.eup %5828 }
 0xce5   :  { %1605 = vrot.lane.b32.xlu0 %v5829_v29, %s5954_s30 }
 0xce7   :  { %v1776_v32 = vpop.permute.xlu0 %1775 }
 0xce8   :  { %v6451_v34 = vadd.f32 %v1776_v32, %v1768_v31 }
 0xcea   :  { %5830 = vtanh.f32 %v6451_v34 }
 0xcef   :  { %v1946_v36 = vpop.permute.xlu1 %1945 }
 0xcf0   :  { %v6455_v56 = vadd.f32 %v1946_v36, %v1938_v35 }
 0xcf2   :  { %5832 = vtanh.f32 %v6455_v56 }
 0xcf4   :  { %v5831_v9 = vpop.eup %5830 }
 0xcf5   :  { %1781 = vrot.lane.b32.xlu1 %v5831_v9, %s5954_s30 }
 0xcfc   :  { %v5833_v38 = vpop.eup %5832 }
 0xcfd   :  { %1951 = vrot.lane.b32.xlu0 %v5833_v38, %s5954_s30 }
 0xd57   :  { %v1606_v37 = vpop.permute.xlu0 %1605 }
 0xd58   :  { %v1608_v14 = vmul.f32 %v5821_v5, %v1606_v37 }
 0xd5a   :  { %1610 = vrot.lane.b32.xlu1 %v1608_v14, %s5955_s5 }
 0xd67   :  { %v1782_v39 = vpop.permute.xlu1 %1781 }
 0xd68   :  { %v1784_v40 = vmul.f32 %v5825_v18, %v1782_v39 }
 0xd6a   :  { %2061 = vrot.lane.b32.xlu0 %v1784_v40, %s5955_s5 }
 0xd6f   :  { %v1952_v24 = vpop.permute.xlu0 %1951 }
 0xd70   :  { %v1954_v42 = vmul.f32 %v5827_v25, %v1952_v24 }
 0xd72   :  { %2236 = vrot.lane.b32.xlu1 %v1954_v42, %s5955_s5 }
 0xdcc   :  { %v1611_v43 = vpop.permute.xlu1 %1610 }
 0xdcd   :  { %1614 = vst.msk [vmem:[#allocation3 + $0x20] sm:$0xff] %vm239_vm2, %v1611_v43  ;;  %5157 = vmatmul.mubr.msk.f32.vlgmr.msra.gmra.mrb[24].mxu1 %vm239_vm2, %v1611_v43 }
 0xdce   :  { %5579 = vmatpush3.bf16.msra.mxu1 %v6183_v51  ;;  %5178 = vmatprep.mubr.msk.f32.mxu1 %vm5952_vm1, %v5953_v16 }
 0xdcf   :  { %5580 = vmatprep.subr.bf16.mxu1 %v5951_v10 }
 0xdd2   :  { %5582 = vmatpush3.bf16.msra.mxu1 %v6194_v55 }
 0xdd3   :  { %5589 = vmatprep.subr.bf16.mxu1 %v5951_v10 }
 0xdd5   :  { %5179 = vmatmul.mubr.msk.f32.vlgmr.msra.gmra.mrb[26].mxu1 %vm239_vm2, %v1611_v43 }
 0xdd6   :  { %5591 = vmatpush3.bf16.msra.mxu1 %v6254_v47  ;;  %5200 = vmatprep.mubr.msk.f32.mxu1 %vm5952_vm1, %v5953_v16 }
 0xdd7   :  { %5592 = vmatprep.subr.bf16.mxu1 %v5951_v10 }
 0xdda   :  { %5594 = vmatpush3.bf16.msra.mxu1 %v6273_v58 }
 0xddb   :  { %5601 = vmatprep.subr.bf16.mxu1 %v5951_v10 }
 0xddc   :  { %v2062_v44 = vpop.permute.xlu0 %2061 }
 0xddd   :  { %5168 = vmatmul.mubr.msk.f32.vlgmr.msra.gmra.mrb[22].mxu0 %vm239_vm2, %v2062_v44  ;;  %5201 = vmatmul.mubr.msk.f32.vlgmr.msra.gmra.mrb[28].mxu1 %vm239_vm2, %v2062_v44 }
 0xdde   :  { %5585 = vmatpush3.bf16.msra.mxu0 %v6263_v50  ;;  %5189 = vmatprep.mubr.msk.f32.mxu0 %vm5952_vm1, %v5953_v16 }
 0xddf   :  { %5586 = vmatprep.subr.bf16.mxu0 %v5951_v10  ;;  %5603 = vmatpush3.bf16.msra.mxu1 %v6145_v41 }
 0xde0   :  { %5604 = vmatprep.subr.bf16.mxu1 %v5951_v10  ;;  %5222 = vmatprep.mubr.msk.f32.mxu1 %vm5952_vm1, %v5953_v16 }
 0xde2   :  { %5588 = vmatpush3.bf16.msra.mxu0 %v6280_v59 }
 0xde3   :  { %5595 = vmatprep.subr.bf16.mxu0 %v5951_v10  ;;  %5606 = vmatpush3.bf16.msra.mxu1 %v6163_v46 }
 0xde4   :  { %v2237_v45 = vpop.permute.xlu1 %2236  ;;  %5613 = vmatprep.subr.bf16.mxu1 %v5951_v10 }
 0xde5   :  { %5190 = vmatmul.mubr.msk.f32.vlgmr.msra.gmra.mrb[24].mxu0 %vm239_vm2, %v2237_v45 }
 0xde6   :  { %5597 = vmatpush3.bf16.msra.mxu0 %v6078_v8  ;;  %5211 = vmatprep.mubr.msk.f32.mxu0 %vm5952_vm1, %v5953_v16 }
 0xde7   :  { %5598 = vmatprep.subr.bf16.mxu0 %v5951_v10 }
 0xdea   :  { %5600 = vmatpush3.bf16.msra.mxu0 %v6102_v15 }
 0xdeb   :  { %5607 = vmatprep.subr.bf16.mxu0 %v5951_v10 }
 0xea0   :  { %v2025_v53 = vpop.f32.mrb[24].mxu1 }
 0xea1   :  { %v2029_v54 = vadd.f32 %v2025_v53, %v195_v49  ;;  %v5158_v19 = vpop.f32.mrb[25].mxu1 }
 0xea3   :  { %5834 = vtanh.f32 %v2029_v54  ;;  %v4612_v13 = vmul.f32 -1.442695, %v2029_v54 }
 0xea8   :  { %v2201_v21 = vpop.f32.mrb[26].mxu1 }
 0xea9   :  { %v5180_v60 = vpop.f32.mrb[27].mxu1 }
 0xead   :  { %v5835_v62 = vpop.eup %5834 }
 0xeae   :  { %2039 = vrot.lane.b32.xlu0 %v5835_v62, %s5954_s30 }
 0xeb0   :  { %v2131_v63 = vpop.f32.mrb[22].mxu0  ;;  %v2376_v30 = vpop.f32.mrb[28].mxu1 }
 0xeb1   :  { %v2202_v2 = vadd.f32 %v2201_v21, %v2131_v63  ;;  %v5169_v33 = vpop.f32.mrb[23].mxu0  ;;  %v5202_v3 = vpop.f32.mrb[29].mxu1 }
 0xeb2   :  { %v200_v33 = vadd.f32 %v6502_v48, %v6130_v23 }
 0xeb3   :  { %v2205_v4 = vadd.f32 %v6217_v0, %v2202_v2 }
 0xeb5   :  { %5836 = vtanh.f32 %v2205_v4  ;;  %v4615_v52 = vmul.f32 -1.442695, %v2205_v4 }
 0xeb8   :  { %v2306_v5 = vpop.f32.mrb[24].mxu0 }
 0xeb9   :  { %v2377_v6 = vadd.f32 %v2376_v30, %v2306_v5  ;;  %v5191_v17 = vpop.f32.mrb[25].mxu0 }
 0xebb   :  { %v2380_v7 = vadd.f32 %v6310_v57, %v2377_v6 }
 0xebd   :  { %5838 = vtanh.f32 %v2380_v7  ;;  %v4618_v0 = vmul.f32 -1.442695, %v2380_v7 }
 0xebe   :  { %5840 = vpow2.f32 %v4612_v13 }
 0xebf   :  { %v5837_v11 = vpop.eup %5836 }
 0xec0   :  { %2215 = vrot.lane.b32.xlu1 %v5837_v11, %s5954_s30 }
 0xec7   :  { %v5839_v12 = vpop.eup %5838 }
 0xec8   :  { %2390 = vrot.lane.b32.xlu0 %v5839_v12, %s5954_s30  ;;  %v5841_v18 = vpop.eup %5840 }
 0xec9   :  { %v2033_v20 = vadd.f32 1.0, %v5841_v18 }
 0xecb   :  { %5842 = vrcp.f32 %v2033_v20 }
 0xecc   :  { %5844 = vpow2.f32 %v4615_v52 }
 0xecd   :  { %5846 = vpow2.f32 %v4618_v0 }
 0xed5   :  { %v5843_v25 = vpop.eup %5842 }
 0xed6   :  { %v5845_v26 = vpop.eup %5844  ;;  %v2037_v14 = vmul.f32 %v5843_v25, %v6446_v1 }
 0xed7   :  { %v2209_v28 = vadd.f32 1.0, %v5845_v26  ;;  %v5847_v29 = vpop.eup %5846 }
 0xed8   :  { %v2384_v31 = vadd.f32 1.0, %v5847_v29 }
 0xed9   :  { %5848 = vrcp.f32 %v2209_v28 }
 0xeda   :  { %5850 = vrcp.f32 %v2384_v31 }
 0xee3   :  { %v5849_v32 = vpop.eup %5848 }
 0xee4   :  { %v5851_v9 = vpop.eup %5850  ;;  %v2213_v42 = vmul.f32 %v5849_v32, %v6451_v34 }
 0xee5   :  { %v2388_v45 = vmul.f32 %v5851_v9, %v6455_v56 }
 0xf20   :  { %v2040_v61 = vpop.permute.xlu0 %2039 }
 0xf21   :  { %v2042_v27 = vmul.f32 %v5843_v25, %v2040_v61 }
 0xf23   :  { %2044 = vrot.lane.b32.xlu1 %v2042_v27, %s5954_s30 }
 0xf32   :  { %v2216_v35 = vpop.permute.xlu1 %2215 }
 0xf33   :  { %v2218_v36 = vmul.f32 %v5849_v32, %v2216_v35 }
 0xf35   :  { %2220 = vrot.lane.b32.xlu0 %v2218_v36, %s5954_s30 }
 0xf3a   :  { %v2391_v38 = vpop.permute.xlu0 %2390 }
 0xf3b   :  { %v2393_v37 = vmul.f32 %v5851_v9, %v2391_v38 }
 0xf3d   :  { %2395 = vrot.lane.b32.xlu1 %v2393_v37, %s5954_s30 }
 0xf95   :  { %v2045_v39 = vpop.permute.xlu1 %2044 }
 0xf96   :  { %v6515_v40 = vadd.f32 %v2045_v39, %v2037_v14 }
 0xf98   :  { %5852 = vtanh.f32 %v6515_v40 }
 0xfa2   :  { %v5853_v24 = vpop.eup %5852 }
 0xfa3   :  { %2050 = vrot.lane.b32.xlu0 %v5853_v24, %s5954_s30 }
 0xfa7   :  { %v2221_v43 = vpop.permute.xlu0 %2220 }
 0xfa8   :  { %v6520_v44 = vadd.f32 %v2221_v43, %v2213_v42 }
 0xfaa   :  { %5854 = vtanh.f32 %v6520_v44 }
 0xfaf   :  { %v2396_v49 = vpop.permute.xlu1 %2395 }
 0xfb0   :  { %v6524_v53 = vadd.f32 %v2396_v49, %v2388_v45 }
 0xfb2   :  { %5856 = vtanh.f32 %v6524_v53 }
 0xfb4   :  { %v5855_v1 = vpop.eup %5854 }
 0xfb5   :  { %2226 = vrot.lane.b32.xlu1 %v5855_v1, %s5954_s30 }
 0xfbc   :  { %v5857_v54 = vpop.eup %5856 }
 0xfbd   :  { %2401 = vrot.lane.b32.xlu0 %v5857_v54, %s5954_s30 }
0x1015   :  { %v2051_v19 = vpop.permute.xlu0 %2050 }
0x1016   :  { %v2053_v34 = vmul.f32 %v5843_v25, %v2051_v19 }
0x1018   :  { %2055 = vrot.lane.b32.xlu1 %v2053_v34, %s5955_s5 }
0x1027   :  { %v2227_v21 = vpop.permute.xlu1 %2226 }
0x1028   :  { %v2229_v60 = vmul.f32 %v5849_v32, %v2227_v21 }
0x102a   :  { %2231 = vrot.lane.b32.xlu0 %v2229_v60, %s5955_s5 }
0x102f   :  { %v2402_v56 = vpop.permute.xlu0 %2401 }
0x1030   :  { %v2404_v62 = vmul.f32 %v5851_v9, %v2402_v56 }
0x1032   :  { %2684 = vrot.lane.b32.xlu1 %v2404_v62, %s5955_s5 }
0x108a   :  { %v2056_v63 = vpop.permute.xlu1 %2055 }
0x108b   :  { %2059 = vst.msk [vmem:[#allocation3 + $0x28] sm:$0xff] %vm239_vm2, %v2056_v63  ;;  %5212 = vmatmul.mubr.msk.f32.vlgmr.msra.gmra.mrb[26].mxu0 %vm239_vm2, %v2056_v63 }
0x108c   :  { %5609 = vmatpush3.bf16.msra.mxu0 %v6183_v51  ;;  %5233 = vmatprep.mubr.msk.f32.mxu0 %vm5952_vm1, %v5953_v16 }
0x108d   :  { %5610 = vmatprep.subr.bf16.mxu0 %v5951_v10 }
0x1090   :  { %5612 = vmatpush3.bf16.msra.mxu0 %v6194_v55 }
0x1091   :  { %5619 = vmatprep.subr.bf16.mxu0 %v5951_v10 }
0x1093   :  { %5234 = vmatmul.mubr.msk.f32.vlgmr.msra.gmra.mrb[28].mxu0 %vm239_vm2, %v2056_v63 }
0x1094   :  { %5621 = vmatpush3.bf16.msra.mxu0 %v6254_v47  ;;  %5255 = vmatprep.mubr.msk.f32.mxu0 %vm5952_vm1, %v5953_v16 }
0x1095   :  { %5622 = vmatprep.subr.bf16.mxu0 %v5951_v10 }
0x1098   :  { %5624 = vmatpush3.bf16.msra.mxu0 %v6273_v58 }
0x1099   :  { %5631 = vmatprep.subr.bf16.mxu0 %v5951_v10 }
0x109c   :  { %v2232_v30 = vpop.permute.xlu0 %2231 }
0x109d   :  { %2234 = vst.msk [vmem:[#allocation4] sm:$0xff] %vm239_vm2, %v2232_v30  ;;  %5223 = vmatmul.mubr.msk.f32.vlgmr.msra.gmra.mrb[30].mxu1 %vm239_vm2, %v2232_v30  ;;  %5256 = vmatmul.mubr.msk.f32.vlgmr.msra.gmra.mrb[30].mxu0 %vm239_vm2, %v2232_v30 }
0x109e   :  { %5615 = vmatpush3.bf16.msra.mxu1 %v6263_v50  ;;  %5244 = vmatprep.mubr.msk.f32.mxu1 %vm5952_vm1, %v5953_v16 }
0x109f   :  { %5616 = vmatprep.subr.bf16.mxu1 %v5951_v10  ;;  %5633 = vmatpush3.bf16.msra.mxu0 %v6145_v41 }
0x10a0   :  { %5634 = vmatprep.subr.bf16.mxu0 %v5951_v10  ;;  %5277 = vmatprep.mubr.msk.f32.mxu0 %vm5952_vm1, %v5953_v16 }
0x10a2   :  { %5618 = vmatpush3.bf16.msra.mxu1 %v6280_v59 }
0x10a3   :  { %5625 = vmatprep.subr.bf16.mxu1 %v5951_v10  ;;  %5636 = vmatpush3.bf16.msra.mxu0 %v6163_v46 }
0x10a4   :  { %v2685_v2 = vpop.permute.xlu1 %2684  ;;  %5643 = vmatprep.subr.bf16.mxu0 %v5951_v10 }
0x10a5   :  { %5245 = vmatmul.mubr.msk.f32.vlgmr.msra.gmra.mrb[32].mxu1 %vm239_vm2, %v2685_v2 }
0x10a6   :  { %5627 = vmatpush3.bf16.msra.mxu1 %v6078_v8  ;;  %5266 = vmatprep.mubr.msk.f32.mxu1 %vm5952_vm1, %v5953_v16 }
0x10a7   :  { %5628 = vmatprep.subr.bf16.mxu1 %v5951_v10 }
0x10aa   :  { %5630 = vmatpush3.bf16.msra.mxu1 %v6102_v15  ;;  %v6575_v15 = vld [vmem:[%s6978_s6] ss:$0 sm:$0xff] }
0x10ab   :  { %5637 = vmatprep.subr.bf16.mxu1 %v5951_v10 }
0x115e   :  { %v2475_v3 = vpop.f32.mrb[26].mxu0 }
0x115f   :  { %v2479_v4 = vadd.f32 %v2475_v3, %v200_v33  ;;  %v5213_v5 = vpop.f32.mrb[27].mxu0 }
0x1161   :  { %5858 = vtanh.f32 %v2479_v4  ;;  %v4620_v27 = vmul.f32 -1.442695, %v2479_v4 }
0x1166   :  { %v2648_v6 = vpop.f32.mrb[28].mxu0 }
0x1167   :  { %v5235_v17 = vpop.f32.mrb[29].mxu0 }
0x116b   :  { %v5859_v7 = vpop.eup %5858 }
0x116c   :  { %2489 = vrot.lane.b32.xlu0 %v5859_v7, %s5954_s30 }
0x1170   :  { %v2578_v8 = vpop.f32.mrb[30].mxu1  ;;  %v2824_v11 = vpop.f32.mrb[30].mxu0 }
0x1171   :  { %v2649_v12 = vadd.f32 %v2648_v6, %v2578_v8  ;;  %v5224_v13 = vpop.f32.mrb[31].mxu1  ;;  %v5257_v18 = vpop.f32.mrb[31].mxu0 }
0x1173   :  { %v2652_v23 = vadd.f32 %v6575_v15, %v2649_v12 }
0x1175   :  { %5860 = vtanh.f32 %v2652_v23  ;;  %v4623_v31 = vmul.f32 -1.442695, %v2652_v23 }
0x1178   :  { %v2754_v20 = vpop.f32.mrb[32].mxu1 }
0x1179   :  { %v2825_v52 = vadd.f32 %v2824_v11, %v2754_v20  ;;  %v5246_v0 = vpop.f32.mrb[33].mxu1 }
0x117b   :  { %v2828_v25 = vadd.f32 %v6310_v57, %v2825_v52 }
0x117d   :  { %5862 = vtanh.f32 %v2828_v25  ;;  %v4626_v32 = vmul.f32 -1.442695, %v2828_v25 }
0x117e   :  { %5864 = vpow2.f32 %v4620_v27 }
0x117f   :  { %v5861_v61 = vpop.eup %5860 }
0x1180   :  { %2662 = vrot.lane.b32.xlu1 %v5861_v61, %s5954_s30 }
0x1187   :  { %v5863_v26 = vpop.eup %5862 }
0x1188   :  { %2838 = vrot.lane.b32.xlu0 %v5863_v26, %s5954_s30  ;;  %v5865_v28 = vpop.eup %5864 }
0x1189   :  { %v2483_v29 = vadd.f32 1.0, %v5865_v28 }
0x118b   :  { %5866 = vrcp.f32 %v2483_v29 }
0x118c   :  { %5868 = vpow2.f32 %v4623_v31 }
0x118d   :  { %5870 = vpow2.f32 %v4626_v32 }
0x1195   :  { %v5867_v35 = vpop.eup %5866 }
0x1196   :  { %v5869_v57 = vpop.eup %5868  ;;  %v2487_v1 = vmul.f32 %v5867_v35, %v6515_v40 }
0x1197   :  { %v2656_v38 = vadd.f32 1.0, %v5869_v57  ;;  %v5871_v37 = vpop.eup %5870 }
0x1198   :  { %v2832_v14 = vadd.f32 1.0, %v5871_v37 }
0x1199   :  { %5872 = vrcp.f32 %v2656_v38 }
0x119a   :  { %5874 = vrcp.f32 %v2832_v14 }
0x11a3   :  { %v5873_v39 = vpop.eup %5872 }
0x11a4   :  { %v5875_v43 = vpop.eup %5874  ;;  %v2660_v21 = vmul.f32 %v5873_v39, %v6520_v44 }
0x11a5   :  { %v2836_v62 = vmul.f32 %v5875_v43, %v6524_v53 }
0x11de   :  { %v2490_v36 = vpop.permute.xlu0 %2489 }
0x11df   :  { %v2492_v9 = vmul.f32 %v5867_v35, %v2490_v36 }
0x11e1   :  { %2494 = vrot.lane.b32.xlu1 %v2492_v9, %s5954_s30 }
0x11f2   :  { %v2663_v24 = vpop.permute.xlu1 %2662 }
0x11f3   :  { %v2665_v42 = vmul.f32 %v5873_v39, %v2663_v24 }
0x11f5   :  { %2667 = vrot.lane.b32.xlu0 %v2665_v42, %s5954_s30 }
0x11fa   :  { %v2839_v45 = vpop.permute.xlu0 %2838 }
0x11fb   :  { %v2841_v49 = vmul.f32 %v5875_v43, %v2839_v45 }
0x11fd   :  { %2843 = vrot.lane.b32.xlu1 %v2841_v49, %s5954_s30 }
0x1253   :  { %v2495_v54 = vpop.permute.xlu1 %2494 }
0x1254   :  { %v6585_v19 = vadd.f32 %v2495_v54, %v2487_v1 }
0x1256   :  { %5876 = vtanh.f32 %v6585_v19 }
0x1260   :  { %v5877_v34 = vpop.eup %5876 }
0x1261   :  { %2500 = vrot.lane.b32.xlu0 %v5877_v34, %s5954_s30 }
0x1267   :  { %v2668_v60 = vpop.permute.xlu0 %2667 }
0x1268   :  { %v6590_v56 = vadd.f32 %v2668_v60, %v2660_v21 }
0x126a   :  { %5878 = vtanh.f32 %v6590_v56 }
0x126f   :  { %v2844_v63 = vpop.permute.xlu1 %2843 }
0x1270   :  { %v6594_v30 = vadd.f32 %v2844_v63, %v2836_v62 }
0x1272   :  { %5880 = vtanh.f32 %v6594_v30 }
0x1274   :  { %v5879_v40 = vpop.eup %5878 }
0x1275   :  { %2673 = vrot.lane.b32.xlu1 %v5879_v40, %s5954_s30 }
0x127c   :  { %v5881_v2 = vpop.eup %5880 }
0x127d   :  { %2849 = vrot.lane.b32.xlu0 %v5881_v2, %s5954_s30 }
0x12d3   :  { %v2501_v33 = vpop.permute.xlu0 %2500 }
0x12d4   :  { %v2503_v44 = vmul.f32 %v5867_v35, %v2501_v33 }
0x12d6   :  { %2505 = vrot.lane.b32.xlu1 %v2503_v44, %s5955_s5 }
0x12e7   :  { %v2674_v3 = vpop.permute.xlu1 %2673 }
0x12e8   :  { %v2676_v4 = vmul.f32 %v5873_v39, %v2674_v3 }
0x12ea   :  { %2678 = vrot.lane.b32.xlu0 %v2676_v4, %s5955_s5 }
0x12ef   :  { %v2850_v53 = vpop.permute.xlu0 %2849 }
0x12f0   :  { %v2852_v5 = vmul.f32 %v5875_v43, %v2850_v53 }
0x12f2   :  { %2854 = vrot.lane.b32.xlu1 %v2852_v5, %s5955_s5 }
0x1348   :  { %v2506_v6 = vpop.permute.xlu1 %2505 }
0x1349   :  { %2509 = vst.msk [vmem:[#allocation3 + $0x30] sm:$0xff] %vm239_vm2, %v2506_v6  ;;  %5267 = vmatmul.mubr.msk.f32.vlgmr.msra.gmra.mrb[34].mxu1 %vm239_vm2, %v2506_v6 }
0x134a   :  { %5639 = vmatpush3.bf16.msra.mxu1 %v6183_v51  ;;  %5288 = vmatprep.mubr.msk.f32.mxu1 %vm5952_vm1, %v5953_v16 }
0x134b   :  { %5640 = vmatprep.subr.bf16.mxu1 %v5951_v10 }
0x134e   :  { %5642 = vmatpush3.bf16.msra.mxu1 %v6194_v55 }
0x134f   :  { %5649 = vmatprep.subr.bf16.mxu1 %v5951_v10 }
0x1351   :  { %5289 = vmatmul.mubr.msk.f32.vlgmr.msra.gmra.mrb[36].mxu1 %vm239_vm2, %v2506_v6 }
0x1352   :  { %5651 = vmatpush3.bf16.msra.mxu1 %v6254_v47  ;;  %5310 = vmatprep.mubr.msk.f32.mxu1 %vm5952_vm1, %v5953_v16 }
0x1353   :  { %5652 = vmatprep.subr.bf16.mxu1 %v5951_v10 }
0x1356   :  { %5654 = vmatpush3.bf16.msra.mxu1 %v6273_v58 }
0x1357   :  { %5661 = vmatprep.subr.bf16.mxu1 %v5951_v10 }
0x135c   :  { %v2679_v17 = vpop.permute.xlu0 %2678 }
0x135d   :  { %2682 = vst.msk [vmem:[#allocation4 + $0x8] sm:$0xff] %vm239_vm2, %v2679_v17  ;;  %5278 = vmatmul.mubr.msk.f32.vlgmr.msra.gmra.mrb[32].mxu0 %vm239_vm2, %v2679_v17  ;;  %5311 = vmatmul.mubr.msk.f32.vlgmr.msra.gmra.mrb[38].mxu1 %vm239_vm2, %v2679_v17 }
0x135e   :  { %5645 = vmatpush3.bf16.msra.mxu0 %v6263_v50  ;;  %5299 = vmatprep.mubr.msk.f32.mxu0 %vm5952_vm1, %v5953_v16 }
0x135f   :  { %5646 = vmatprep.subr.bf16.mxu0 %v5951_v10  ;;  %5663 = vmatpush3.bf16.msra.mxu1 %v6183_v51  ;;  %v205_v51 = vadd.f32 %v6502_v48, %v6128_v22  ;;  %v6647_v48 = vld [vmem:[%s6981_s9] ss:$0 sm:$0xff] }
0x1360   :  { %5664 = vmatprep.subr.bf16.mxu1 %v5951_v10  ;;  %5332 = vmatprep.mubr.msk.f32.mxu1 %vm5952_vm1, %v5953_v16 }
0x1362   :  { %5648 = vmatpush3.bf16.msra.mxu0 %v6280_v59 }
0x1363   :  { %5666 = vmatpush3.bf16.msra.mxu1 %v6194_v55  ;;  %5655 = vmatprep.subr.bf16.mxu0 %v5951_v10 }
0x1364   :  { %v2855_v7 = vpop.permute.xlu1 %2854  ;;  %5673 = vmatprep.subr.bf16.mxu1 %v5951_v10 }
0x1365   :  { %2858 = vst.msk [vmem:[#allocation4 + $0x20] sm:$0xff] %vm239_vm2, %v2855_v7  ;;  %5300 = vmatmul.mubr.msk.f32.vlgmr.msra.gmra.mrb[34].mxu0 %vm239_vm2, %v2855_v7 }
0x1366   :  { %5657 = vmatpush3.bf16.msra.mxu0 %v6145_v41  ;;  %5321 = vmatprep.mubr.msk.f32.mxu0 %vm5952_vm1, %v5953_v16 }
0x1367   :  { %5658 = vmatprep.subr.bf16.mxu0 %v5951_v10 }
0x136a   :  { %5660 = vmatpush3.bf16.msra.mxu0 %v6163_v46 }
0x136b   :  { %5667 = vmatprep.subr.bf16.mxu0 %v5951_v10 }
0x141c   :  { %v2929_v55 = vpop.f32.mrb[34].mxu1 }
0x141d   :  { %v2933_v8 = vadd.f32 %v2929_v55, %v205_v51  ;;  %v5268_v11 = vpop.f32.mrb[35].mxu1 }
0x141f   :  { %5882 = vtanh.f32 %v2933_v8  ;;  %v4628_v29 = vmul.f32 -1.442695, %v2933_v8 }
0x1424   :  { %v3102_v12 = vpop.f32.mrb[36].mxu1 }
0x1425   :  { %v5290_v13 = vpop.f32.mrb[37].mxu1 }
0x1429   :  { %v5883_v18 = vpop.eup %5882 }
0x142a   :  { %2943 = vrot.lane.b32.xlu0 %v5883_v18, %s5954_s30 }
0x1430   :  { %v3032_v41 = vpop.f32.mrb[32].mxu0  ;;  %v3275_v23 = vpop.f32.mrb[38].mxu1 }
0x1431   :  { %v3103_v20 = vadd.f32 %v3102_v12, %v3032_v41  ;;  %v5279_v52 = vpop.f32.mrb[33].mxu0  ;;  %v5312_v0 = vpop.f32.mrb[39].mxu1 }
0x1433   :  { %v3106_v46 = vadd.f32 %v6575_v15, %v3103_v20 }
0x1435   :  { %5884 = vtanh.f32 %v3106_v46  ;;  %v4631_v35 = vmul.f32 -1.442695, %v3106_v46 }
0x1438   :  { %v3205_v25 = vpop.f32.mrb[34].mxu0 }
0x1439   :  { %v3276_v61 = vadd.f32 %v3275_v23, %v3205_v25  ;;  %v5301_v22 = vpop.f32.mrb[35].mxu0 }
0x143b   :  { %v3279_v26 = vadd.f32 %v6647_v48, %v3276_v61 }
0x143d   :  { %5886 = vtanh.f32 %v3279_v26  ;;  %v4634_v36 = vmul.f32 -1.442695, %v3279_v26 }
0x143e   :  { %5888 = vpow2.f32 %v4628_v29 }
0x143f   :  { %v5885_v27 = vpop.eup %5884 }
0x1440   :  { %3116 = vrot.lane.b32.xlu1 %v5885_v27, %s5954_s30 }
0x1447   :  { %v5887_v28 = vpop.eup %5886 }
0x1448   :  { %3289 = vrot.lane.b32.xlu0 %v5887_v28, %s5954_s30  ;;  %v5889_v31 = vpop.eup %5888 }
0x1449   :  { %v2937_v32 = vadd.f32 1.0, %v5889_v31 }
0x144b   :  { %5890 = vrcp.f32 %v2937_v32 }
0x144c   :  { %5892 = vpow2.f32 %v4631_v35 }
0x144d   :  { %5894 = vpow2.f32 %v4634_v36 }
0x1455   :  { %v5891_v9 = vpop.eup %5890 }
0x1456   :  { %v5893_v37 = vpop.eup %5892  ;;  %v2941_v34 = vmul.f32 %v5891_v9, %v6585_v19 }
0x1457   :  { %v3110_v14 = vadd.f32 1.0, %v5893_v37  ;;  %v5895_v39 = vpop.eup %5894  ;;  %v4155_v37 = vld [vmem:[%s6982_s12] sm:$0xff] }
0x1458   :  { %v3283_v24 = vadd.f32 1.0, %v5895_v39 }
0x1459   :  { %5896 = vrcp.f32 %v3110_v14  ;;  %v4156_v14 = vld [vmem:[%s6982_s12 + $0x8] sm:$0xff] }
0x145a   :  { %5898 = vrcp.f32 %v3283_v24  ;;  %v5707_v24 = vpack.c.bf16 %v4156_v14, %v4155_v37 }
0x1463   :  { %v5897_v42 = vpop.eup %5896 }
0x1464   :  { %v5899_v49 = vpop.eup %5898  ;;  %v3114_v63 = vmul.f32 %v5897_v42, %v6590_v56 }
0x1465   :  { %v3287_v33 = vmul.f32 %v5899_v49, %v6594_v30 }
0x149c   :  { %v2944_v57 = vpop.permute.xlu0 %2943 }
0x149d   :  { %v2946_v38 = vmul.f32 %v5891_v9, %v2944_v57 }
0x149f   :  { %2948 = vrot.lane.b32.xlu1 %v2946_v38, %s5954_s30 }
0x14b2   :  { %v3117_v43 = vpop.permute.xlu1 %3116 }
0x14b3   :  { %v3119_v45 = vmul.f32 %v5897_v42, %v3117_v43  ;;  %v3845_v43 = vld [vmem:[%s6983_s10] sm:$0xff] }
0x14b5   :  { %3121 = vrot.lane.b32.xlu0 %v3119_v45, %s5954_s30  ;;  %v3846_v45 = vld [vmem:[%s6983_s10 + $0x8] sm:$0xff] }
0x14ba   :  { %v3290_v1 = vpop.permute.xlu0 %3289 }
0x14bb   :  { %v3292_v54 = vmul.f32 %v5899_v49, %v3290_v1 }
0x14bd   :  { %3294 = vrot.lane.b32.xlu1 %v3292_v54, %s5954_s30 }
0x1511   :  { %v2949_v21 = vpop.permute.xlu1 %2948 }
0x1512   :  { %v2951_v60 = vadd.f32 %v2949_v21, %v2941_v34 }
0x1514   :  { %5900 = vtanh.f32 %v2951_v60  ;;  %v4157_v60 = vld [vmem:[%s6982_s12 + $0x10] sm:$0xff] }
0x151e   :  { %v5901_v62 = vpop.eup %5900 }
0x151f   :  { %2954 = vrot.lane.b32.xlu0 %v5901_v62, %s5954_s30  ;;  %v4158_v62 = vld [vmem:[%s6982_s12 + $0x18] sm:$0xff] }
0x1527   :  { %v3122_v40 = vpop.permute.xlu0 %3121 }
0x1528   :  { %v6658_v2 = vadd.f32 %v3122_v40, %v3114_v63  ;;  %v5711_v63 = vpack.c.bf16 %v4158_v62, %v4157_v60 }
0x152a   :  { %5902 = vtanh.f32 %v6658_v2 }
0x152f   :  { %v3295_v44 = vpop.permute.xlu1 %3294 }
0x1530   :  { %v6662_v3 = vadd.f32 %v3295_v44, %v3287_v33  ;;  %v3847_v33 = vld [vmem:[%s6983_s10 + $0x10] sm:$0xff]  ;;  %v3848_v44 = vld [vmem:[%s6983_s10 + $0x18] sm:$0xff] }
0x1532   :  { %5904 = vtanh.f32 %v6662_v3 }
0x1534   :  { %v5903_v19 = vpop.eup %5902 }
0x1535   :  { %3127 = vrot.lane.b32.xlu1 %v5903_v19, %s5954_s30 }
0x153c   :  { %v5905_v4 = vpop.eup %5904 }
0x153d   :  { %3300 = vrot.lane.b32.xlu0 %v5905_v4, %s5954_s30  ;;  %v4148_v4 = vld [vmem:[#allocation3 + $0x8] sm:$0xff] }
0x1591   :  { %v2955_v53 = vpop.permute.xlu0 %2954 }
0x1592   :  { %v2957_v56 = vmul.f32 %v5891_v9, %v2955_v53  ;;  %v3954_v53 = vld [vmem:[%s6983_s10 + $0x20] sm:$0xff] }
0x1594   :  { %2959 = vrot.lane.b32.xlu1 %v2957_v56, %s5955_s5  ;;  %v3955_v56 = vld [vmem:[%s6983_s10 + $0x28] sm:$0xff] }
0x15a7   :  { %v3128_v5 = vpop.permute.xlu1 %3127 }
0x15a8   :  { %v3130_v6 = vmul.f32 %v5897_v42, %v3128_v5  ;;  %v3841_v5 = vld [vmem:[#allocation4] sm:$0xff] }
0x15aa   :  { %3132 = vrot.lane.b32.xlu0 %v3130_v6, %s5955_s5  ;;  %v4149_v6 = vld [vmem:[#allocation3 + $0x10] sm:$0xff] }
0x15af   :  { %v3301_v30 = vpop.permute.xlu0 %3300 }
0x15b0   :  { %v3303_v17 = vmul.f32 %v5899_v49, %v3301_v30  ;;  %v5691_v49 = vpack.c.bf16 %v3846_v45, %v3845_v43  ;;  %v5699_v30 = vpack.c.bf16 %v3955_v56, %v3954_v53 }
0x15b2   :  { %3305 = vrot.lane.b32.xlu1 %v3303_v17, %s5955_s5  ;;  %v4150_v17 = vld [vmem:[#allocation3 + $0x18] sm:$0xff] }
0x1606   :  { %v2960_v7 = vpop.permute.xlu1 %2959 }
0x1607   :  { %2963 = vst.msk [vmem:[#allocation3 + $0x38] sm:$0xff] %vm239_vm2, %v2960_v7  ;;  %5333 = vmatmul.mubr.msk.f32.vlgmr.msra.gmra.mrb[40].mxu1 %vm239_vm2, %v2960_v7  ;;  %v3956_v7 = vld [vmem:[%s6983_s10 + $0x30] sm:$0xff] }
0x1608   :  { %5675 = vmatpush3.bf16.msra.mxu1 %v6254_v47  ;;  %5354 = vmatprep.mubr.msk.f32.mxu1 %vm5952_vm1, %v5953_v16 }
0x1609   :  { %5676 = vmatprep.subr.bf16.mxu1 %v5951_v10 }
0x160c   :  { %5678 = vmatpush3.bf16.msra.mxu1 %v6273_v58 }
0x160d   :  { %5685 = vmatprep.subr.bf16.mxu1 %v5951_v10 }
0x161c   :  { %v3133_v51 = vpop.permute.xlu0 %3132 }
0x161d   :  { %3136 = vst.msk [vmem:[#allocation4 + $0x10] sm:$0xff] %vm239_vm2, %v3133_v51  ;;  %5322 = vmatmul.mubr.msk.f32.vlgmr.msra.gmra.mrb[36].mxu0 %vm239_vm2, %v3133_v51  ;;  %5355 = vmatmul.mubr.msk.f32.vlgmr.msra.gmra.mrb[42].mxu1 %vm239_vm2, %v3133_v51  ;;  %v3957_v51 = vld [vmem:[%s6983_s10 + $0x38] sm:$0xff] }
0x161e   :  { %5669 = vmatpush3.bf16.msra.mxu0 %v6263_v50  ;;  %5343 = vmatprep.mubr.msk.f32.mxu0 %vm5952_vm1, %v5953_v16 }
0x161f   :  { %5670 = vmatprep.subr.bf16.mxu0 %v5951_v10  ;;  %5687 = vmatpush3.bf16.msra.mxu1 %v6254_v47 }
0x1620   :  { %5688 = vmatprep.subr.bf16.mxu1 %v5951_v10  ;;  %5376 = vmatprep.mubr.msk.f32.mxu1 %vm5952_vm1, %v5953_v16 }
0x1622   :  { %5672 = vmatpush3.bf16.msra.mxu0 %v6280_v59 }
0x1623   :  { %5690 = vmatpush3.bf16.msra.mxu1 %v6273_v58  ;;  %5679 = vmatprep.subr.bf16.mxu0 %v5951_v10 }
0x1624   :  { %v3306_v55 = vpop.permute.xlu1 %3305  ;;  %5708 = vmatprep.subr.bf16.mxu1 %v5707_v24 }
0x1625   :  { %3309 = vst.msk [vmem:[#allocation4 + $0x28] sm:$0xff] %vm239_vm2, %v3306_v55  ;;  %5344 = vmatmul.mubr.msk.f32.vlgmr.msra.gmra.mrb[38].mxu0 %vm239_vm2, %v3306_v55  ;;  %v4151_v55 = vld [vmem:[#allocation3 + $0x20] sm:$0xff] }
0x1626   :  { %5681 = vmatpush3.bf16.msra.mxu0 %v6263_v50  ;;  %5365 = vmatprep.mubr.msk.f32.mxu0 %vm5952_vm1, %v5953_v16 }
0x1627   :  { %5682 = vmatprep.subr.bf16.mxu0 %v5951_v10 }
0x162a   :  { %5684 = vmatpush3.bf16.msra.mxu0 %v6280_v59 }
0x162b   :  { %5692 = vmatprep.subr.bf16.mxu0 %v5691_v49 }
0x16da   :  { %v3450_v47 = vpop.f32.mrb[40].mxu1 }
0x16db   :  { %v5334_v8 = vpop.f32.mrb[41].mxu1 }
0x16dc   :  { %v3842_v8 = vld [vmem:[#allocation4 + $0x8] sm:$0xff] }
0x16f0   :  { %v3378_v11 = vpop.f32.mrb[36].mxu0  ;;  %v3623_v58 = vpop.f32.mrb[42].mxu1 }
0x16f1   :  { %v3451_v12 = vadd.f32 %v3450_v47, %v3378_v11  ;;  %v5323_v13 = vpop.f32.mrb[37].mxu0  ;;  %v5356_v18 = vpop.f32.mrb[43].mxu1  ;;  %v5703_v47 = vpack.c.bf16 %v3957_v51, %v3956_v7  ;;  %v4152_v11 = vld [vmem:[#allocation3 + $0x28] sm:$0xff] }
0x16f2   :  { %v4154_v18 = vld [vmem:[#allocation3 + $0x38] sm:$0xff] }
0x16f3   :  { %v3454_v41 = vadd.f32 %v6575_v15, %v3451_v12  ;;  %v4153_v12 = vld [vmem:[#allocation3 + $0x30] sm:$0xff] }
0x16f5   :  { %5906 = vtanh.f32 %v3454_v41  ;;  %v4637_v59 = vmul.f32 -1.442695, %v3454_v41  ;;  %v3950_v41 = vld [vmem:[#allocation4 + $0x20] sm:$0xff] }
0x16f8   :  { %v3553_v23 = vpop.f32.mrb[38].mxu0 }
0x16f9   :  { %v3624_v20 = vadd.f32 %v3623_v58, %v3553_v23  ;;  %v5345_v50 = vpop.f32.mrb[39].mxu0  ;;  %v3843_v58 = vld [vmem:[#allocation4 + $0x10] sm:$0xff]  ;;  %v3951_v23 = vld [vmem:[#allocation4 + $0x28] sm:$0xff] }
0x16fb   :  { %v3627_v52 = vadd.f32 %v6647_v48, %v3624_v20 }
0x16fd   :  { %5908 = vtanh.f32 %v3627_v52  ;;  %v4640_v0 = vmul.f32 -1.442695, %v3627_v52 }
0x16fe   :  { %5910 = vpow2.f32 %v4637_v59 }
0x16ff   :  { %v5907_v16 = vpop.eup %5906  ;;  %5912 = vpow2.f32 %v4640_v0 }
0x1700   :  { %3464 = vrot.lane.b32.xlu0 %v5907_v16, %s5954_s30  ;;  %v4653_v16 = vld [vmem:[%s6984_s13] ss:$0 sm:$0xff] }
0x1707   :  { %v5909_v10 = vpop.eup %5908 }
0x1708   :  { %3637 = vrot.lane.b32.xlu1 %v5909_v10, %s5954_s30  ;;  %v5911_v46 = vpop.eup %5910 }
0x1709   :  { %v3458_v25 = vadd.f32 1.0, %v5911_v46  ;;  %v5913_v15 = vpop.eup %5912 }
0x170a   :  { %v3631_v61 = vadd.f32 1.0, %v5913_v15 }
0x170b   :  { %5914 = vrcp.f32 %v3458_v25 }
0x170c   :  { %5916 = vrcp.f32 %v3631_v61 }
0x1715   :  { %v5915_v22 = vpop.eup %5914 }
0x1716   :  { %v5917_v28 = vpop.eup %5916  ;;  %v3462_v32 = vmul.f32 %v5915_v22, %v6658_v2  ;;  %v4147_v2 = vld [vmem:[#allocation3] sm:$0xff] }
0x1717   :  { %v3635_v9 = vmul.f32 %v5917_v28, %v6662_v3  ;;  %v5695_v3 = vpack.c.bf16 %v3848_v44, %v3847_v33 }
0x1772   :  { %v3465_v26 = vpop.permute.xlu0 %3464 }
0x1773   :  { %v3467_v27 = vmul.f32 %v5915_v22, %v3465_v26 }
0x1775   :  { %3469 = vrot.lane.b32.xlu0 %v3467_v27, %s5954_s30 }
0x177a   :  { %v3638_v29 = vpop.permute.xlu1 %3637 }
0x177b   :  { %v3640_v31 = vmul.f32 %v5917_v28, %v3638_v29 }
0x177d   :  { %3642 = vrot.lane.b32.xlu1 %v3640_v31, %s5954_s30 }
0x17e7   :  { %v3470_v35 = vpop.permute.xlu0 %3469 }
0x17e8   :  { %v3472_v36 = vadd.f32 %v3470_v35, %v3462_v32 }
0x17ea   :  { %5918 = vtanh.f32 %v3472_v36 }
0x17ef   :  { %v3643_v57 = vpop.permute.xlu1 %3642 }
0x17f0   :  { %v6707_v38 = vadd.f32 %v3643_v57, %v3635_v9 }
0x17f2   :  { %5920 = vtanh.f32 %v6707_v38 }
0x17f4   :  { %v5919_v39 = vpop.eup %5918 }
0x17f5   :  { %3475 = vrot.lane.b32.xlu0 %v5919_v39, %s5954_s30 }
0x17fc   :  { %v5921_v42 = vpop.eup %5920 }
0x17fd   :  { %3648 = vrot.lane.b32.xlu1 %v5921_v42, %s5954_s30 }
0x1867   :  { %v3476_v1 = vpop.permute.xlu0 %3475 }
0x1868   :  { %v3478_v54 = vmul.f32 %v5915_v22, %v3476_v1 }
0x186a   :  { %3480 = vrot.lane.b32.xlu0 %v3478_v54, %s5955_s5 }
0x186f   :  { %v3649_v34 = vpop.permute.xlu1 %3648 }
0x1870   :  { %v3651_v21 = vmul.f32 %v5917_v28, %v3649_v34 }
0x1872   :  { %3653 = vrot.lane.b32.xlu1 %v3651_v21, %s5955_s5 }
0x18dc   :  { %v3481_v40 = vpop.permute.xlu0 %3480 }
0x18dd   :  { %3484 = vst.msk [vmem:[#allocation4 + $0x18] sm:$0xff] %vm239_vm2, %v3481_v40  ;;  %5377 = vmatmul.mubr.msk.f32.vlgmr.msra.gmra.mrb[44].mxu1 %vm239_vm2, %v3481_v40 }
0x18de   :  { %5710 = vmatpush3.bf16.msra.mxu1 %v5707_v24  ;;  %5415 = vmatprep.mubr.msk.f32.mxu1 %vm239_vm2, %v4147_v2 }
0x18df   :  { %5712 = vmatprep.subr.bf16.mxu1 %v5711_v63 }
0x18e2   :  { %5714 = vmatpush3.bf16.msra.mxu1 %v5711_v63 }
0x18e4   :  { %v3654_v19 = vpop.permute.xlu1 %3653  ;;  %v3844_v13 = vld [vmem:[#allocation4 + $0x18] sm:$0xff] }
0x18e5   :  { %3657 = vst.msk [vmem:[#allocation4 + $0x30] sm:$0xff] %vm239_vm2, %v3654_v19  ;;  %5366 = vmatmul.mubr.msk.f32.vlgmr.msra.gmra.mrb[40].mxu0 %vm239_vm2, %v3654_v19  ;;  %5416 = vmatmul.mubr.msk.f32.vlgmr.msra.gmra.mrb[46].mxu1 %vm239_vm2, %v4148_v4 }
0x18e6   :  { %5694 = vmatpush3.bf16.msra.mxu0 %v5691_v49  ;;  %5387 = vmatprep.mubr.msk.f32.mxu0 %vm239_vm2, %v3841_v5 }
0x18e7   :  { %5418 = vmatprep.mubr.msk.f32.mxu1 %vm239_vm2, %v4149_v6  ;;  %5696 = vmatprep.subr.bf16.mxu0 %v5695_v3  ;;  %v6824_v6 = vld [vmem:[%s6985_s11] ss:$0 sm:$0xff] }
0x18e9   :  { %5419 = vmatmul.mubr.msk.f32.gmra.mrb[48].mxu1 %vm239_vm2, %v4150_v17 }
0x18ea   :  { %5698 = vmatpush3.bf16.msra.mxu0 %v5695_v3  ;;  %5421 = vmatprep.mubr.msk.f32.mxu1 %vm239_vm2, %v4151_v55 }
0x18eb   :  { %5700 = vmatprep.subr.bf16.mxu0 %v5699_v30 }
0x18ec   :  { %v3952_v20 = vld [vmem:[#allocation4 + $0x30] sm:$0xff] }
0x18ed   :  { %5388 = vmatmul.mubr.msk.f32.vlgmr.msra.gmra.mrb[42].mxu0 %vm239_vm2, %v3842_v8  ;;  %5422 = vmatmul.mubr.msk.f32.gmra.mrb[50].mxu1 %vm239_vm2, %v4152_v11 }
0x18ee   :  { %5390 = vmatprep.mubr.msk.f32.mxu0 %vm239_vm2, %v3843_v58  ;;  %5702 = vmatpush3.bf16.msra.mxu0 %v5699_v30 }
0x18ef   :  { %5424 = vmatprep.mubr.msk.f32.mxu1 %vm239_vm2, %v4153_v12  ;;  %5704 = vmatprep.subr.bf16.mxu0 %v5703_v47 }
0x18f1   :  { %5391 = vmatmul.mubr.msk.f32.gmra.mrb[44].mxu0 %vm239_vm2, %v3844_v13  ;;  %5425 = vmatmul.mubr.msk.f32.gmra.mrb[52].mxu1 %vm239_vm2, %v4154_v18 }
0x18f2   :  { %5706 = vmatpush3.bf16.msra.mxu0 %v5703_v47  ;;  %5401 = vmatprep.mubr.msk.f32.mxu0 %vm239_vm2, %v3950_v41 }
0x18f5   :  { %5402 = vmatmul.mubr.msk.f32.vlgmr.msra.gmra.mrb[42].mxu0 %vm239_vm2, %v3951_v23 }
0x18f6   :  { %5404 = vmatprep.mubr.msk.f32.mxu0 %vm239_vm2, %v3952_v20 }
0x19b0   :  { %v3798_v50 = vpop.f32.mrb[44].mxu1 }
0x19b1   :  { %v5378_v52 = vpop.f32.mrb[45].mxu1 }
0x19b8   :  { %v3726_v10 = vpop.f32.mrb[40].mxu0  ;;  %v5417_v59 = vpop.f32.mrb[46].mxu1 }
0x19b9   :  { %v3799_v0 = vadd.f32 %v3798_v50, %v3726_v10  ;;  %v6772_v46 = vadd.f32 %v5417_v59, %v4653_v16  ;;  %v5367_v25 = vpop.f32.mrb[41].mxu0  ;;  %v4256_v15 = vpop.f32.mrb[47].mxu1 }
0x19ba   :  { %v6774_v61 = vadd.f32 %v4653_v16, %v4256_v15 }
0x19bb   :  { %v6777_v22 = vadd.f32 %v6647_v48, %v3799_v0  ;;  %v4296_v26 = vsel %vm239_vm2, %v6772_v46, 0.0  ;;  %v4318_v27 = vmul.f32 %v6772_v46, %v6772_v46 }
0x19bc   :  { %v4295_v28 = vsel %vm239_vm2, %v6774_v61, 0.0  ;;  %v4317_v29 = vmul.f32 %v6774_v61, %v6774_v61  ;;  %v5420_v31 = vpop.f32.mrb[48].mxu1 }
0x19bd   :  { %5922 = vtanh.f32 %v6777_v22  ;;  %v4326_v32 = vsel %vm239_vm2, %v4318_v27, 0.0  ;;  %v4297_v35 = vadd.f32 %v4296_v26, %v4295_v28  ;;  %v4266_v48 = vpop.f32.mrb[49].mxu1  ;;  %v6790_v9 = vadd.f32 %v5420_v31, %v4653_v16 }
0x19be   :  { %v4325_v36 = vsel %vm239_vm2, %v4317_v29, 0.0  ;;  %v6792_v57 = vadd.f32 %v4653_v16, %v4266_v48 }
0x19bf   :  { %v4327_v37 = vadd.f32 %v4326_v32, %v4325_v36  ;;  %v4320_v14 = vmul.f32 %v6790_v9, %v6790_v9  ;;  %v4300_v1 = vsel %vm239_vm2, %v6790_v9, 0.0 }
0x19c0   :  { %v4298_v39 = vsel %vm239_vm2, %v6792_v57, 0.0  ;;  %v4319_v24 = vmul.f32 %v6792_v57, %v6792_v57  ;;  %v5423_v42 = vpop.f32.mrb[50].mxu1 }
0x19c1   :  { %v4299_v43 = vadd.f32 %v4298_v39, %v4297_v35  ;;  %v6800_v45 = vadd.f32 %v5423_v42, %v4653_v16  ;;  %v4276_v49 = vpop.f32.mrb[51].mxu1  ;;  %v4330_v62 = vsel %vm239_vm2, %v4320_v14, 0.0 }
0x19c2   :  { %v4328_v54 = vsel %vm239_vm2, %v4319_v24, 0.0  ;;  %v6805_v34 = vadd.f32 %v4653_v16, %v4276_v49 }
0x19c3   :  { %v4329_v21 = vadd.f32 %v4328_v54, %v4327_v37  ;;  %v4301_v60 = vadd.f32 %v4300_v1, %v4299_v43  ;;  %v4322_v63 = vmul.f32 %v6800_v45, %v6800_v45  ;;  %v4304_v53 = vsel %vm239_vm2, %v6800_v45, 0.0 }
0x19c4   :  { %v4302_v40 = vsel %vm239_vm2, %v6805_v34, 0.0  ;;  %v4321_v2 = vmul.f32 %v6805_v34, %v6805_v34  ;;  %v5426_v33 = vpop.f32.mrb[52].mxu1 }
0x19c5   :  { %v4303_v44 = vadd.f32 %v4302_v40, %v4301_v60  ;;  %v4331_v3 = vadd.f32 %v4330_v62, %v4329_v21  ;;  %v6814_v19 = vadd.f32 %v5426_v33, %v4653_v16  ;;  %v4286_v4 = vpop.f32.mrb[53].mxu1  ;;  %v4334_v51 = vsel %vm239_vm2, %v4322_v63, 0.0 }
0x19c6   :  { %v4332_v56 = vsel %vm239_vm2, %v4321_v2, 0.0  ;;  %v6819_v5 = vadd.f32 %v4653_v16, %v4286_v4 }
0x19c7   :  { %v5923_v30 = vpop.eup %5922  ;;  %v4333_v17 = vadd.f32 %v4332_v56, %v4331_v3  ;;  %v4305_v7 = vadd.f32 %v4304_v53, %v4303_v44  ;;  %v4324_v55 = vmul.f32 %v6814_v19, %v6814_v19  ;;  %v4308_v41 = vsel %vm239_vm2, %v6814_v19, 0.0 }
0x19c8   :  { %v4306_v47 = vsel %vm239_vm2, %v6819_v5, 0.0  ;;  %v4323_v8 = vmul.f32 %v6819_v5, %v6819_v5  ;;  %v5403_v11 = vpop.f32.mrb[42].mxu0  ;;  %3812 = vrot.lane.b32.xlu0 %v5923_v30, %s5954_s30 }
0x19c9   :  { %v4307_v58 = vadd.f32 %v4306_v47, %v4305_v7  ;;  %v4335_v12 = vadd.f32 %v4334_v51, %v4333_v17  ;;  %v6835_v13 = vadd.f32 %v5403_v11, %v6824_v6  ;;  %v4036_v18 = vpop.f32.mrb[43].mxu0  ;;  %v4338_v16 = vsel %vm239_vm2, %v4324_v55, 0.0 }
0x19ca   :  { %v4336_v23 = vsel %vm239_vm2, %v4323_v8, 0.0  ;;  %v6841_v20 = vadd.f32 %v6824_v6, %v4036_v18 }
0x19cb   :  { %v4309_v50 = vadd.f32 %v4308_v41, %v4307_v58  ;;  %v4337_v52 = vadd.f32 %v4336_v23, %v4335_v12  ;;  %v4075_v10 = vand.u32 2147483647, %v6835_v13  ;;  %vm4067_vm5 = vcmp.ne.f32.partialorder %v6835_v13, %v6835_v13 }
0x19cc   :  { %v4074_v25 = vand.u32 2147483647, %v6841_v20  ;;  %v4062_v11 = vmax.f32 %v6841_v20, 0.0  ;;  %vm4066_vm7 = vcmp.ne.f32.partialorder %v6841_v20, %v6841_v20 }
0x19cd   :  { %v4310_v59 = vrot.slane %v4309_v50, 4  ;;  %v4339_v0 = vadd.f32 %v4338_v16, %v4337_v52  ;;  %v4079_v15 = vsub.f32 0.0, %v4075_v10 }
0x19ce   :  { %v4078_v28 = vsub.f32 0.0, %v4074_v25 }
0x19cf   :  { %v4311_v26 = vadd.f32 %v4310_v59, %v4309_v50  ;;  %v4340_v27 = vrot.slane %v4339_v0, 4  ;;  %v4084_v29 = vmul.f32 1.442695, %v4079_v15 }
0x19d0   :  { %v4082_v35 = vmul.f32 1.442695, %v4078_v28 }
0x19d1   :  { %v4312_v31 = vrot.slane %v4311_v26, 2  ;;  %v4341_v32 = vadd.f32 %v4340_v27, %v4339_v0  ;;  %5924 = vpow2.f32 %v4084_v29 }
0x19d2   :  { %5926 = vpow2.f32 %v4082_v35 }
0x19d3   :  { %v4313_v48 = vadd.f32 %v4312_v31, %v4311_v26  ;;  %v4342_v36 = vrot.slane %v4341_v32, 2 }
0x19d5   :  { %v4314_v37 = vrot.slane %v4313_v48, 1  ;;  %v4343_v14 = vadd.f32 %v4342_v36, %v4341_v32 }
0x19d7   :  { %v4315_v39 = vadd.f32 %v4314_v37, %v4313_v48  ;;  %v4344_v24 = vrot.slane %v4343_v14, 1  ;;  %v4643_v48 = vmul.f32 -1.442695, %v6777_v22  ;;  %v4405_v22 = vld [vmem:[%s6987_s16] sm:$0xff] }
0x19d9   :  { %v6846_v42 = vmul.f32 0.015625, %v4315_v39  ;;  %v4345_v43 = vadd.f32 %v4344_v24, %v4343_v14 }
0x19db   :  { %v4346_v49 = vmul.f32 0.015625, %v4345_v43  ;;  %v4347_v1 = vmul.f32 %v6846_v42, %v6846_v42  ;;  %v4355_v54 = vsub.f32 %v6819_v5, %v6846_v42  ;;  %v4349_v21 = vsub.f32 %v6774_v61, %v6846_v42  ;;  %v5925_v60 = vpop.eup %5924 }
0x19dc   :  { %v4350_v62 = vsub.f32 %v6772_v46, %v6846_v42  ;;  %v4351_v63 = vsub.f32 %v6792_v57, %v6846_v42  ;;  %v4352_v40 = vsub.f32 %v6790_v9, %v6846_v42  ;;  %v4353_v2 = vsub.f32 %v6805_v34, %v6846_v42  ;;  %v5927_v33 = vpop.eup %5926 }
0x19dd   :  { %v4348_v44 = vsub.f32 %v4346_v49, %v4347_v1  ;;  %v4099_v3 = vadd.f32 1.0, %v5925_v60  ;;  %v4090_v4 = vadd.f32 1.0, %v5927_v33  ;;  %v4354_v61 = vsub.f32 %v6800_v45, %v6846_v42  ;;  %v4406_v49 = vld [vmem:[%s6987_s16 + $0x8] sm:$0xff] }
0x19de   :  { %v4356_v46 = vsub.f32 %v6814_v19, %v6846_v42  ;;  %v4102_v57 = vmul.f32 -0.5, %v5925_v60  ;;  %v4093_v56 = vmul.f32 -0.5, %v5927_v33  ;;  %v4059_v9 = vlaneseq }
0x19df   :  { %v4357_v53 = vadd.f32 1e-05, %v4348_v44  ;;  %5928 = vlog2.f32 %v4099_v3  ;;  %v4105_v30 = vand.u32 2147483647, %v5925_v60  ;;  %v4096_v17 = vand.u32 2147483647, %v5927_v33 }
0x19e0   :  { %5930 = vlog2.f32 %v4090_v4  ;;  %v4103_v5 = vadd.f32 1.0, %v4102_v57  ;;  %v4094_v34 = vadd.f32 1.0, %v4093_v56  ;;  %v6866_v51 = vand.u32 127, %v4059_v9 }
0x19e1   :  { %5932 = vrsqrt.f32 %v4357_v53  ;;  %v4063_v45 = vmax.f32 %v6835_v13, 0.0  ;;  %vm4106_vm3 = vcmp.lt.f32.partialorder %v4105_v30, 0.0004427343  ;;  %vm4097_vm4 = vcmp.lt.f32.partialorder %v4096_v17, 0.0004427343 }
0x19e2   :  { %v4104_v8 = vmul.f32 %v5925_v60, %v4103_v5  ;;  %v4095_v12 = vmul.f32 %v5927_v33, %v4094_v34  ;;  %vm4061_vm6 = vcmp.lt.s32.totalorder %v6866_v51, 2  ;;  %5934 = vpow2.f32 %v4643_v48  ;;  %v4663_v33 = vld [vmem:[%s6989_s15] ss:$0 sm:$0xff] }
0x19e3   :  { %v5715_v1 = vpack.c.bf16 %v4406_v49, %v4405_v22 }
0x19e5   :  { %5716 = vmatprep.subr.bf16.mxu0 %v5715_v1 }
0x19e6   :  { %5718 = vmatpush3.bf16.msra.mxu0 %v5715_v1 }
0x19e9   :  { %v5929_v7 = vpop.eup %5928 }
0x19ea   :  { %v5931_v55 = vpop.eup %5930  ;;  %v4101_v47 = vmul.f32 0.6931472, %v5929_v7 }
0x19eb   :  { %v5933_v58 = vpop.eup %5932  ;;  %v4092_v19 = vmul.f32 0.6931472, %v5931_v55 }
0x19ec   :  { %v6870_v18 = vmul.f32 %v5933_v58, %v4355_v54  ;;  %v4107_v41 = vsel %vm4106_vm3, %v4104_v8, %v4101_v47  ;;  %v4359_v23 = vmul.f32 %v5933_v58, %v4349_v21  ;;  %v4360_v50 = vmul.f32 %v5933_v58, %v4350_v62  ;;  %v4408_v54 = vld [vmem:[%s6987_s16 + $0x18] sm:$0xff] }
0x19ed   :  { %v4127_v52 = vadd.f32 %v4107_v41, %v4063_v45  ;;  %v4098_v16 = vsel %vm4097_vm4, %v4095_v12, %v4092_v19  ;;  %v4361_v10 = vmul.f32 %v5933_v58, %v4351_v63  ;;  %v4362_v59 = vmul.f32 %v5933_v58, %v4352_v40  ;;  %v4662_v63 = vld [vmem:[%s6988_s14] ss:$0 sm:$0xff] }
0x19ee   :  { %v4126_v0 = vadd.f32 %v4098_v16, %v4062_v11  ;;  %v4363_v15 = vmul.f32 %v5933_v58, %v4353_v2  ;;  %v4364_v31 = vmul.f32 %v5933_v58, %v4354_v61  ;;  %v4366_v35 = vmul.f32 %v5933_v58, %v4356_v46 }
0x19ef   :  { %v4131_v25 = vsel %vm4067_vm5, %v6835_v13, %v4127_v52  ;;  %v4374_v2 = vmul.f32 %v4662_v63, %v4359_v23  ;;  %v4375_v44 = vmul.f32 %v4662_v63, %v4360_v50  ;;  %v4376_v4 = vmul.f32 %v4662_v63, %v4361_v10  ;;  %v4664_v10 = vld [vmem:[%s6990_s17] ss:$0 sm:$0xff] }
0x19f0   :  { %v4135_v26 = vadd.f32 1e-06, %v4131_v25  ;;  %v4130_v27 = vsel %vm4066_vm7, %v6841_v20, %v4126_v0  ;;  %v4377_v53 = vmul.f32 %v4662_v63, %v4362_v59  ;;  %v4378_v9 = vmul.f32 %v4662_v63, %v4363_v15 }
0x19f1   :  { %v4134_v28 = vadd.f32 1e-06, %v4130_v27  ;;  %v4389_v3 = vadd.f32 %v4663_v33, %v4374_v2  ;;  %v4390_v61 = vadd.f32 %v4663_v33, %v4375_v44  ;;  %v4391_v56 = vadd.f32 %v4663_v33, %v4376_v4 }
0x19f2   :  { %v4139_v29 = vsel %vm4061_vm6, %v6835_v13, %v4135_v26  ;;  %v5935_v13 = vpop.eup %5934  ;;  %v4392_v30 = vadd.f32 %v4663_v33, %v4377_v53  ;;  %v4379_v34 = vmul.f32 %v4662_v63, %v4364_v31  ;;  %v4380_v17 = vmul.f32 %v4662_v63, %v6870_v18 }
0x19f3   :  { %4144 = vst.msk [vmem:[%s6986_s18 + $0x8] sm:$0xff] %vm4142_vm8, %v4139_v29  ;;  %v4138_v32 = vsel %vm4061_vm6, %v6841_v20, %v4134_v28  ;;  %v3806_v36 = vadd.f32 1.0, %v5935_v13  ;;  %v4397_v57 = vmax.f32 %v4389_v3, 0.0  ;;  %v4398_v5 = vmax.f32 %v4390_v61, 0.0 }
0x19f4   :  { %4143 = vst.msk [vmem:[%s6986_s18] sm:$0xff] %vm4142_vm8, %v4138_v32  ;;  %v4399_v7 = vmax.f32 %v4391_v56, 0.0  ;;  %v4393_v55 = vadd.f32 %v4663_v33, %v4378_v9  ;;  %v4400_v45 = vmax.f32 %v4392_v30, 0.0  ;;  %v4394_v47 = vadd.f32 %v4663_v33, %v4379_v34 }
0x19f5   :  { %5936 = vrcp.f32 %v3806_v36  ;;  %v4381_v8 = vmul.f32 %v4662_v63, %v4366_v35  ;;  %v4395_v58 = vadd.f32 %v4663_v33, %v4380_v17 }
0x19f6   :  { %v4401_v11 = vmax.f32 %v4393_v55, 0.0  ;;  %v4402_v19 = vmax.f32 %v4394_v47, 0.0 }
0x19f7   :  { %v4396_v12 = vadd.f32 %v4663_v33, %v4381_v8  ;;  %v4403_v41 = vmax.f32 %v4395_v58, 0.0 }
0x19f9   :  { %v4404_v18 = vmax.f32 %v4396_v12, 0.0 }
0x19ff   :  { %v5937_v37 = vpop.eup %5936 }
0x1a00   :  { %v3810_v24 = vmul.f32 %v5937_v37, %v6707_v38  ;;  %v4407_v38 = vld [vmem:[%s6987_s16 + $0x10] sm:$0xff] }
0x1a01   :  { %v5719_v21 = vpack.c.bf16 %v4408_v54, %v4407_v38 }
0x1a03   :  { %5720 = vmatprep.subr.bf16.mxu0 %v5719_v21 }
0x1a04   :  { %5722 = vmatpush3.bf16.msra.mxu0 %v5719_v21 }
0x1a3a   :  { %v3813_v14 = vpop.permute.xlu0 %3812 }
0x1a3b   :  { %v3815_v39 = vmul.f32 %v5937_v37, %v3813_v14 }
0x1a3d   :  { %3817 = vrot.lane.b32.xlu1 %v3815_v39, %s5954_s30 }
0x1aaf   :  { %v3818_v20 = vpop.permute.xlu1 %3817 }
0x1ab0   :  { %v3820_v42 = vadd.f32 %v3818_v20, %v3810_v24 }
0x1ab2   :  { %5938 = vtanh.f32 %v3820_v42 }
0x1abc   :  { %v5939_v43 = vpop.eup %5938 }
0x1abd   :  { %3823 = vrot.lane.b32.xlu0 %v5939_v43, %s5954_s30 }
0x1b2f   :  { %v3824_v60 = vpop.permute.xlu0 %3823 }
0x1b30   :  { %v3826_v62 = vmul.f32 %v5937_v37, %v3824_v60 }
0x1b32   :  { %3828 = vrot.lane.b32.xlu1 %v3826_v62, %s5955_s5 }
0x1ba4   :  { %v3829_v40 = vpop.permute.xlu1 %3828 }
0x1ba5   :  { %3832 = vst.msk [vmem:[#allocation4 + $0x38] sm:$0xff] %vm239_vm2, %v3829_v40 }
0x1bac   :  { %v3953_v46 = vld [vmem:[#allocation4 + $0x38] sm:$0xff] }
0x1bad   :  { %5405 = vmatmul.mubr.msk.f32.gmra.mrb[44].mxu0 %vm239_vm2, %v3953_v46 }
0x1bae   :  { %5435 = vmatprep.mubr.msk.f32.mxu0 %vm239_vm2, %v4397_v57 }
0x1bb1   :  { %5436 = vmatmul.mubr.msk.f32.vlgmr.msra.gmra.mrb[46].mxu0 %vm239_vm2, %v4398_v5 }
0x1bb2   :  { %5438 = vmatprep.mubr.msk.f32.mxu0 %vm239_vm2, %v4399_v7 }
0x1bb5   :  { %5439 = vmatmul.mubr.msk.f32.gmra.mrb[48].mxu0 %vm239_vm2, %v4400_v45 }
0x1bb6   :  { %5441 = vmatprep.mubr.msk.f32.mxu0 %vm239_vm2, %v4401_v11 }
0x1bb9   :  { %5442 = vmatmul.mubr.msk.f32.gmra.mrb[50].mxu0 %vm239_vm2, %v4402_v19 }
0x1bba   :  { %5444 = vmatprep.mubr.msk.f32.mxu0 %vm239_vm2, %v4403_v41 }
0x1bbd   :  { %5445 = vmatmul.mubr.msk.f32.gmra.mrb[52].mxu0 %vm239_vm2, %v4404_v18 }
0x1c80   :  { %v5406_v23 = vpop.f32.mrb[44].mxu0 }
0x1c81   :  { %v6928_v50 = vadd.f32 %v5406_v23, %v6824_v6  ;;  %v4046_v52 = vpop.f32.mrb[45].mxu0 }
0x1c82   :  { %v6931_v16 = vadd.f32 %v6824_v6, %v4046_v52 }
0x1c83   :  { %v4077_v59 = vand.u32 2147483647, %v6928_v50  ;;  %v4065_v11 = vmax.f32 %v6928_v50, 0.0  ;;  %vm4069_vm12 = vcmp.ne.f32.partialorder %v6928_v50, %v6928_v50 }
0x1c84   :  { %v4076_v0 = vand.u32 2147483647, %v6931_v16  ;;  %v5437_v25 = vpop.f32.mrb[46].mxu0  ;;  %v4064_v41 = vmax.f32 %v6931_v16, 0.0  ;;  %vm4068_vm13 = vcmp.ne.f32.partialorder %v6931_v16, %v6931_v16 }
0x1c85   :  { %v4081_v15 = vsub.f32 0.0, %v4077_v59  ;;  %v4512_v26 = vadd.f32 %v5437_v25, %v4664_v10  ;;  %v4506_v27 = vpop.f32.mrb[47].mxu0 }
0x1c86   :  { %v4080_v28 = vsub.f32 0.0, %v4076_v0  ;;  %v4507_v29 = vadd.f32 %v4664_v10, %v4506_v27 }
0x1c87   :  { %v4088_v31 = vmul.f32 1.442695, %v4081_v15  ;;  %v4547_v32 = vsel %vm4545_vm9, %v4512_v26, 0.0 }
0x1c88   :  { %v4086_v6 = vmul.f32 1.442695, %v4080_v28  ;;  %v4546_v35 = vsel %vm4545_vm9, %v4507_v29, 0.0  ;;  %v5440_v48 = vpop.f32.mrb[48].mxu0 }
0x1c89   :  { %5940 = vpow2.f32 %v4088_v31  ;;  %v4548_v13 = vadd.f32 %v4547_v32, %v4546_v35  ;;  %v4516_v36 = vpop.f32.mrb[49].mxu0  ;;  %v4522_v37 = vadd.f32 %v5440_v48, %v4664_v10 }
0x1c8a   :  { %5942 = vpow2.f32 %v4086_v6  ;;  %v4517_v14 = vadd.f32 %v4664_v10, %v4516_v36 }
0x1c8b   :  { %v4551_v43 = vsel %vm4545_vm9, %v4522_v37, 0.0 }
0x1c8c   :  { %v4549_v39 = vsel %vm4545_vm9, %v4517_v14, 0.0  ;;  %v5443_v24 = vpop.f32.mrb[50].mxu0 }
0x1c8d   :  { %v4550_v20 = vadd.f32 %v4549_v39, %v4548_v13  ;;  %v4526_v42 = vpop.f32.mrb[51].mxu0  ;;  %v4532_v22 = vadd.f32 %v5443_v24, %v4664_v10 }
0x1c8e   :  { %v4527_v49 = vadd.f32 %v4664_v10, %v4526_v42 }
0x1c8f   :  { %v4552_v1 = vadd.f32 %v4551_v43, %v4550_v20  ;;  %v4555_v62 = vsel %vm4545_vm9, %v4532_v22, 0.0 }
0x1c90   :  { %v4553_v38 = vsel %vm4545_vm9, %v4527_v49, 0.0  ;;  %v5446_v54 = vpop.f32.mrb[52].mxu0 }
0x1c91   :  { %v4554_v21 = vadd.f32 %v4553_v38, %v4552_v1  ;;  %v4536_v60 = vpop.f32.mrb[53].mxu0  ;;  %v4542_v63 = vadd.f32 %v5446_v54, %v4664_v10 }
0x1c92   :  { %v4537_v40 = vadd.f32 %v4664_v10, %v4536_v60 }
0x1c93   :  { %v5941_v2 = vpop.eup %5940  ;;  %v4556_v33 = vadd.f32 %v4555_v62, %v4554_v21  ;;  %v4559_v46 = vsel %vm4545_vm9, %v4542_v63, 0.0 }
0x1c94   :  { %v5943_v44 = vpop.eup %5942  ;;  %v4117_v3 = vadd.f32 1.0, %v5941_v2  ;;  %v4557_v4 = vsel %vm4545_vm9, %v4537_v40, 0.0  ;;  %v4120_v56 = vmul.f32 -0.5, %v5941_v2  ;;  %v4123_v34 = vand.u32 2147483647, %v5941_v2 }
0x1c95   :  { %v4108_v61 = vadd.f32 1.0, %v5943_v44  ;;  %v4558_v53 = vadd.f32 %v4557_v4, %v4556_v33  ;;  %v4111_v5 = vmul.f32 -0.5, %v5943_v44  ;;  %v4114_v7 = vand.u32 2147483647, %v5943_v44 }
0x1c96   :  { %5944 = vlog2.f32 %v4117_v3  ;;  %v4121_v30 = vadd.f32 1.0, %v4120_v56  ;;  %vm4124_vm10 = vcmp.lt.f32.partialorder %v4123_v34, 0.0004427343 }
0x1c97   :  { %5946 = vlog2.f32 %v4108_v61  ;;  %v4560_v57 = vadd.f32 %v4559_v46, %v4558_v53  ;;  %v4112_v17 = vadd.f32 1.0, %v4111_v5  ;;  %vm4115_vm11 = vcmp.lt.f32.partialorder %v4114_v7, 0.0004427343 }
0x1c98   :  { %v4122_v8 = vmul.f32 %v5941_v2, %v4121_v30 }
0x1c99   :  { %v4562_v9 = vmul.f32 0.125, %v4560_v57  ;;  %v4113_v19 = vmul.f32 %v5943_v44, %v4112_v17 }
0x1c9b   :  { %4563 = vst.msk [vmem:[%s6991_s19] sm:$0xff] %vm4545_vm9, %v4562_v9 }
0x1ca0   :  { %v5945_v55 = vpop.eup %5944 }
0x1ca1   :  { %v5947_v45 = vpop.eup %5946  ;;  %v4119_v47 = vmul.f32 0.6931472, %v5945_v55 }
0x1ca2   :  { %v4110_v58 = vmul.f32 0.6931472, %v5947_v45 }
0x1ca3   :  { %v4125_v12 = vsel %vm4124_vm10, %v4122_v8, %v4119_v47 }
0x1ca4   :  { %v4129_v18 = vadd.f32 %v4125_v12, %v4065_v11  ;;  %v4116_v23 = vsel %vm4115_vm11, %v4113_v19, %v4110_v58 }
0x1ca5   :  { %v4128_v52 = vadd.f32 %v4116_v23, %v4064_v41 }
0x1ca6   :  { %v4133_v10 = vsel %vm4069_vm12, %v6928_v50, %v4129_v18 }
0x1ca7   :  { %v4137_v59 = vadd.f32 1e-06, %v4133_v10  ;;  %v4132_v0 = vsel %vm4068_vm13, %v6931_v16, %v4128_v52 }
0x1ca8   :  { %v4136_v25 = vadd.f32 1e-06, %v4132_v0 }
0x1ca9   :  { %v4141_v15 = vsel %vm4061_vm6, %v6928_v50, %v4137_v59 }
0x1caa   :  { %4146 = vst.msk [vmem:[%s6986_s18 + $0x18] sm:$0xff] %vm4142_vm8, %v4141_v15  ;;  %v4140_v26 = vsel %vm4061_vm6, %v6931_v16, %v4136_v25 }
0x1cab   :  { %4145 = vst.msk [vmem:[%s6986_s18 + $0x10] sm:$0xff] %vm4142_vm8, %v4140_v26 }

</bundles_post_ra>
